<compile_context>
chip_gen: v6e
topology: v6e:2x2x1
jax: 0.10.0
libtpu: 0.0.40
codegen_flags: <defaults>
</compile_context>

<pallas_src>
import jax
import jax.numpy as jnp
import numpy as np
from jax.experimental import pallas as pl
from jax.experimental.pallas import tpu as pltpu


# ----------------------------------------------------------------------------
# Fused kernel: one grid step = one image, both convs.
# ----------------------------------------------------------------------------
def _basic_block_kernel(x_ref, w1_ref, b1_ref, w2_ref, b2_ref, out_ref,
                        xpad_ref, hpad_ref):
    # x_ref   : (1, C, HW)   input image, NCHW with spatial flattened (lane-dense)
    # w?_ref  : (9, C, Cp)   conv weights, BN scale folded; cout zero-padded to Cp
    # b?_ref  : (1, C)       folded BN bias (true channels only)
    # out_ref : (1, C, HW)   output, NCHW with spatial flattened (lane-dense)
    # xpad_ref, hpad_ref : (H+2, W+2, C) VMEM scratch with zero halo ring
    _, C, HW = x_ref.shape
    Hp, Wp, _ = xpad_ref.shape
    H, W = Hp - 2, Wp - 2

    # Zero the halo scratch ONCE (grid axis is "arbitrary" => sequential, so
    # program_id 0 runs first).  Correctness relies on (a) the halo ring never
    # being written afterwards and (b) the interior being fully rewritten on
    # every grid step — both hold below.
    @pl.when(pl.program_id(0) == 0)
    def _init():
        xpad_ref[...] = jnp.zeros_like(xpad_ref)
        hpad_ref[...] = jnp.zeros_like(hpad_ref)

    def conv3x3(src_ref, w_ref):
        # 3 dx-shifted copies (the only sublane-offset relayouts); dy taps are
        # free leading-dim slices of them.  Accumulate 9 small K=C matmuls
        # instead of materializing an im2col slab.
        shifted = [src_ref[:, dx:dx + W, :] for dx in range(3)]   # (H+2, W, C)
        acc = None
        for dy in range(3):
            for dx in range(3):
                tap = shifted[dx][dy:dy + H].reshape(HW, C)       # (HW, C)
                part = jnp.dot(tap, w_ref[dy * 3 + dx],
                               preferred_element_type=jnp.float32)
                acc = part if acc is None else acc + part
        return acc                                                 # (HW, Cp)

    # (C, HW) -> (HW, C) once; reused for the halo fill AND as the residual.
    x_t = x_ref[0].T                                               # (HW, C)
    xpad_ref[1:H + 1, 1:W + 1, :] = x_t.reshape(H, W, C)

    # ---- conv1 (BN1 scale folded into weights) + BN1 bias + ReLU ----
    h1 = conv3x3(xpad_ref, w1_ref)                                 # (HW, Cp)
    h1c = jnp.maximum(h1[:, 0:C] + b1_ref[...], 0.0)               # (HW, C)
    hpad_ref[1:H + 1, 1:W + 1, :] = h1c.reshape(H, W, C)

    # ---- conv2 (BN2 scale folded) + BN2 bias + residual + ReLU ----
    h2 = conv3x3(hpad_ref, w2_ref)                                 # (HW, Cp)
    out_c = jnp.maximum(h2[:, 0:C] + b2_ref[...] + x_t, 0.0)       # (HW, C)

    # lane-dense store: (HW, C) -> (C, HW)
    out_ref[0] = out_c.T.astype(out_ref.dtype)


# ----------------------------------------------------------------------------
# Wrapper (NCHW interface, mirrors the PyTorch module)
# ----------------------------------------------------------------------------
def _fold_bn(gamma, beta, mean, var, eps=1e-5):
    scale = gamma / jnp.sqrt(var + eps)
    bias = beta - mean * scale
    return scale, bias


def _prep_conv_bn(w_hwio, scale, cpad):
    """Fold BN scale into conv weight; pad ONLY the output channels to cpad.

    Returns weights of shape (9, Cin, cpad) with tap index t = dy*3 + dx.
    The zero-padded output columns keep the (unused) pad lanes of the conv
    results exactly zero.
    """
    cin, cout = w_hwio.shape[2], w_hwio.shape[3]
    w = w_hwio.astype(jnp.float32) * scale.astype(jnp.float32)[None, None, None, :]
    w = jnp.pad(w, ((0, 0), (0, 0), (0, 0), (0, cpad - cout)))
    return w.reshape(9, cin, cpad)


@jax.jit
def basic_block_forward(x_nchw, params):
    N, C, H, W = x_nchw.shape
    Cp = ((C + 127) // 128) * 128          # lane-dense output-channel padding

    # Free metadata reshape — no NCHW->NHWC transpose / extra HBM pass.
    x_flat = x_nchw.reshape(N, C, H * W).astype(jnp.float32)

    s1, b1 = _fold_bn(params["bn1_gamma"], params["bn1_beta"],
                      params["bn1_mean"], params["bn1_var"])
    s2, b2 = _fold_bn(params["bn2_gamma"], params["bn2_beta"],
                      params["bn2_mean"], params["bn2_var"])
    w1m = _prep_conv_bn(params["w1"], s1, Cp)
    w2m = _prep_conv_bn(params["w2"], s2, Cp)
    b1r = b1.astype(jnp.float32).reshape(1, C)
    b2r = b2.astype(jnp.float32).reshape(1, C)

    out_flat = pl.pallas_call(
        _basic_block_kernel,
        out_shape=jax.ShapeDtypeStruct((N, C, H * W), jnp.float32),
        grid_spec=pltpu.PrefetchScalarGridSpec(
            num_scalar_prefetch=0,
            grid=(N,),
            in_specs=[
                # activation: blocked per image, lane-dense on HW
                pl.BlockSpec((1, C, H * W), lambda n: (n, 0, 0)),
                # weights / biases: whole-array VMEM residents (single-buffered,
                # fetched once — constant across grid steps)
                pl.BlockSpec(memory_space=pltpu.MemorySpace.VMEM),   # w1
                pl.BlockSpec(memory_space=pltpu.MemorySpace.VMEM),   # b1
                pl.BlockSpec(memory_space=pltpu.MemorySpace.VMEM),   # w2
                pl.BlockSpec(memory_space=pltpu.MemorySpace.VMEM),   # b2
            ],
            out_specs=pl.BlockSpec((1, C, H * W), lambda n: (n, 0, 0)),
            scratch_shapes=[
                pltpu.VMEM((H + 2, W + 2, C), jnp.float32),  # padded input
                pltpu.VMEM((H + 2, W + 2, C), jnp.float32),  # padded hidden
            ],
        ),
        # "arbitrary": guarantees sequential execution so the step-0 halo init
        # is seen by every later step (a multi-core "parallel" split would not
        # run step 0 on every core).
        compiler_params=pltpu.CompilerParams(
            dimension_semantics=("arbitrary",)),
    )(x_flat, w1m, b1r, w2m, b2r)

    return out_flat.reshape(N, C, H, W)    # free reshape: kernel wrote NCHW-flat


# ----------------------------------------------------------------------------
# Pure-JAX reference (for correctness check)
# ----------------------------------------------------------------------------
def basic_block_reference(x_nchw, params):
    def conv(x, w_hwio):
        return jax.lax.conv_general_dilated(
            x, w_hwio, window_strides=(1, 1), padding="SAME",
            dimension_numbers=("NCHW", "HWIO", "NCHW"))

    def bn(x, g, b, m, v, eps=1e-5):
        g = g[None, :, None, None]
        b = b[None, :, None, None]
        m = m[None, :, None, None]
        v = v[None, :, None, None]
        return (x - m) / jnp.sqrt(v + eps) * g + b

    out = conv(x_nchw, params["w1"])
    out = bn(out, params["bn1_gamma"], params["bn1_beta"],
             params["bn1_mean"], params["bn1_var"])
    out = jnp.maximum(out, 0.0)
    out = conv(out, params["w2"])
    out = bn(out, params["bn2_gamma"], params["bn2_beta"],
             params["bn2_mean"], params["bn2_var"])
    out = out + x_nchw
    return jnp.maximum(out, 0.0)


if __name__ == "__main__":
    key = jax.random.PRNGKey(0)
    N, C, H, W = 2, 4, 16, 16          # inplanes = planes = 4, stride = 1
    (k_x, k_w1, k_w2, k_g1, k_b1, k_g2, k_b2,
     k_m1, k_v1, k_m2, k_v2) = jax.random.split(key, 11)

    x = jax.random.normal(k_x, (N, C, H, W), jnp.float32)

    params = {
        # conv weights in HWIO layout (3, 3, Cin, Cout)
        "w1": jax.random.normal(k_w1, (3, 3, C, C), jnp.float32) * 0.1,
        "w2": jax.random.normal(k_w2, (3, 3, C, C), jnp.float32) * 0.1,
        "bn1_gamma": 1.0 + 0.1 * jax.random.normal(k_g1, (C,), jnp.float32),
        "bn1_beta": 0.1 * jax.random.normal(k_b1, (C,), jnp.float32),
        "bn1_mean": 0.1 * jax.random.normal(k_m1, (C,), jnp.float32),
        "bn1_var": jnp.abs(jax.random.normal(k_v1, (C,), jnp.float32)) + 0.5,
        "bn2_gamma": 1.0 + 0.1 * jax.random.normal(k_g2, (C,), jnp.float32),
        "bn2_beta": 0.1 * jax.random.normal(k_b2, (C,), jnp.float32),
        "bn2_mean": 0.1 * jax.random.normal(k_m2, (C,), jnp.float32),
        "bn2_var": jnp.abs(jax.random.normal(k_v2, (C,), jnp.float32)) + 0.5,
    }

    out = basic_block_forward(x, params)
    out = jax.block_until_ready(out)

    ref = jax.block_until_ready(basic_block_reference(x, params))
    np.testing.assert_allclose(np.asarray(out), np.asarray(ref),
                               rtol=1e-4, atol=1e-4)
    print("KERNEL_OK")
</pallas_src>

<mosaic_0001>
module attributes {stable_mosaic.version = 11 : i64} {
  func.func @_basic_block_kernel(%arg0: i32, %arg1: memref<1x4x256xf32, #tpu.memory_space<vmem>>, %arg2: memref<9x4x128xf32, #tpu.memory_space<vmem>>, %arg3: memref<1x4xf32, #tpu.memory_space<vmem>>, %arg4: memref<9x4x128xf32, #tpu.memory_space<vmem>>, %arg5: memref<1x4xf32, #tpu.memory_space<vmem>>, %arg6: memref<1x4x256xf32, #tpu.memory_space<vmem>>, %arg7: memref<18x18x4xf32, #tpu.memory_space<vmem>>, %arg8: memref<18x18x4xf32, #tpu.memory_space<vmem>>) attributes {dimension_semantics = [#tpu.dimension_semantics<arbitrary>], iteration_bounds = array<i64: 2>, scalar_prefetch = 0 : i64, scratch_operands = 2 : i64, tpu.core_type = #tpu.core_type<tc>, window_params = [{transform_indices = @transform_0, window_bounds = array<i64: 1, 4, 256>}, {pipeline_mode = #tpu.pipeline_mode<synchronous>, transform_indices = @transform_1, window_bounds = array<i64: 9, 4, 128>}, {pipeline_mode = #tpu.pipeline_mode<synchronous>, transform_indices = @transform_2, window_bounds = array<i64: 1, 4>}, {pipeline_mode = #tpu.pipeline_mode<synchronous>, transform_indices = @transform_3, window_bounds = array<i64: 9, 4, 128>}, {pipeline_mode = #tpu.pipeline_mode<synchronous>, transform_indices = @transform_4, window_bounds = array<i64: 1, 4>}, {transform_indices = @transform_5, window_bounds = array<i64: 1, 4, 256>}]} {
    %c0_i32 = arith.constant 0 : i32
    %0 = arith.cmpi eq, %arg0, %c0_i32 : i32
    %1 = arith.extui %0 : i1 to i32
    %c0_i32_0 = arith.constant 0 : i32
    %2 = arith.cmpi ne, %1, %c0_i32_0 : i32
    scf.if %2 {
      %cst_99 = arith.constant 0.000000e+00 : f32
      %139 = vector.broadcast %cst_99 : f32 to vector<18x18x4xf32>
      %c0_100 = arith.constant 0 : index
      %c0_101 = arith.constant 0 : index
      %c0_102 = arith.constant 0 : index
      %140 = vector.load %arg7[%c0_100, %c0_101, %c0_102] : memref<18x18x4xf32, #tpu.memory_space<vmem>>, vector<18x18x4xf32>
      tpu.vector_store %arg7[%c0_100, %c0_101, %c0_102], %139 {strides = array<i32>} : memref<18x18x4xf32, #tpu.memory_space<vmem>>, vector<18x18x4xf32>,
      %cst_103 = arith.constant 0.000000e+00 : f32
      %141 = vector.broadcast %cst_103 : f32 to vector<18x18x4xf32>
      %c0_104 = arith.constant 0 : index
      %c0_105 = arith.constant 0 : index
      %c0_106 = arith.constant 0 : index
      %142 = vector.load %arg8[%c0_104, %c0_105, %c0_106] : memref<18x18x4xf32, #tpu.memory_space<vmem>>, vector<18x18x4xf32>
      tpu.vector_store %arg8[%c0_104, %c0_105, %c0_106], %141 {strides = array<i32>} : memref<18x18x4xf32, #tpu.memory_space<vmem>>, vector<18x18x4xf32>,
    } else {
    }
    %c0 = arith.constant 0 : index
    %c0_1 = arith.constant 0 : index
    %c0_2 = arith.constant 0 : index
    %3 = vector.load %arg1[%c0, %c0_1, %c0_2] : memref<1x4x256xf32, #tpu.memory_space<vmem>>, vector<1x4x256xf32>
    %4 = vector.shape_cast %3 : vector<1x4x256xf32> to vector<4x256xf32>
    %5 = tpu.transpose %4, [1, 0] : vector<4x256xf32> -> vector<256x4xf32>
    %6 = vector.shape_cast %5 : vector<256x4xf32> to vector<16x16x4xf32>
    %c1 = arith.constant 1 : index
    %c1_3 = arith.constant 1 : index
    %c0_4 = arith.constant 0 : index
    %7 = vector.load %arg7[%c1, %c1_3, %c0_4] : memref<18x18x4xf32, #tpu.memory_space<vmem>>, vector<16x16x4xf32>
    tpu.vector_store %arg7[%c1, %c1_3, %c0_4], %6 {strides = array<i32>} : memref<18x18x4xf32, #tpu.memory_space<vmem>>, vector<16x16x4xf32>,
    %c0_5 = arith.constant 0 : index
    %c0_6 = arith.constant 0 : index
    %c0_7 = arith.constant 0 : index
    %8 = vector.load %arg7[%c0_5, %c0_6, %c0_7] : memref<18x18x4xf32, #tpu.memory_space<vmem>>, vector<18x16x4xf32>
    %c0_8 = arith.constant 0 : index
    %c1_9 = arith.constant 1 : index
    %c0_10 = arith.constant 0 : index
    %9 = vector.load %arg7[%c0_8, %c1_9, %c0_10] : memref<18x18x4xf32, #tpu.memory_space<vmem>>, vector<18x16x4xf32>
    %c0_11 = arith.constant 0 : index
    %c2 = arith.constant 2 : index
    %c0_12 = arith.constant 0 : index
    %10 = vector.load %arg7[%c0_11, %c2, %c0_12] : memref<18x18x4xf32, #tpu.memory_space<vmem>>, vector<18x16x4xf32>
    %11 = vector.extract_strided_slice %8 {offsets = [0, 0, 0], sizes = [16, 16, 4], strides = [1, 1, 1]} : vector<18x16x4xf32> to vector<16x16x4xf32>
    %12 = vector.shape_cast %11 : vector<16x16x4xf32> to vector<256x4xf32>
    %c0_13 = arith.constant 0 : index
    %c0_14 = arith.constant 0 : index
    %c0_15 = arith.constant 0 : index
    %13 = vector.load %arg2[%c0_13, %c0_14, %c0_15] : memref<9x4x128xf32, #tpu.memory_space<vmem>>, vector<1x4x128xf32>
    %14 = vector.shape_cast %13 : vector<1x4x128xf32> to vector<4x128xf32>
    %cst = arith.constant dense<0.000000e+00> : vector<256x128xf32>
    %15 = tpu.matmul %12, %14, %cst {dimension_numbers = #tpu.dot_dimension_numbers<[1], [0], [0], [1], [0, 0, 1, 1], [], []>} : vector<256x4xf32>, vector<4x128xf32>, vector<256x128xf32> -> vector<256x128xf32>
    %16 = vector.extract_strided_slice %9 {offsets = [0, 0, 0], sizes = [16, 16, 4], strides = [1, 1, 1]} : vector<18x16x4xf32> to vector<16x16x4xf32>
    %17 = vector.shape_cast %16 : vector<16x16x4xf32> to vector<256x4xf32>
    %c1_16 = arith.constant 1 : index
    %c0_17 = arith.constant 0 : index
    %c0_18 = arith.constant 0 : index
    %18 = vector.load %arg2[%c1_16, %c0_17, %c0_18] : memref<9x4x128xf32, #tpu.memory_space<vmem>>, vector<1x4x128xf32>
    %19 = vector.shape_cast %18 : vector<1x4x128xf32> to vector<4x128xf32>
    %cst_19 = arith.constant dense<0.000000e+00> : vector<256x128xf32>
    %20 = tpu.matmul %17, %19, %cst_19 {dimension_numbers = #tpu.dot_dimension_numbers<[1], [0], [0], [1], [0, 0, 1, 1], [], []>} : vector<256x4xf32>, vector<4x128xf32>, vector<256x128xf32> -> vector<256x128xf32>
    %21 = arith.addf %15, %20 : vector<256x128xf32>
    %22 = vector.extract_strided_slice %10 {offsets = [0, 0, 0], sizes = [16, 16, 4], strides = [1, 1, 1]} : vector<18x16x4xf32> to vector<16x16x4xf32>
    %23 = vector.shape_cast %22 : vector<16x16x4xf32> to vector<256x4xf32>
    %c2_20 = arith.constant 2 : index
    %c0_21 = arith.constant 0 : index
    %c0_22 = arith.constant 0 : index
    %24 = vector.load %arg2[%c2_20, %c0_21, %c0_22] : memref<9x4x128xf32, #tpu.memory_space<vmem>>, vector<1x4x128xf32>
    %25 = vector.shape_cast %24 : vector<1x4x128xf32> to vector<4x128xf32>
    %cst_23 = arith.constant dense<0.000000e+00> : vector<256x128xf32>
    %26 = tpu.matmul %23, %25, %cst_23 {dimension_numbers = #tpu.dot_dimension_numbers<[1], [0], [0], [1], [0, 0, 1, 1], [], []>} : vector<256x4xf32>, vector<4x128xf32>, vector<256x128xf32> -> vector<256x128xf32>
    %27 = arith.addf %21, %26 : vector<256x128xf32>
    %28 = vector.extract_strided_slice %8 {offsets = [1, 0, 0], sizes = [16, 16, 4], strides = [1, 1, 1]} : vector<18x16x4xf32> to vector<16x16x4xf32>
    %29 = vector.shape_cast %28 : vector<16x16x4xf32> to vector<256x4xf32>
    %c3 = arith.constant 3 : index
    %c0_24 = arith.constant 0 : index
    %c0_25 = arith.constant 0 : index
    %30 = vector.load %arg2[%c3, %c0_24, %c0_25] : memref<9x4x128xf32, #tpu.memory_space<vmem>>, vector<1x4x128xf32>
    %31 = vector.shape_cast %30 : vector<1x4x128xf32> to vector<4x128xf32>
    %cst_26 = arith.constant dense<0.000000e+00> : vector<256x128xf32>
    %32 = tpu.matmul %29, %31, %cst_26 {dimension_numbers = #tpu.dot_dimension_numbers<[1], [0], [0], [1], [0, 0, 1, 1], [], []>} : vector<256x4xf32>, vector<4x128xf32>, vector<256x128xf32> -> vector<256x128xf32>
    %33 = arith.addf %27, %32 : vector<256x128xf32>
    %34 = vector.extract_strided_slice %9 {offsets = [1, 0, 0], sizes = [16, 16, 4], strides = [1, 1, 1]} : vector<18x16x4xf32> to vector<16x16x4xf32>
    %35 = vector.shape_cast %34 : vector<16x16x4xf32> to vector<256x4xf32>
    %c4 = arith.constant 4 : index
    %c0_27 = arith.constant 0 : index
    %c0_28 = arith.constant 0 : index
    %36 = vector.load %arg2[%c4, %c0_27, %c0_28] : memref<9x4x128xf32, #tpu.memory_space<vmem>>, vector<1x4x128xf32>
    %37 = vector.shape_cast %36 : vector<1x4x128xf32> to vector<4x128xf32>
    %cst_29 = arith.constant dense<0.000000e+00> : vector<256x128xf32>
    %38 = tpu.matmul %35, %37, %cst_29 {dimension_numbers = #tpu.dot_dimension_numbers<[1], [0], [0], [1], [0, 0, 1, 1], [], []>} : vector<256x4xf32>, vector<4x128xf32>, vector<256x128xf32> -> vector<256x128xf32>
    %39 = arith.addf %33, %38 : vector<256x128xf32>
    %40 = vector.extract_strided_slice %10 {offsets = [1, 0, 0], sizes = [16, 16, 4], strides = [1, 1, 1]} : vector<18x16x4xf32> to vector<16x16x4xf32>
    %41 = vector.shape_cast %40 : vector<16x16x4xf32> to vector<256x4xf32>
    %c5 = arith.constant 5 : index
    %c0_30 = arith.constant 0 : index
    %c0_31 = arith.constant 0 : index
    %42 = vector.load %arg2[%c5, %c0_30, %c0_31] : memref<9x4x128xf32, #tpu.memory_space<vmem>>, vector<1x4x128xf32>
    %43 = vector.shape_cast %42 : vector<1x4x128xf32> to vector<4x128xf32>
    %cst_32 = arith.constant dense<0.000000e+00> : vector<256x128xf32>
    %44 = tpu.matmul %41, %43, %cst_32 {dimension_numbers = #tpu.dot_dimension_numbers<[1], [0], [0], [1], [0, 0, 1, 1], [], []>} : vector<256x4xf32>, vector<4x128xf32>, vector<256x128xf32> -> vector<256x128xf32>
    %45 = arith.addf %39, %44 : vector<256x128xf32>
    %46 = vector.extract_strided_slice %8 {offsets = [2, 0, 0], sizes = [16, 16, 4], strides = [1, 1, 1]} : vector<18x16x4xf32> to vector<16x16x4xf32>
    %47 = vector.shape_cast %46 : vector<16x16x4xf32> to vector<256x4xf32>
    %c6 = arith.constant 6 : index
    %c0_33 = arith.constant 0 : index
    %c0_34 = arith.constant 0 : index
    %48 = vector.load %arg2[%c6, %c0_33, %c0_34] : memref<9x4x128xf32, #tpu.memory_space<vmem>>, vector<1x4x128xf32>
    %49 = vector.shape_cast %48 : vector<1x4x128xf32> to vector<4x128xf32>
    %cst_35 = arith.constant dense<0.000000e+00> : vector<256x128xf32>
    %50 = tpu.matmul %47, %49, %cst_35 {dimension_numbers = #tpu.dot_dimension_numbers<[1], [0], [0], [1], [0, 0, 1, 1], [], []>} : vector<256x4xf32>, vector<4x128xf32>, vector<256x128xf32> -> vector<256x128xf32>
    %51 = arith.addf %45, %50 : vector<256x128xf32>
    %52 = vector.extract_strided_slice %9 {offsets = [2, 0, 0], sizes = [16, 16, 4], strides = [1, 1, 1]} : vector<18x16x4xf32> to vector<16x16x4xf32>
    %53 = vector.shape_cast %52 : vector<16x16x4xf32> to vector<256x4xf32>
    %c7 = arith.constant 7 : index
    %c0_36 = arith.constant 0 : index
    %c0_37 = arith.constant 0 : index
    %54 = vector.load %arg2[%c7, %c0_36, %c0_37] : memref<9x4x128xf32, #tpu.memory_space<vmem>>, vector<1x4x128xf32>
    %55 = vector.shape_cast %54 : vector<1x4x128xf32> to vector<4x128xf32>
    %cst_38 = arith.constant dense<0.000000e+00> : vector<256x128xf32>
    %56 = tpu.matmul %53, %55, %cst_38 {dimension_numbers = #tpu.dot_dimension_numbers<[1], [0], [0], [1], [0, 0, 1, 1], [], []>} : vector<256x4xf32>, vector<4x128xf32>, vector<256x128xf32> -> vector<256x128xf32>
    %57 = arith.addf %51, %56 : vector<256x128xf32>
    %58 = vector.extract_strided_slice %10 {offsets = [2, 0, 0], sizes = [16, 16, 4], strides = [1, 1, 1]} : vector<18x16x4xf32> to vector<16x16x4xf32>
    %59 = vector.shape_cast %58 : vector<16x16x4xf32> to vector<256x4xf32>
    %c8 = arith.constant 8 : index
    %c0_39 = arith.constant 0 : index
    %c0_40 = arith.constant 0 : index
    %60 = vector.load %arg2[%c8, %c0_39, %c0_40] : memref<9x4x128xf32, #tpu.memory_space<vmem>>, vector<1x4x128xf32>
    %61 = vector.shape_cast %60 : vector<1x4x128xf32> to vector<4x128xf32>
    %cst_41 = arith.constant dense<0.000000e+00> : vector<256x128xf32>
    %62 = tpu.matmul %59, %61, %cst_41 {dimension_numbers = #tpu.dot_dimension_numbers<[1], [0], [0], [1], [0, 0, 1, 1], [], []>} : vector<256x4xf32>, vector<4x128xf32>, vector<256x128xf32> -> vector<256x128xf32>
    %63 = arith.addf %57, %62 : vector<256x128xf32>
    %64 = vector.extract_strided_slice %63 {offsets = [0, 0], sizes = [256, 4], strides = [1, 1]} : vector<256x128xf32> to vector<256x4xf32>
    %c0_42 = arith.constant 0 : index
    %c0_43 = arith.constant 0 : index
    %65 = vector.load %arg3[%c0_42, %c0_43] : memref<1x4xf32, #tpu.memory_space<vmem>>, vector<1x4xf32>
    %66 = vector.broadcast %65 : vector<1x4xf32> to vector<256x4xf32>
    %67 = arith.addf %64, %66 : vector<256x4xf32>
    %cst_44 = arith.constant 0.000000e+00 : f32
    %68 = vector.broadcast %cst_44 : f32 to vector<256x4xf32>
    %69 = arith.maximumf %67, %68 : vector<256x4xf32>
    %70 = vector.shape_cast %69 : vector<256x4xf32> to vector<16x16x4xf32>
    %c1_45 = arith.constant 1 : index
    %c1_46 = arith.constant 1 : index
    %c0_47 = arith.constant 0 : index
    %71 = vector.load %arg8[%c1_45, %c1_46, %c0_47] : memref<18x18x4xf32, #tpu.memory_space<vmem>>, vector<16x16x4xf32>
    tpu.vector_store %arg8[%c1_45, %c1_46, %c0_47], %70 {strides = array<i32>} : memref<18x18x4xf32, #tpu.memory_space<vmem>>, vector<16x16x4xf32>,
    %c0_48 = arith.constant 0 : index
    %c0_49 = arith.constant 0 : index
    %c0_50 = arith.constant 0 : index
    %72 = vector.load %arg8[%c0_48, %c0_49, %c0_50] : memref<18x18x4xf32, #tpu.memory_space<vmem>>, vector<18x16x4xf32>
    %c0_51 = arith.constant 0 : index
    %c1_52 = arith.constant 1 : index
    %c0_53 = arith.constant 0 : index
    %73 = vector.load %arg8[%c0_51, %c1_52, %c0_53] : memref<18x18x4xf32, #tpu.memory_space<vmem>>, vector<18x16x4xf32>
    %c0_54 = arith.constant 0 : index
    %c2_55 = arith.constant 2 : index
    %c0_56 = arith.constant 0 : index
    %74 = vector.load %arg8[%c0_54, %c2_55, %c0_56] : memref<18x18x4xf32, #tpu.memory_space<vmem>>, vector<18x16x4xf32>
    %75 = vector.extract_strided_slice %72 {offsets = [0, 0, 0], sizes = [16, 16, 4], strides = [1, 1, 1]} : vector<18x16x4xf32> to vector<16x16x4xf32>
    %76 = vector.shape_cast %75 : vector<16x16x4xf32> to vector<256x4xf32>
    %c0_57 = arith.constant 0 : index
    %c0_58 = arith.constant 0 : index
    %c0_59 = arith.constant 0 : index
    %77 = vector.load %arg4[%c0_57, %c0_58, %c0_59] : memref<9x4x128xf32, #tpu.memory_space<vmem>>, vector<1x4x128xf32>
    %78 = vector.shape_cast %77 : vector<1x4x128xf32> to vector<4x128xf32>
    %cst_60 = arith.constant dense<0.000000e+00> : vector<256x128xf32>
    %79 = tpu.matmul %76, %78, %cst_60 {dimension_numbers = #tpu.dot_dimension_numbers<[1], [0], [0], [1], [0, 0, 1, 1], [], []>} : vector<256x4xf32>, vector<4x128xf32>, vector<256x128xf32> -> vector<256x128xf32>
    %80 = vector.extract_strided_slice %73 {offsets = [0, 0, 0], sizes = [16, 16, 4], strides = [1, 1, 1]} : vector<18x16x4xf32> to vector<16x16x4xf32>
    %81 = vector.shape_cast %80 : vector<16x16x4xf32> to vector<256x4xf32>
    %c1_61 = arith.constant 1 : index
    %c0_62 = arith.constant 0 : index
    %c0_63 = arith.constant 0 : index
    %82 = vector.load %arg4[%c1_61, %c0_62, %c0_63] : memref<9x4x128xf32, #tpu.memory_space<vmem>>, vector<1x4x128xf32>
    %83 = vector.shape_cast %82 : vector<1x4x128xf32> to vector<4x128xf32>
    %cst_64 = arith.constant dense<0.000000e+00> : vector<256x128xf32>
    %84 = tpu.matmul %81, %83, %cst_64 {dimension_numbers = #tpu.dot_dimension_numbers<[1], [0], [0], [1], [0, 0, 1, 1], [], []>} : vector<256x4xf32>, vector<4x128xf32>, vector<256x128xf32> -> vector<256x128xf32>
    %85 = arith.addf %79, %84 : vector<256x128xf32>
    %86 = vector.extract_strided_slice %74 {offsets = [0, 0, 0], sizes = [16, 16, 4], strides = [1, 1, 1]} : vector<18x16x4xf32> to vector<16x16x4xf32>
    %87 = vector.shape_cast %86 : vector<16x16x4xf32> to vector<256x4xf32>
    %c2_65 = arith.constant 2 : index
    %c0_66 = arith.constant 0 : index
    %c0_67 = arith.constant 0 : index
    %88 = vector.load %arg4[%c2_65, %c0_66, %c0_67] : memref<9x4x128xf32, #tpu.memory_space<vmem>>, vector<1x4x128xf32>
    %89 = vector.shape_cast %88 : vector<1x4x128xf32> to vector<4x128xf32>
    %cst_68 = arith.constant dense<0.000000e+00> : vector<256x128xf32>
    %90 = tpu.matmul %87, %89, %cst_68 {dimension_numbers = #tpu.dot_dimension_numbers<[1], [0], [0], [1], [0, 0, 1, 1], [], []>} : vector<256x4xf32>, vector<4x128xf32>, vector<256x128xf32> -> vector<256x128xf32>
    %91 = arith.addf %85, %90 : vector<256x128xf32>
    %92 = vector.extract_strided_slice %72 {offsets = [1, 0, 0], sizes = [16, 16, 4], strides = [1, 1, 1]} : vector<18x16x4xf32> to vector<16x16x4xf32>
    %93 = vector.shape_cast %92 : vector<16x16x4xf32> to vector<256x4xf32>
    %c3_69 = arith.constant 3 : index
    %c0_70 = arith.constant 0 : index
    %c0_71 = arith.constant 0 : index
    %94 = vector.load %arg4[%c3_69, %c0_70, %c0_71] : memref<9x4x128xf32, #tpu.memory_space<vmem>>, vector<1x4x128xf32>
    %95 = vector.shape_cast %94 : vector<1x4x128xf32> to vector<4x128xf32>
    %cst_72 = arith.constant dense<0.000000e+00> : vector<256x128xf32>
    %96 = tpu.matmul %93, %95, %cst_72 {dimension_numbers = #tpu.dot_dimension_numbers<[1], [0], [0], [1], [0, 0, 1, 1], [], []>} : vector<256x4xf32>, vector<4x128xf32>, vector<256x128xf32> -> vector<256x128xf32>
    %97 = arith.addf %91, %96 : vector<256x128xf32>
    %98 = vector.extract_strided_slice %73 {offsets = [1, 0, 0], sizes = [16, 16, 4], strides = [1, 1, 1]} : vector<18x16x4xf32> to vector<16x16x4xf32>
    %99 = vector.shape_cast %98 : vector<16x16x4xf32> to vector<256x4xf32>
    %c4_73 = arith.constant 4 : index
    %c0_74 = arith.constant 0 : index
    %c0_75 = arith.constant 0 : index
    %100 = vector.load %arg4[%c4_73, %c0_74, %c0_75] : memref<9x4x128xf32, #tpu.memory_space<vmem>>, vector<1x4x128xf32>
    %101 = vector.shape_cast %100 : vector<1x4x128xf32> to vector<4x128xf32>
    %cst_76 = arith.constant dense<0.000000e+00> : vector<256x128xf32>
    %102 = tpu.matmul %99, %101, %cst_76 {dimension_numbers = #tpu.dot_dimension_numbers<[1], [0], [0], [1], [0, 0, 1, 1], [], []>} : vector<256x4xf32>, vector<4x128xf32>, vector<256x128xf32> -> vector<256x128xf32>
    %103 = arith.addf %97, %102 : vector<256x128xf32>
    %104 = vector.extract_strided_slice %74 {offsets = [1, 0, 0], sizes = [16, 16, 4], strides = [1, 1, 1]} : vector<18x16x4xf32> to vector<16x16x4xf32>
    %105 = vector.shape_cast %104 : vector<16x16x4xf32> to vector<256x4xf32>
    %c5_77 = arith.constant 5 : index
    %c0_78 = arith.constant 0 : index
    %c0_79 = arith.constant 0 : index
    %106 = vector.load %arg4[%c5_77, %c0_78, %c0_79] : memref<9x4x128xf32, #tpu.memory_space<vmem>>, vector<1x4x128xf32>
    %107 = vector.shape_cast %106 : vector<1x4x128xf32> to vector<4x128xf32>
    %cst_80 = arith.constant dense<0.000000e+00> : vector<256x128xf32>
    %108 = tpu.matmul %105, %107, %cst_80 {dimension_numbers = #tpu.dot_dimension_numbers<[1], [0], [0], [1], [0, 0, 1, 1], [], []>} : vector<256x4xf32>, vector<4x128xf32>, vector<256x128xf32> -> vector<256x128xf32>
    %109 = arith.addf %103, %108 : vector<256x128xf32>
    %110 = vector.extract_strided_slice %72 {offsets = [2, 0, 0], sizes = [16, 16, 4], strides = [1, 1, 1]} : vector<18x16x4xf32> to vector<16x16x4xf32>
    %111 = vector.shape_cast %110 : vector<16x16x4xf32> to vector<256x4xf32>
    %c6_81 = arith.constant 6 : index
    %c0_82 = arith.constant 0 : index
    %c0_83 = arith.constant 0 : index
    %112 = vector.load %arg4[%c6_81, %c0_82, %c0_83] : memref<9x4x128xf32, #tpu.memory_space<vmem>>, vector<1x4x128xf32>
    %113 = vector.shape_cast %112 : vector<1x4x128xf32> to vector<4x128xf32>
    %cst_84 = arith.constant dense<0.000000e+00> : vector<256x128xf32>
    %114 = tpu.matmul %111, %113, %cst_84 {dimension_numbers = #tpu.dot_dimension_numbers<[1], [0], [0], [1], [0, 0, 1, 1], [], []>} : vector<256x4xf32>, vector<4x128xf32>, vector<256x128xf32> -> vector<256x128xf32>
    %115 = arith.addf %109, %114 : vector<256x128xf32>
    %116 = vector.extract_strided_slice %73 {offsets = [2, 0, 0], sizes = [16, 16, 4], strides = [1, 1, 1]} : vector<18x16x4xf32> to vector<16x16x4xf32>
    %117 = vector.shape_cast %116 : vector<16x16x4xf32> to vector<256x4xf32>
    %c7_85 = arith.constant 7 : index
    %c0_86 = arith.constant 0 : index
    %c0_87 = arith.constant 0 : index
    %118 = vector.load %arg4[%c7_85, %c0_86, %c0_87] : memref<9x4x128xf32, #tpu.memory_space<vmem>>, vector<1x4x128xf32>
    %119 = vector.shape_cast %118 : vector<1x4x128xf32> to vector<4x128xf32>
    %cst_88 = arith.constant dense<0.000000e+00> : vector<256x128xf32>
    %120 = tpu.matmul %117, %119, %cst_88 {dimension_numbers = #tpu.dot_dimension_numbers<[1], [0], [0], [1], [0, 0, 1, 1], [], []>} : vector<256x4xf32>, vector<4x128xf32>, vector<256x128xf32> -> vector<256x128xf32>
    %121 = arith.addf %115, %120 : vector<256x128xf32>
    %122 = vector.extract_strided_slice %74 {offsets = [2, 0, 0], sizes = [16, 16, 4], strides = [1, 1, 1]} : vector<18x16x4xf32> to vector<16x16x4xf32>
    %123 = vector.shape_cast %122 : vector<16x16x4xf32> to vector<256x4xf32>
    %c8_89 = arith.constant 8 : index
    %c0_90 = arith.constant 0 : index
    %c0_91 = arith.constant 0 : index
    %124 = vector.load %arg4[%c8_89, %c0_90, %c0_91] : memref<9x4x128xf32, #tpu.memory_space<vmem>>, vector<1x4x128xf32>
    %125 = vector.shape_cast %124 : vector<1x4x128xf32> to vector<4x128xf32>
    %cst_92 = arith.constant dense<0.000000e+00> : vector<256x128xf32>
    %126 = tpu.matmul %123, %125, %cst_92 {dimension_numbers = #tpu.dot_dimension_numbers<[1], [0], [0], [1], [0, 0, 1, 1], [], []>} : vector<256x4xf32>, vector<4x128xf32>, vector<256x128xf32> -> vector<256x128xf32>
    %127 = arith.addf %121, %126 : vector<256x128xf32>
    %128 = vector.extract_strided_slice %127 {offsets = [0, 0], sizes = [256, 4], strides = [1, 1]} : vector<256x128xf32> to vector<256x4xf32>
    %c0_93 = arith.constant 0 : index
    %c0_94 = arith.constant 0 : index
    %129 = vector.load %arg5[%c0_93, %c0_94] : memref<1x4xf32, #tpu.memory_space<vmem>>, vector<1x4xf32>
    %130 = vector.broadcast %129 : vector<1x4xf32> to vector<256x4xf32>
    %131 = arith.addf %128, %130 : vector<256x4xf32>
    %132 = arith.addf %131, %5 : vector<256x4xf32>
    %cst_95 = arith.constant 0.000000e+00 : f32
    %133 = vector.broadcast %cst_95 : f32 to vector<256x4xf32>
    %134 = arith.maximumf %132, %133 : vector<256x4xf32>
    %135 = tpu.transpose %134, [1, 0] : vector<256x4xf32> -> vector<4x256xf32>
    %c0_96 = arith.constant 0 : index
    %c0_97 = arith.constant 0 : index
    %c0_98 = arith.constant 0 : index
    %136 = vector.load %arg6[%c0_96, %c0_97, %c0_98] : memref<1x4x256xf32, #tpu.memory_space<vmem>>, vector<1x4x256xf32>
    %137 = vector.shape_cast %136 : vector<1x4x256xf32> to vector<4x256xf32>
    %138 = vector.shape_cast %135 : vector<4x256xf32> to vector<1x4x256xf32>
    tpu.vector_store %arg6[%c0_96, %c0_97, %c0_98], %138 {strides = array<i32>} : memref<1x4x256xf32, #tpu.memory_space<vmem>>, vector<1x4x256xf32>,
    return
  }
  func.func @transform_0(%arg0: i32) -> (i32, i32, i32) {
    %c0_i32 = arith.constant 0 : i32
    %c0_i32_0 = arith.constant 0 : i32
    %c0_i32_1 = arith.constant 0 : i32
    return %arg0, %c0_i32, %c0_i32_0 : i32, i32, i32
  }
  func.func @transform_1(%arg0: i32) -> (i32, i32, i32) {
    %c0_i32 = arith.constant 0 : i32
    %c0_i32_0 = arith.constant 0 : i32
    %c0_i32_1 = arith.constant 0 : i32
    %c0_i32_2 = arith.constant 0 : i32
    return %c0_i32, %c0_i32_0, %c0_i32_1 : i32, i32, i32
  }
  func.func @transform_2(%arg0: i32) -> (i32, i32) {
    %c0_i32 = arith.constant 0 : i32
    %c0_i32_0 = arith.constant 0 : i32
    %c0_i32_1 = arith.constant 0 : i32
    return %c0_i32, %c0_i32_0 : i32, i32
  }
  func.func @transform_3(%arg0: i32) -> (i32, i32, i32) {
    %c0_i32 = arith.constant 0 : i32
    %c0_i32_0 = arith.constant 0 : i32
    %c0_i32_1 = arith.constant 0 : i32
    %c0_i32_2 = arith.constant 0 : i32
    return %c0_i32, %c0_i32_0, %c0_i32_1 : i32, i32, i32
  }
  func.func @transform_4(%arg0: i32) -> (i32, i32) {
    %c0_i32 = arith.constant 0 : i32
    %c0_i32_0 = arith.constant 0 : i32
    %c0_i32_1 = arith.constant 0 : i32
    return %c0_i32, %c0_i32_0 : i32, i32
  }
  func.func @transform_5(%arg0: i32) -> (i32, i32, i32) {
    %c0_i32 = arith.constant 0 : i32
    %c0_i32_0 = arith.constant 0 : i32
    %c0_i32_1 = arith.constant 0 : i32
    return %arg0, %c0_i32, %c0_i32_0 : i32, i32, i32
  }
}

</mosaic_0001>

<bundles_post_ra>
// kernel: basic_block_forward.1
= control target key start
LH: loop header
LB: loop body
LE: loop exit
PB: predicated region body
PF: predicated region fallthrough
CT: control target
= control target key end

     0   :  { %s8393_s18 = smov 0   ;;  %s11707_s0 = inlined_call_operand.vmem [shape: f32[2,4,256], index: 0, kind: input, shape index: {}]   ;;  %s11708_s1 = inlined_call_operand.vmem [shape: f32[9,4,128], index: 1, kind: input, shape index: {}]   ;;  %s11709_s2 = inlined_call_operand.vmem [shape: f32[1,4], index: 2, kind: input, shape index: {}]   ;;  %s11710_s3 = inlined_call_operand.vmem [shape: f32[9,4,128], index: 3, kind: input, shape index: {}]   ;;  %s11711_s4 = inlined_call_operand.vmem [shape: f32[1,4], index: 4, kind: input, shape index: {}]   ;;  %s11712_s5 = inlined_call_operand.vmem [shape: f32[2,4,256], index: 5, kind: output, shape index: {}]  }
   0x1 LB: > { %s6223_s19 = sadd.s32 4294967295, %s8360_s18   ;;  %p6227_p0 = scmp.ge.s32.totalorder %s8360_s18, 1  ;;  %s8360_s18 = sphi %s8393_s18, %s15_s18  }
   0x2   : > { %p187_p1 = scmp.lt.s32.totalorder %s8360_s18, 3 }
   0x4   : > { %p188_p2 = pnand %p6227_p0, %p187_p1 }
   0x6   : > { %191 = sbr.rel (%p188_p2) target bundleno = 1382 (0x566), region = 40 }
   0xb   : > { %p215_p3 = scmp.lt.s32.totalorder %s6223_s19, 1  ;;  %p6232_p4 = scmp.ne.s32.totalorder %s6223_s19, 0 }
   0xd   : > { %s216_s20 = scalar_select %p215_p3, %s6223_s19, 1 }
   0xe   : > { %228 = sbr.rel (%p6232_p4) target bundleno = 74 (0x4a), region = 44 }
   0xf   : > { %s6847_s21 = sshll.u32 %s216_s20, 3 }
  0x10   : > { %s8404_s24 = scalar_lea.vmem %s11707_s0, %s6847_s21  ;;  %s8409_s27 = scalar_lea.vmem %s11712_s5, %s6847_s21 }
  0x13   : > { %vm229_vm0 = vcmask 31744   ;;  %vm232_vm1 = vcmask 25600   ;;  %v8362_v0 = vmov 0.0  }
  0x14   : > { %230 = vst.msk [vmem:[#allocation2] sm:$0xff] %vm229_vm0, %v8362_v0  ;;  %231 = vst.msk [vmem:[#allocation2 + $0x8] sm:$0xff] %vm229_vm0, %v8362_v0 }
  0x15   : > { %234 = vst.msk [vmem:[#allocation2 + $0x18] sm:$0xff] %vm229_vm0, %v8362_v0  ;;  %235 = vst.msk [vmem:[#allocation2 + $0x20] sm:$0xff] %vm229_vm0, %v8362_v0 }
  0x16   : > { %237 = vst.msk [vmem:[#allocation2 + $0x30] sm:$0xff] %vm229_vm0, %v8362_v0  ;;  %238 = vst.msk [vmem:[#allocation2 + $0x38] sm:$0xff] %vm229_vm0, %v8362_v0 }
  0x17   : > { %240 = vst.msk [vmem:[#allocation2 + $0x48] sm:$0xff] %vm229_vm0, %v8362_v0  ;;  %241 = vst.msk [vmem:[#allocation2 + $0x50] sm:$0xff] %vm229_vm0, %v8362_v0 }
  0x18   : > { %243 = vst.msk [vmem:[#allocation2 + $0x60] sm:$0xff] %vm229_vm0, %v8362_v0  ;;  %244 = vst.msk [vmem:[#allocation2 + $0x68] sm:$0xff] %vm229_vm0, %v8362_v0 }
  0x19   : > { %246 = vst.msk [vmem:[#allocation2 + $0x78] sm:$0xff] %vm229_vm0, %v8362_v0  ;;  %247 = vst.msk [vmem:[#allocation2 + $0x80] sm:$0xff] %vm229_vm0, %v8362_v0 }
  0x1a   : > { %249 = vst.msk [vmem:[#allocation2 + $0x90] sm:$0xff] %vm229_vm0, %v8362_v0  ;;  %250 = vst.msk [vmem:[#allocation2 + $0x98] sm:$0xff] %vm229_vm0, %v8362_v0 }
  0x1b   : > { %252 = vst.msk [vmem:[#allocation2 + $0xa8] sm:$0xff] %vm229_vm0, %v8362_v0  ;;  %253 = vst.msk [vmem:[#allocation2 + $0xb0] sm:$0xff] %vm229_vm0, %v8362_v0 }
  0x1c   : > { %255 = vst.msk [vmem:[#allocation2 + $0xc0] sm:$0xff] %vm229_vm0, %v8362_v0  ;;  %256 = vst.msk [vmem:[#allocation2 + $0xc8] sm:$0xff] %vm229_vm0, %v8362_v0 }
  0x1d   : > { %258 = vst.msk [vmem:[#allocation2 + $0xd8] sm:$0xff] %vm229_vm0, %v8362_v0  ;;  %259 = vst.msk [vmem:[#allocation2 + $0xe0] sm:$0xff] %vm229_vm0, %v8362_v0 }
  0x1e   : > { %261 = vst.msk [vmem:[#allocation2 + $0xf0] sm:$0xff] %vm229_vm0, %v8362_v0  ;;  %262 = vst.msk [vmem:[#allocation2 + $0xf8] sm:$0xff] %vm229_vm0, %v8362_v0 }
  0x1f   : > { %264 = vst.msk [vmem:[#allocation2 + $0x108] sm:$0xff] %vm229_vm0, %v8362_v0  ;;  %265 = vst.msk [vmem:[#allocation2 + $0x110] sm:$0xff] %vm229_vm0, %v8362_v0 }
  0x20   : > { %267 = vst.msk [vmem:[#allocation2 + $0x120] sm:$0xff] %vm229_vm0, %v8362_v0  ;;  %268 = vst.msk [vmem:[#allocation2 + $0x128] sm:$0xff] %vm229_vm0, %v8362_v0 }
  0x21   : > { %270 = vst.msk [vmem:[#allocation2 + $0x138] sm:$0xff] %vm229_vm0, %v8362_v0  ;;  %271 = vst.msk [vmem:[#allocation2 + $0x140] sm:$0xff] %vm229_vm0, %v8362_v0 }
  0x22   : > { %273 = vst.msk [vmem:[#allocation2 + $0x150] sm:$0xff] %vm229_vm0, %v8362_v0  ;;  %274 = vst.msk [vmem:[#allocation2 + $0x158] sm:$0xff] %vm229_vm0, %v8362_v0 }
  0x23   : > { %276 = vst.msk [vmem:[#allocation2 + $0x168] sm:$0xff] %vm229_vm0, %v8362_v0  ;;  %277 = vst.msk [vmem:[#allocation2 + $0x170] sm:$0xff] %vm229_vm0, %v8362_v0 }
  0x24   : > { %279 = vst.msk [vmem:[#allocation2 + $0x180] sm:$0xff] %vm229_vm0, %v8362_v0  ;;  %280 = vst.msk [vmem:[#allocation2 + $0x188] sm:$0xff] %vm229_vm0, %v8362_v0 }
  0x25   : > { %282 = vst.msk [vmem:[#allocation2 + $0x198] sm:$0xff] %vm229_vm0, %v8362_v0  ;;  %283 = vst.msk [vmem:[#allocation2 + $0x1a0] sm:$0xff] %vm229_vm0, %v8362_v0 }
  0x26   : > { %285 = vst.msk [vmem:[#allocation3] sm:$0xff] %vm229_vm0, %v8362_v0  ;;  %286 = vst.msk [vmem:[#allocation3 + $0x8] sm:$0xff] %vm229_vm0, %v8362_v0 }
  0x27   : > { %288 = vst.msk [vmem:[#allocation3 + $0x18] sm:$0xff] %vm229_vm0, %v8362_v0  ;;  %289 = vst.msk [vmem:[#allocation3 + $0x20] sm:$0xff] %vm229_vm0, %v8362_v0 }
  0x28   : > { %291 = vst.msk [vmem:[#allocation3 + $0x30] sm:$0xff] %vm229_vm0, %v8362_v0  ;;  %292 = vst.msk [vmem:[#allocation3 + $0x38] sm:$0xff] %vm229_vm0, %v8362_v0 }
  0x29   : > { %294 = vst.msk [vmem:[#allocation3 + $0x48] sm:$0xff] %vm229_vm0, %v8362_v0  ;;  %295 = vst.msk [vmem:[#allocation3 + $0x50] sm:$0xff] %vm229_vm0, %v8362_v0 }
  0x2a   : > { %297 = vst.msk [vmem:[#allocation3 + $0x60] sm:$0xff] %vm229_vm0, %v8362_v0  ;;  %298 = vst.msk [vmem:[#allocation3 + $0x68] sm:$0xff] %vm229_vm0, %v8362_v0 }
  0x2b   : > { %300 = vst.msk [vmem:[#allocation3 + $0x78] sm:$0xff] %vm229_vm0, %v8362_v0  ;;  %301 = vst.msk [vmem:[#allocation3 + $0x80] sm:$0xff] %vm229_vm0, %v8362_v0 }
  0x2c   : > { %303 = vst.msk [vmem:[#allocation3 + $0x90] sm:$0xff] %vm229_vm0, %v8362_v0  ;;  %304 = vst.msk [vmem:[#allocation3 + $0x98] sm:$0xff] %vm229_vm0, %v8362_v0 }
  0x2d   : > { %306 = vst.msk [vmem:[#allocation3 + $0xa8] sm:$0xff] %vm229_vm0, %v8362_v0  ;;  %307 = vst.msk [vmem:[#allocation3 + $0xb0] sm:$0xff] %vm229_vm0, %v8362_v0 }
  0x2e   : > { %309 = vst.msk [vmem:[#allocation3 + $0xc0] sm:$0xff] %vm229_vm0, %v8362_v0  ;;  %310 = vst.msk [vmem:[#allocation3 + $0xc8] sm:$0xff] %vm229_vm0, %v8362_v0 }
  0x2f   : > { %312 = vst.msk [vmem:[#allocation3 + $0xd8] sm:$0xff] %vm229_vm0, %v8362_v0  ;;  %313 = vst.msk [vmem:[#allocation3 + $0xe0] sm:$0xff] %vm229_vm0, %v8362_v0 }
  0x30   : > { %315 = vst.msk [vmem:[#allocation3 + $0xf0] sm:$0xff] %vm229_vm0, %v8362_v0  ;;  %316 = vst.msk [vmem:[#allocation3 + $0xf8] sm:$0xff] %vm229_vm0, %v8362_v0 }
  0x31   : > { %318 = vst.msk [vmem:[#allocation3 + $0x108] sm:$0xff] %vm229_vm0, %v8362_v0  ;;  %319 = vst.msk [vmem:[#allocation3 + $0x110] sm:$0xff] %vm229_vm0, %v8362_v0 }
  0x32   : > { %321 = vst.msk [vmem:[#allocation3 + $0x120] sm:$0xff] %vm229_vm0, %v8362_v0  ;;  %322 = vst.msk [vmem:[#allocation3 + $0x128] sm:$0xff] %vm229_vm0, %v8362_v0 }
  0x33   : > { %324 = vst.msk [vmem:[#allocation3 + $0x138] sm:$0xff] %vm229_vm0, %v8362_v0  ;;  %325 = vst.msk [vmem:[#allocation3 + $0x140] sm:$0xff] %vm229_vm0, %v8362_v0 }
  0x34   : > { %327 = vst.msk [vmem:[#allocation3 + $0x150] sm:$0xff] %vm229_vm0, %v8362_v0  ;;  %328 = vst.msk [vmem:[#allocation3 + $0x158] sm:$0xff] %vm229_vm0, %v8362_v0 }
  0x35   : > { %330 = vst.msk [vmem:[#allocation3 + $0x168] sm:$0xff] %vm229_vm0, %v8362_v0  ;;  %331 = vst.msk [vmem:[#allocation3 + $0x170] sm:$0xff] %vm229_vm0, %v8362_v0 }
  0x36   : > { %333 = vst.msk [vmem:[#allocation3 + $0x180] sm:$0xff] %vm229_vm0, %v8362_v0  ;;  %334 = vst.msk [vmem:[#allocation3 + $0x188] sm:$0xff] %vm229_vm0, %v8362_v0 }
  0x37   : > { %336 = vst.msk [vmem:[#allocation3 + $0x198] sm:$0xff] %vm229_vm0, %v8362_v0  ;;  %337 = vst.msk [vmem:[#allocation3 + $0x1a0] sm:$0xff] %vm229_vm0, %v8362_v0 }
  0x38   : > { %233 = vst.msk [vmem:[#allocation2 + $0x10] sm:$0x3] %vm232_vm1, %v8362_v0  ;;  %236 = vst.msk [vmem:[#allocation2 + $0x28] sm:$0x3] %vm232_vm1, %v8362_v0 }
  0x39   : > { %239 = vst.msk [vmem:[#allocation2 + $0x40] sm:$0x3] %vm232_vm1, %v8362_v0  ;;  %242 = vst.msk [vmem:[#allocation2 + $0x58] sm:$0x3] %vm232_vm1, %v8362_v0 }
  0x3a   : > { %245 = vst.msk [vmem:[#allocation2 + $0x70] sm:$0x3] %vm232_vm1, %v8362_v0  ;;  %248 = vst.msk [vmem:[#allocation2 + $0x88] sm:$0x3] %vm232_vm1, %v8362_v0 }
  0x3b   : > { %251 = vst.msk [vmem:[#allocation2 + $0xa0] sm:$0x3] %vm232_vm1, %v8362_v0  ;;  %254 = vst.msk [vmem:[#allocation2 + $0xb8] sm:$0x3] %vm232_vm1, %v8362_v0 }
  0x3c   : > { %257 = vst.msk [vmem:[#allocation2 + $0xd0] sm:$0x3] %vm232_vm1, %v8362_v0  ;;  %260 = vst.msk [vmem:[#allocation2 + $0xe8] sm:$0x3] %vm232_vm1, %v8362_v0 }
  0x3d   : > { %263 = vst.msk [vmem:[#allocation2 + $0x100] sm:$0x3] %vm232_vm1, %v8362_v0  ;;  %266 = vst.msk [vmem:[#allocation2 + $0x118] sm:$0x3] %vm232_vm1, %v8362_v0 }
  0x3e   : > { %269 = vst.msk [vmem:[#allocation2 + $0x130] sm:$0x3] %vm232_vm1, %v8362_v0  ;;  %272 = vst.msk [vmem:[#allocation2 + $0x148] sm:$0x3] %vm232_vm1, %v8362_v0 }
  0x3f   : > { %275 = vst.msk [vmem:[#allocation2 + $0x160] sm:$0x3] %vm232_vm1, %v8362_v0  ;;  %278 = vst.msk [vmem:[#allocation2 + $0x178] sm:$0x3] %vm232_vm1, %v8362_v0 }
  0x40   : > { %281 = vst.msk [vmem:[#allocation2 + $0x190] sm:$0x3] %vm232_vm1, %v8362_v0  ;;  %284 = vst.msk [vmem:[#allocation2 + $0x1a8] sm:$0x3] %vm232_vm1, %v8362_v0 }
  0x41   : > { %287 = vst.msk [vmem:[#allocation3 + $0x10] sm:$0x3] %vm232_vm1, %v8362_v0  ;;  %290 = vst.msk [vmem:[#allocation3 + $0x28] sm:$0x3] %vm232_vm1, %v8362_v0 }
  0x42   : > { %293 = vst.msk [vmem:[#allocation3 + $0x40] sm:$0x3] %vm232_vm1, %v8362_v0  ;;  %296 = vst.msk [vmem:[#allocation3 + $0x58] sm:$0x3] %vm232_vm1, %v8362_v0 }
  0x43   : > { %299 = vst.msk [vmem:[#allocation3 + $0x70] sm:$0x3] %vm232_vm1, %v8362_v0  ;;  %302 = vst.msk [vmem:[#allocation3 + $0x88] sm:$0x3] %vm232_vm1, %v8362_v0 }
  0x44   : > { %305 = vst.msk [vmem:[#allocation3 + $0xa0] sm:$0x3] %vm232_vm1, %v8362_v0  ;;  %308 = vst.msk [vmem:[#allocation3 + $0xb8] sm:$0x3] %vm232_vm1, %v8362_v0 }
  0x45   : > { %311 = vst.msk [vmem:[#allocation3 + $0xd0] sm:$0x3] %vm232_vm1, %v8362_v0  ;;  %314 = vst.msk [vmem:[#allocation3 + $0xe8] sm:$0x3] %vm232_vm1, %v8362_v0 }
  0x46   : > { %317 = vst.msk [vmem:[#allocation3 + $0x100] sm:$0x3] %vm232_vm1, %v8362_v0  ;;  %320 = vst.msk [vmem:[#allocation3 + $0x118] sm:$0x3] %vm232_vm1, %v8362_v0 }
  0x47   : > { %323 = vst.msk [vmem:[#allocation3 + $0x130] sm:$0x3] %vm232_vm1, %v8362_v0  ;;  %326 = vst.msk [vmem:[#allocation3 + $0x148] sm:$0x3] %vm232_vm1, %v8362_v0 }
  0x48   : > { %329 = vst.msk [vmem:[#allocation3 + $0x160] sm:$0x3] %vm232_vm1, %v8362_v0  ;;  %332 = vst.msk [vmem:[#allocation3 + $0x178] sm:$0x3] %vm232_vm1, %v8362_v0 }
  0x49   : > { %335 = vst.msk [vmem:[#allocation3 + $0x190] sm:$0x3] %vm232_vm1, %v8362_v0  ;;  %338 = vst.msk [vmem:[#allocation3 + $0x1a8] sm:$0x3] %vm232_vm1, %v8362_v0 }
  0x4a PF: > { %v339_v1 = vld [vmem:[%s8404_s24] sm:$0xff]  ;;  %vm648_vm2 = vcmask 1043456   ;;  %vm408_vm3 = vcmask 31744   ;;  %v478_v6 = vld [vmem:[#allocation2 + $0x9] sm:$0xff]  ;;  %v8838_v56 = vld [vmem:[%s11708_s1 + $0x14] sm:$0xf] }
  0x4b   : > { %343 = vxpose.xlu0.b32.start.end [1/1] (short) %v339_v1, 128  ;;  %v6233_v2 = vld [vmem:[%s11708_s1 + $0x4] sm:$0xf]  ;;  %v549_v3 = vld [vmem:[%s11708_s1] sm:$0xf]  ;;  %v442_v7 = vld [vmem:[#allocation2 + $0x8] sm:$0xff]  ;;  %v341_v8 = vcombine.high %v339_v1, %v339_v1 }
  0x4c   : > { %v477_v4 = vld [vmem:[#allocation2 + $0x1] sm:$0xff]  ;;  %7443 = vmatprep.subr.msk.mxu0 %vm648_vm2, %v6233_v2  ;;  %7493 = vmatprep.subr.msk.mxu1 %vm648_vm2, %v549_v3  ;;  %v6334_v10 = vld [vmem:[%s11708_s1 + $0xc] sm:$0xf]  ;;  %v8654_v11 = vld [vmem:[%s11708_s1 + $0x10] sm:$0xf] }
  0x4d   : > { %v441_v5 = vld [vmem:[#allocation2] sm:$0xff]  ;;  %7444 = vmatpush3.msk.msra.mxu0 %vm648_vm2, %v6233_v2  ;;  %7445 = vmatprep.mubr.msk.f32.mxu0 %vm408_vm3, %v477_v4  ;;  %v6300_v9 = vld [vmem:[%s11708_s1 + $0x8] sm:$0xf] }
  0x4e   : > { %7494 = vmatpush3.msk.msra.mxu1 %vm648_vm2, %v549_v3  ;;  %7495 = vmatprep.mubr.msk.f32.mxu1 %vm408_vm3, %v441_v5 }
  0x4f   : > { %7446 = vmatmul.mubr.msk.f32.vlgmr.msra.gmra.mxu0 %vm408_vm3, %v478_v6  ;;  %7496 = vmatmul.mubr.msk.f32.vlgmr.msra.gmra.mxu1 %vm408_vm3, %v442_v7 }
  0x50   : > { %7543 = vmatprep.subr.msk.mxu0 %vm648_vm2, %v6300_v9  ;;  %7593 = vmatprep.subr.msk.mxu1 %vm648_vm2, %v6334_v10 }
  0x51   : > { %7544 = vmatpush3.msk.msra.mxu0 %vm648_vm2, %v6300_v9  ;;  %7594 = vmatpush3.msk.msra.mxu1 %vm648_vm2, %v6334_v10 }
  0x52   : > { %7643 = vmatprep.subr.msk.mxu0 %vm648_vm2, %v8654_v11  ;;  %7693 = vmatprep.subr.msk.mxu1 %vm648_vm2, %v8838_v56 }
  0x88   : > { %375 = vxpose.xlu0.b32.start.end [1/1] (short) %v341_v8, 128 }
  0xc7   : > { %v8659_v12 = vpop.trf.xlu0 }
  0xc8   : > { %11832 = vst [vmem:[#allocation4_spill] sm:$0xff] %v8659_v12  ;;  %409 = vst.msk [vmem:[#allocation2 + $0x19] sm:$0xff] %vm408_vm3, %v8659_v12 }
  0xcb   : > { %v8663_v13 = vpop.trf.xlu0 }
  0xcc   : > { %11833 = vst [vmem:[#allocation5_spill] sm:$0xff] %v8663_v13  ;;  %410 = vst.msk [vmem:[#allocation2 + $0x21] sm:$0xff] %vm408_vm3, %v8663_v13 }
  0xcf   : > { %v8667_v14 = vpop.trf.xlu0  ;;  %v8669_v15 = vld [vmem:[#allocation2 + $0x19] sm:$0xff] }
  0xd0   : > { %11834 = vst [vmem:[#allocation6_spill] sm:$0xff] %v8667_v14  ;;  %v8671_v16 = vld [vmem:[#allocation2 + $0x18] sm:$0xff]  ;;  %411 = vst.msk [vmem:[#allocation2 + $0x31] sm:$0xff] %vm408_vm3, %v8667_v14  ;;  %7448 = vmatprep.mubr.msk.f32.mxu0 %vm408_vm3, %v8669_v15 }
  0xd1   : > { %7498 = vmatprep.mubr.msk.f32.mxu1 %vm408_vm3, %v8671_v16 }
  0xd3   : > { %v8679_v17 = vpop.trf.xlu0  ;;  %v8681_v18 = vld [vmem:[#allocation2 + $0x21] sm:$0xff] }
  0xd4   : > { %11835 = vst [vmem:[#allocation7_spill] sm:$0xff] %v8679_v17  ;;  %v8683_v19 = vld [vmem:[#allocation2 + $0x20] sm:$0xff]  ;;  %412 = vst.msk [vmem:[#allocation2 + $0x39] sm:$0xff] %vm408_vm3, %v8679_v17  ;;  %7449 = vmatmul.mubr.msk.f32.gmra.mxu0 %vm408_vm3, %v8681_v18 }
  0xd5   : > { %7499 = vmatmul.mubr.msk.f32.gmra.mxu1 %vm408_vm3, %v8683_v19 }
  0xd7   : > { %v8691_v20 = vpop.trf.xlu0  ;;  %v8693_v21 = vld [vmem:[#allocation2 + $0x31] sm:$0xff] }
  0xd8   : > { %11836 = vst [vmem:[#allocation8_spill] sm:$0xff] %v8691_v20  ;;  %v8695_v22 = vld [vmem:[#allocation2 + $0x30] sm:$0xff]  ;;  %413 = vst.msk [vmem:[#allocation2 + $0x49] sm:$0xff] %vm408_vm3, %v8691_v20  ;;  %7451 = vmatprep.mubr.msk.f32.mxu0 %vm408_vm3, %v8693_v21 }
  0xd9   : > { %7501 = vmatprep.mubr.msk.f32.mxu1 %vm408_vm3, %v8695_v22 }
  0xdb   : > { %v8703_v23 = vpop.trf.xlu0  ;;  %v8705_v24 = vld [vmem:[#allocation2 + $0x39] sm:$0xff] }
  0xdc   : > { %11837 = vst [vmem:[#allocation9_spill] sm:$0xff] %v8703_v23  ;;  %v8707_v25 = vld [vmem:[#allocation2 + $0x38] sm:$0xff]  ;;  %414 = vst.msk [vmem:[#allocation2 + $0x51] sm:$0xff] %vm408_vm3, %v8703_v23  ;;  %7452 = vmatmul.mubr.msk.f32.gmra.mxu0 %vm408_vm3, %v8705_v24 }
  0xdd   : > { %7502 = vmatmul.mubr.msk.f32.gmra.mxu1 %vm408_vm3, %v8707_v25 }
  0xdf   : > { %v8715_v26 = vpop.trf.xlu0  ;;  %v8717_v27 = vld [vmem:[#allocation2 + $0x49] sm:$0xff] }
  0xe0   : > { %11838 = vst [vmem:[#allocation10_spill] sm:$0xff] %v8715_v26  ;;  %v8719_v28 = vld [vmem:[#allocation2 + $0x48] sm:$0xff]  ;;  %415 = vst.msk [vmem:[#allocation2 + $0x61] sm:$0xff] %vm408_vm3, %v8715_v26  ;;  %7454 = vmatprep.mubr.msk.f32.mxu0 %vm408_vm3, %v8717_v27 }
  0xe1   : > { %11839 = vst [vmem:[#allocation11_spill] sm:$0xff] %v8719_v28  ;;  %7504 = vmatprep.mubr.msk.f32.mxu1 %vm408_vm3, %v8719_v28 }
  0xe3   : > { %v8727_v29 = vpop.trf.xlu0  ;;  %v8729_v30 = vld [vmem:[#allocation2 + $0x51] sm:$0xff] }
  0xe4   : > { %11840 = vst [vmem:[#allocation12_spill] sm:$0xff] %v8727_v29  ;;  %v8731_v31 = vld [vmem:[#allocation2 + $0x50] sm:$0xff]  ;;  %416 = vst.msk [vmem:[#allocation2 + $0x69] sm:$0xff] %vm408_vm3, %v8727_v29  ;;  %7455 = vmatmul.mubr.msk.f32.gmra.mxu0 %vm408_vm3, %v8729_v30 }
  0xe5   : > { %11841 = vst [vmem:[#allocation13_spill] sm:$0xff] %v8731_v31  ;;  %7505 = vmatmul.mubr.msk.f32.gmra.mxu1 %vm408_vm3, %v8731_v31 }
  0xe7   : > { %v8739_v32 = vpop.trf.xlu0  ;;  %v8741_v33 = vld [vmem:[#allocation2 + $0x61] sm:$0xff] }
  0xe8   : > { %11842 = vst [vmem:[#allocation14_spill] sm:$0xff] %v8739_v32  ;;  %v8743_v34 = vld [vmem:[#allocation2 + $0x60] sm:$0xff]  ;;  %417 = vst.msk [vmem:[#allocation2 + $0x79] sm:$0xff] %vm408_vm3, %v8739_v32  ;;  %7457 = vmatprep.mubr.msk.f32.mxu0 %vm408_vm3, %v8741_v33 }
  0xe9   : > { %11843 = vst [vmem:[#allocation15_spill] sm:$0xff] %v8743_v34  ;;  %7507 = vmatprep.mubr.msk.f32.mxu1 %vm408_vm3, %v8743_v34 }
  0xeb   : > { %v8751_v35 = vpop.trf.xlu0  ;;  %v8753_v36 = vld [vmem:[#allocation2 + $0x69] sm:$0xff] }
  0xec   : > { %11844 = vst [vmem:[#allocation16_spill] sm:$0xff] %v8751_v35  ;;  %v8755_v37 = vld [vmem:[#allocation2 + $0x68] sm:$0xff]  ;;  %418 = vst.msk [vmem:[#allocation2 + $0x81] sm:$0xff] %vm408_vm3, %v8751_v35  ;;  %7458 = vmatmul.mubr.msk.f32.gmra.mxu0 %vm408_vm3, %v8753_v36 }
  0xed   : > { %11845 = vst [vmem:[#allocation17_spill] sm:$0xff] %v8755_v37  ;;  %7508 = vmatmul.mubr.msk.f32.gmra.mxu1 %vm408_vm3, %v8755_v37 }
  0xef   : > { %v8763_v38 = vpop.trf.xlu0  ;;  %v8765_v39 = vld [vmem:[#allocation2 + $0x79] sm:$0xff] }
  0xf0   : > { %11846 = vst [vmem:[#allocation18_spill] sm:$0xff] %v8763_v38  ;;  %v8767_v40 = vld [vmem:[#allocation2 + $0x78] sm:$0xff]  ;;  %419 = vst.msk [vmem:[#allocation2 + $0x91] sm:$0xff] %vm408_vm3, %v8763_v38  ;;  %7460 = vmatprep.mubr.msk.f32.mxu0 %vm408_vm3, %v8765_v39 }
  0xf1   : > { %11847 = vst [vmem:[#allocation19_spill] sm:$0xff] %v8767_v40  ;;  %7510 = vmatprep.mubr.msk.f32.mxu1 %vm408_vm3, %v8767_v40 }
  0xf3   : > { %v8775_v41 = vpop.trf.xlu0  ;;  %v8777_v42 = vld [vmem:[#allocation2 + $0x81] sm:$0xff] }
  0xf4   : > { %11848 = vst [vmem:[#allocation20_spill] sm:$0xff] %v8775_v41  ;;  %v8779_v43 = vld [vmem:[#allocation2 + $0x80] sm:$0xff]  ;;  %420 = vst.msk [vmem:[#allocation2 + $0x99] sm:$0xff] %vm408_vm3, %v8775_v41  ;;  %7461 = vmatmul.mubr.msk.f32.gmra.mxu0 %vm408_vm3, %v8777_v42 }
  0xf5   : > { %11849 = vst [vmem:[#allocation21_spill] sm:$0xff] %v8779_v43  ;;  %7511 = vmatmul.mubr.msk.f32.gmra.mxu1 %vm408_vm3, %v8779_v43 }
  0xf7   : > { %v8787_v44 = vpop.trf.xlu0  ;;  %v8789_v45 = vld [vmem:[#allocation2 + $0x91] sm:$0xff] }
  0xf8   : > { %11850 = vst [vmem:[#allocation22_spill] sm:$0xff] %v8787_v44  ;;  %v8791_v46 = vld [vmem:[#allocation2 + $0x90] sm:$0xff]  ;;  %421 = vst.msk [vmem:[#allocation2 + $0xa9] sm:$0xff] %vm408_vm3, %v8787_v44  ;;  %7463 = vmatprep.mubr.msk.f32.mxu0 %vm408_vm3, %v8789_v45 }
  0xf9   : > { %11851 = vst [vmem:[#allocation23_spill] sm:$0xff] %v8791_v46  ;;  %7513 = vmatprep.mubr.msk.f32.mxu1 %vm408_vm3, %v8791_v46 }
  0xfb   : > { %v8799_v47 = vpop.trf.xlu0  ;;  %v8801_v48 = vld [vmem:[#allocation2 + $0x99] sm:$0xff] }
  0xfc   : > { %11852 = vst [vmem:[#allocation24_spill] sm:$0xff] %v8799_v47  ;;  %v8803_v49 = vld [vmem:[#allocation2 + $0x98] sm:$0xff]  ;;  %422 = vst.msk [vmem:[#allocation2 + $0xb1] sm:$0xff] %vm408_vm3, %v8799_v47  ;;  %7464 = vmatmul.mubr.msk.f32.gmra.mxu0 %vm408_vm3, %v8801_v48 }
  0xfd   : > { %11853 = vst [vmem:[#allocation25_spill] sm:$0xff] %v8803_v49  ;;  %7514 = vmatmul.mubr.msk.f32.gmra.mxu1 %vm408_vm3, %v8803_v49 }
  0xff   : > { %v8811_v50 = vpop.trf.xlu0  ;;  %v8813_v51 = vld [vmem:[#allocation2 + $0xa9] sm:$0xff] }
 0x100   : > { %11854 = vst [vmem:[#allocation26_spill] sm:$0xff] %v8811_v50  ;;  %v8815_v52 = vld [vmem:[#allocation2 + $0xa8] sm:$0xff]  ;;  %423 = vst.msk [vmem:[#allocation2 + $0xc1] sm:$0xff] %vm408_vm3, %v8811_v50  ;;  %7466 = vmatprep.mubr.msk.f32.mxu0 %vm408_vm3, %v8813_v51 }
 0x101   : > { %11855 = vst [vmem:[#allocation27_spill] sm:$0xff] %v8815_v52  ;;  %7516 = vmatprep.mubr.msk.f32.mxu1 %vm408_vm3, %v8815_v52 }
 0x103   : > { %v8823_v53 = vpop.trf.xlu0  ;;  %v8825_v54 = vld [vmem:[#allocation2 + $0xb1] sm:$0xff] }
 0x104   : > { %11856 = vst [vmem:[#allocation28_spill] sm:$0xff] %v8823_v53  ;;  %v8827_v55 = vld [vmem:[#allocation2 + $0xb0] sm:$0xff]  ;;  %424 = vst.msk [vmem:[#allocation2 + $0xc9] sm:$0xff] %vm408_vm3, %v8823_v53  ;;  %7467 = vmatmul.mubr.msk.f32.gmra.mxu0 %vm408_vm3, %v8825_v54 }
 0x105   : > { %11857 = vst [vmem:[#allocation29_spill] sm:$0xff] %v8827_v55  ;;  %7517 = vmatmul.mubr.msk.f32.gmra.mxu1 %vm408_vm3, %v8827_v55 }
 0x107   : > { %v8842_v57 = vpop.trf.xlu0  ;;  %v8844_v58 = vld [vmem:[#allocation2 + $0xc1] sm:$0xff] }
 0x108   : > { %11858 = vst [vmem:[#allocation30_spill] sm:$0xff] %v8842_v57  ;;  %v8846_v59 = vld [vmem:[#allocation2 + $0xc0] sm:$0xff]  ;;  %425 = vst.msk [vmem:[#allocation2 + $0xd9] sm:$0xff] %vm408_vm3, %v8842_v57  ;;  %7469 = vmatprep.mubr.msk.f32.mxu0 %vm408_vm3, %v8844_v58 }
 0x109   : > { %11859 = vst [vmem:[#allocation31_spill] sm:$0xff] %v8846_v59  ;;  %7519 = vmatprep.mubr.msk.f32.mxu1 %vm408_vm3, %v8846_v59 }
 0x10b   : > { %v8854_v60 = vpop.trf.xlu0  ;;  %v8856_v61 = vld [vmem:[#allocation2 + $0xc9] sm:$0xff] }
 0x10c   : > { %11860 = vst [vmem:[#allocation32_spill] sm:$0xff] %v8854_v60  ;;  %v8858_v62 = vld [vmem:[#allocation2 + $0xc8] sm:$0xff]  ;;  %426 = vst.msk [vmem:[#allocation2 + $0xe1] sm:$0xff] %vm408_vm3, %v8854_v60  ;;  %7470 = vmatmul.mubr.msk.f32.gmra.mxu0 %vm408_vm3, %v8856_v61 }
 0x10d   : > { %11861 = vst [vmem:[#allocation33_spill] sm:$0xff] %v8858_v62  ;;  %7520 = vmatmul.mubr.msk.f32.gmra.mxu1 %vm408_vm3, %v8858_v62 }
 0x10f   : > { %v8866_v63 = vpop.trf.xlu0  ;;  %v8868_v0 = vld [vmem:[#allocation2 + $0xd9] sm:$0xff]  ;;  %v7447_v2 = vpop.f32.mrf.mxu0 }
 0x110   : > { %11862 = vst [vmem:[#allocation34_spill] sm:$0xff] %v8866_v63  ;;  %v8870_v1 = vld [vmem:[#allocation2 + $0xd8] sm:$0xff]  ;;  %427 = vst.msk [vmem:[#allocation2 + $0xf1] sm:$0xff] %vm408_vm3, %v8866_v63  ;;  %7472 = vmatprep.mubr.msk.f32.mxu0 %vm408_vm3, %v8868_v0  ;;  %v7497_v3 = vpop.f32.mrf.mxu1 }
 0x111   : > { %11863 = vst [vmem:[#allocation35_spill] sm:$0xff] %v8870_v1  ;;  %7522 = vmatprep.mubr.msk.f32.mxu1 %vm408_vm3, %v8870_v1  ;;  %v8878_v4 = vadd.f32 %v7497_v3, %v7447_v2 }
 0x113   : > { %11864 = vst [vmem:[#allocation36_spill] sm:$0xff] %v8878_v4  ;;  %v8880_v5 = vpop.trf.xlu0  ;;  %v8882_v6 = vld [vmem:[#allocation2 + $0xe1] sm:$0xff] }
 0x114   : > { %11865 = vst [vmem:[#allocation37_spill] sm:$0xff] %v8880_v5  ;;  %v8884_v7 = vld [vmem:[#allocation2 + $0xe0] sm:$0xff]  ;;  %428 = vst.msk [vmem:[#allocation2 + $0xf9] sm:$0xff] %vm408_vm3, %v8880_v5  ;;  %7473 = vmatmul.mubr.msk.f32.gmra.mxu0 %vm408_vm3, %v8882_v6 }
 0x115   : > { %11866 = vst [vmem:[#allocation38_spill] sm:$0xff] %v8884_v7  ;;  %7523 = vmatmul.mubr.msk.f32.gmra.mxu1 %vm408_vm3, %v8884_v7 }
 0x117   : > { %v8892_v8 = vpop.trf.xlu0  ;;  %v8894_v9 = vld [vmem:[#allocation2 + $0xf1] sm:$0xff] }
 0x118   : > { %11867 = vst [vmem:[#allocation39_spill] sm:$0xff] %v8892_v8  ;;  %v8896_v10 = vld [vmem:[#allocation2 + $0xf0] sm:$0xff]  ;;  %429 = vst.msk [vmem:[#allocation2 + $0x109] sm:$0xff] %vm408_vm3, %v8892_v8  ;;  %7475 = vmatprep.mubr.msk.f32.mxu0 %vm408_vm3, %v8894_v9 }
 0x119   : > { %11868 = vst [vmem:[#allocation40_spill] sm:$0xff] %v8896_v10  ;;  %7525 = vmatprep.mubr.msk.f32.mxu1 %vm408_vm3, %v8896_v10 }
 0x11b   : > { %v8904_v2 = vpop.trf.xlu0  ;;  %v8906_v3 = vld [vmem:[#allocation2 + $0xf9] sm:$0xff] }
 0x11c   : > { %11869 = vst [vmem:[#allocation41_spill] sm:$0xff] %v8904_v2  ;;  %v8908_v5 = vld [vmem:[#allocation2 + $0xf8] sm:$0xff]  ;;  %430 = vst.msk [vmem:[#allocation2 + $0x111] sm:$0xff] %vm408_vm3, %v8904_v2  ;;  %7476 = vmatmul.mubr.msk.f32.gmra.mxu0 %vm408_vm3, %v8906_v3 }
 0x11d   : > { %11870 = vst [vmem:[#allocation42_spill] sm:$0xff] %v8908_v5  ;;  %7526 = vmatmul.mubr.msk.f32.gmra.mxu1 %vm408_vm3, %v8908_v5 }
 0x11f   : > { %v8916_v8 = vpop.trf.xlu0  ;;  %v8918_v63 = vld [vmem:[#allocation2 + $0x109] sm:$0xff] }
 0x120   : > { %11871 = vst [vmem:[#allocation43_spill] sm:$0xff] %v8916_v8  ;;  %v8920_v60 = vld [vmem:[#allocation2 + $0x108] sm:$0xff]  ;;  %431 = vst.msk [vmem:[#allocation2 + $0x121] sm:$0xff] %vm408_vm3, %v8916_v8  ;;  %7478 = vmatprep.mubr.msk.f32.mxu0 %vm408_vm3, %v8918_v63 }
 0x121   : > { %11872 = vst [vmem:[#allocation44_spill] sm:$0xff] %v8920_v60  ;;  %7528 = vmatprep.mubr.msk.f32.mxu1 %vm408_vm3, %v8920_v60 }
 0x123   : > { %v8928_v2 = vpop.trf.xlu0  ;;  %v8930_v57 = vld [vmem:[#allocation2 + $0x111] sm:$0xff] }
 0x124   : > { %11873 = vst [vmem:[#allocation45_spill] sm:$0xff] %v8928_v2  ;;  %v8932_v53 = vld [vmem:[#allocation2 + $0x110] sm:$0xff]  ;;  %432 = vst.msk [vmem:[#allocation2 + $0x129] sm:$0xff] %vm408_vm3, %v8928_v2  ;;  %7479 = vmatmul.mubr.msk.f32.gmra.mxu0 %vm408_vm3, %v8930_v57 }
 0x125   : > { %11874 = vst [vmem:[#allocation46_spill] sm:$0xff] %v8932_v53  ;;  %7529 = vmatmul.mubr.msk.f32.gmra.mxu1 %vm408_vm3, %v8932_v53 }
 0x127   : > { %v8940_v8 = vpop.trf.xlu0  ;;  %v8942_v50 = vld [vmem:[#allocation2 + $0x121] sm:$0xff] }
 0x128   : > { %11875 = vst [vmem:[#allocation47_spill] sm:$0xff] %v8940_v8  ;;  %v8944_v47 = vld [vmem:[#allocation2 + $0x120] sm:$0xff]  ;;  %433 = vst.msk [vmem:[#allocation2 + $0x139] sm:$0xff] %vm408_vm3, %v8940_v8  ;;  %7481 = vmatprep.mubr.msk.f32.mxu0 %vm408_vm3, %v8942_v50 }
 0x129   : > { %11876 = vst [vmem:[#allocation48_spill] sm:$0xff] %v8944_v47  ;;  %7531 = vmatprep.mubr.msk.f32.mxu1 %vm408_vm3, %v8944_v47 }
 0x12b   : > { %v8952_v2 = vpop.trf.xlu0  ;;  %v8954_v44 = vld [vmem:[#allocation2 + $0x129] sm:$0xff] }
 0x12c   : > { %11877 = vst [vmem:[#allocation49_spill] sm:$0xff] %v8952_v2  ;;  %v8956_v41 = vld [vmem:[#allocation2 + $0x128] sm:$0xff]  ;;  %434 = vst.msk [vmem:[#allocation2 + $0x141] sm:$0xff] %vm408_vm3, %v8952_v2  ;;  %7482 = vmatmul.mubr.msk.f32.gmra.mxu0 %vm408_vm3, %v8954_v44 }
 0x12d   : > { %11878 = vst [vmem:[#allocation50_spill] sm:$0xff] %v8956_v41  ;;  %7532 = vmatmul.mubr.msk.f32.gmra.mxu1 %vm408_vm3, %v8956_v41 }
 0x12f   : > { %v8964_v8 = vpop.trf.xlu0  ;;  %v8966_v38 = vld [vmem:[#allocation2 + $0x139] sm:$0xff] }
 0x130   : > { %11879 = vst [vmem:[#allocation51_spill] sm:$0xff] %v8964_v8  ;;  %v8968_v35 = vld [vmem:[#allocation2 + $0x138] sm:$0xff]  ;;  %435 = vst.msk [vmem:[#allocation2 + $0x151] sm:$0xff] %vm408_vm3, %v8964_v8  ;;  %7484 = vmatprep.mubr.msk.f32.mxu0 %vm408_vm3, %v8966_v38 }
 0x131   : > { %11880 = vst [vmem:[#allocation52_spill] sm:$0xff] %v8968_v35  ;;  %7534 = vmatprep.mubr.msk.f32.mxu1 %vm408_vm3, %v8968_v35 }
 0x133   : > { %v8976_v2 = vpop.trf.xlu0  ;;  %v8978_v32 = vld [vmem:[#allocation2 + $0x141] sm:$0xff] }
 0x134   : > { %11881 = vst [vmem:[#allocation53_spill] sm:$0xff] %v8976_v2  ;;  %v8980_v29 = vld [vmem:[#allocation2 + $0x140] sm:$0xff]  ;;  %436 = vst.msk [vmem:[#allocation2 + $0x159] sm:$0xff] %vm408_vm3, %v8976_v2  ;;  %7485 = vmatmul.mubr.msk.f32.gmra.mxu0 %vm408_vm3, %v8978_v32 }
 0x135   : > { %11882 = vst [vmem:[#allocation54_spill] sm:$0xff] %v8980_v29  ;;  %7535 = vmatmul.mubr.msk.f32.gmra.mxu1 %vm408_vm3, %v8980_v29 }
 0x137   : > { %v8988_v8 = vpop.trf.xlu0  ;;  %v8990_v26 = vld [vmem:[#allocation2 + $0x151] sm:$0xff] }
 0x138   : > { %11883 = vst [vmem:[#allocation55_spill] sm:$0xff] %v8988_v8  ;;  %v8992_v23 = vld [vmem:[#allocation2 + $0x150] sm:$0xff]  ;;  %437 = vst.msk [vmem:[#allocation2 + $0x169] sm:$0xff] %vm408_vm3, %v8988_v8  ;;  %7487 = vmatprep.mubr.msk.f32.mxu0 %vm408_vm3, %v8990_v26 }
 0x139   : > { %11884 = vst [vmem:[#allocation56_spill] sm:$0xff] %v8992_v23  ;;  %7537 = vmatprep.mubr.msk.f32.mxu1 %vm408_vm3, %v8992_v23 }
 0x13b   : > { %v9000_v2 = vpop.trf.xlu0  ;;  %v9002_v20 = vld [vmem:[#allocation2 + $0x159] sm:$0xff] }
 0x13c   : > { %11885 = vst [vmem:[#allocation57_spill] sm:$0xff] %v9000_v2  ;;  %11886 = vst [vmem:[#allocation58_spill] sm:$0xff] %v9002_v20  ;;  %v9004_v17 = vld [vmem:[#allocation2 + $0x158] sm:$0xff]  ;;  %7488 = vmatmul.mubr.msk.f32.gmra.mxu0 %vm408_vm3, %v9002_v20 }
 0x13d   : > { %11887 = vst [vmem:[#allocation59_spill] sm:$0xff] %v9004_v17  ;;  %438 = vst.msk [vmem:[#allocation2 + $0x171] sm:$0xff] %vm408_vm3, %v9000_v2  ;;  %7538 = vmatmul.mubr.msk.f32.gmra.mxu1 %vm408_vm3, %v9004_v17  ;;  %v513_v2 = vld [vmem:[#allocation2 + $0x2] sm:$0xff] }
 0x13f   : > { %v9012_v8 = vld [vmem:[#allocation2 + $0x169] sm:$0xff]  ;;  %v9016_v13 = vpop.trf.xlu0 }
 0x140   : > { %11888 = vst [vmem:[#allocation60_spill] sm:$0xff] %v9012_v8  ;;  %v9014_v14 = vld [vmem:[#allocation2 + $0x168] sm:$0xff]  ;;  %11890 = vst [vmem:[#allocation62_spill] sm:$0xff] %v9016_v13  ;;  %7490 = vmatprep.mubr.msk.f32.mxu0 %vm408_vm3, %v9012_v8  ;;  %v9042_v8 = vld [vmem:[#allocation2 + $0x1a] sm:$0xff] }
 0x141   : > { %11889 = vst [vmem:[#allocation61_spill] sm:$0xff] %v9014_v14  ;;  %7540 = vmatprep.mubr.msk.f32.mxu1 %vm408_vm3, %v9014_v14  ;;  %439 = vst.msk [vmem:[#allocation2 + $0x181] sm:$0xff] %vm408_vm3, %v9016_v13  ;;  %v514_v13 = vld [vmem:[#allocation2 + $0xa] sm:$0xff] }
 0x143   : > { %v9028_v20 = vpop.trf.xlu0 }
 0x144   : > { %v9024_v12 = vld [vmem:[#allocation2 + $0x171] sm:$0xff]  ;;  %11892 = vst [vmem:[#allocation64_spill] sm:$0xff] %v9028_v20  ;;  %440 = vst.msk [vmem:[#allocation2 + $0x189] sm:$0xff] %vm408_vm3, %v9028_v20  ;;  %v9052_v20 = vld [vmem:[%s11708_s1 + $0x1c] sm:$0xf] }
 0x145   : > { %11891 = vst [vmem:[#allocation63_spill] sm:$0xff] %v9024_v12  ;;  %v9026_v4 = vld [vmem:[#allocation2 + $0x170] sm:$0xff]  ;;  %7491 = vmatmul.mubr.msk.f32.gmra.mxu0 %vm408_vm3, %v9024_v12  ;;  %v9047_v12 = vld [vmem:[%s11708_s1 + $0x18] sm:$0xf] }
 0x146   : > { %7541 = vmatmul.mubr.msk.f32.gmra.mxu1 %vm408_vm3, %v9026_v4  ;;  %7545 = vmatprep.mubr.msk.f32.mxu0 %vm408_vm3, %v513_v2  ;;  %v9096_v2 = vld [vmem:[#allocation2 + $0x62] sm:$0xff] }
 0x147   : > { %7595 = vmatprep.mubr.msk.f32.mxu1 %vm408_vm3, %v8671_v16  ;;  %v9078_v16 = vld [vmem:[#allocation2 + $0x3a] sm:$0xff] }
 0x149   : > { %7546 = vmatmul.mubr.msk.f32.vlgmr.msra.gmra.mxu0 %vm408_vm3, %v514_v13  ;;  %v9062_v13 = vld [vmem:[#allocation2 + $0x22] sm:$0xff] }
 0x14a   : > { %7596 = vmatmul.mubr.msk.f32.vlgmr.msra.gmra.mxu1 %vm408_vm3, %v8683_v19  ;;  %7644 = vmatpush3.msk.msra.mxu0 %vm648_vm2, %v8654_v11  ;;  %v9072_v11 = vld [vmem:[#allocation2 + $0x32] sm:$0xff]  ;;  %v9084_v19 = vld [vmem:[#allocation2 + $0x4a] sm:$0xff] }
 0x14b   : > { %7548 = vmatprep.mubr.msk.f32.mxu0 %vm408_vm3, %v9042_v8  ;;  %7598 = vmatprep.mubr.msk.f32.mxu1 %vm408_vm3, %v8695_v22 }
 0x14c   : > { %7694 = vmatpush3.msk.msra.mxu1 %vm648_vm2, %v8838_v56  ;;  %7743 = vmatprep.subr.msk.mxu0 %vm648_vm2, %v9047_v12  ;;  %v9090_v56 = vld [vmem:[#allocation2 + $0x52] sm:$0xff] }
 0x14d   : > { %7793 = vmatprep.subr.msk.mxu1 %vm648_vm2, %v9052_v20  ;;  %7549 = vmatmul.mubr.msk.f32.gmra.mxu0 %vm408_vm3, %v9062_v13 }
 0x14e   : > { %7599 = vmatmul.mubr.msk.f32.gmra.mxu1 %vm408_vm3, %v8707_v25  ;;  %7551 = vmatprep.mubr.msk.f32.mxu0 %vm408_vm3, %v9072_v11 }
 0x14f   : > { %7601 = vmatprep.mubr.msk.f32.mxu1 %vm408_vm3, %v8719_v28  ;;  %v9224_v28 = vld [vmem:[#allocation2 + $0x15a] sm:$0xff] }
 0x150   : > { %11903 = vst [vmem:[#allocation75_spill] sm:$0xff] %v9224_v28 }
 0x151   : > { %7552 = vmatmul.mubr.msk.f32.gmra.mxu0 %vm408_vm3, %v9078_v16 }
 0x152   : > { %7602 = vmatmul.mubr.msk.f32.gmra.mxu1 %vm408_vm3, %v8731_v31  ;;  %7554 = vmatprep.mubr.msk.f32.mxu0 %vm408_vm3, %v9084_v19  ;;  %v9102_v31 = vld [vmem:[#allocation2 + $0x6a] sm:$0xff] }
 0x153   : > { %7604 = vmatprep.mubr.msk.f32.mxu1 %vm408_vm3, %v8743_v34  ;;  %v9108_v34 = vld [vmem:[#allocation2 + $0x7a] sm:$0xff] }
 0x155   : > { %7555 = vmatmul.mubr.msk.f32.gmra.mxu0 %vm408_vm3, %v9090_v56 }
 0x156   : > { %7605 = vmatmul.mubr.msk.f32.gmra.mxu1 %vm408_vm3, %v8755_v37  ;;  %7557 = vmatprep.mubr.msk.f32.mxu0 %vm408_vm3, %v9096_v2  ;;  %v9114_v37 = vld [vmem:[#allocation2 + $0x82] sm:$0xff] }
 0x157   : > { %7607 = vmatprep.mubr.msk.f32.mxu1 %vm408_vm3, %v8767_v40  ;;  %v9120_v40 = vld [vmem:[#allocation2 + $0x92] sm:$0xff] }
 0x159   : > { %7558 = vmatmul.mubr.msk.f32.gmra.mxu0 %vm408_vm3, %v9102_v31 }
 0x15a   : > { %7608 = vmatmul.mubr.msk.f32.gmra.mxu1 %vm408_vm3, %v8779_v43  ;;  %7560 = vmatprep.mubr.msk.f32.mxu0 %vm408_vm3, %v9108_v34  ;;  %v9126_v43 = vld [vmem:[#allocation2 + $0x9a] sm:$0xff] }
 0x15b   : > { %7610 = vmatprep.mubr.msk.f32.mxu1 %vm408_vm3, %v8791_v46  ;;  %v9132_v46 = vld [vmem:[#allocation2 + $0xaa] sm:$0xff] }
 0x15c   : > { %11893 = vst [vmem:[#allocation65_spill] sm:$0xff] %v9132_v46 }
 0x15d   : > { %7561 = vmatmul.mubr.msk.f32.gmra.mxu0 %vm408_vm3, %v9114_v37 }
 0x15e   : > { %7611 = vmatmul.mubr.msk.f32.gmra.mxu1 %vm408_vm3, %v8803_v49  ;;  %7563 = vmatprep.mubr.msk.f32.mxu0 %vm408_vm3, %v9120_v40  ;;  %v9138_v49 = vld [vmem:[#allocation2 + $0xb2] sm:$0xff] }
 0x15f   : > { %7613 = vmatprep.mubr.msk.f32.mxu1 %vm408_vm3, %v8815_v52  ;;  %v9144_v52 = vld [vmem:[#allocation2 + $0xc2] sm:$0xff] }
 0x161   : > { %7564 = vmatmul.mubr.msk.f32.gmra.mxu0 %vm408_vm3, %v9126_v43 }
 0x162   : > { %7614 = vmatmul.mubr.msk.f32.gmra.mxu1 %vm408_vm3, %v8827_v55  ;;  %7566 = vmatprep.mubr.msk.f32.mxu0 %vm408_vm3, %v9132_v46  ;;  %v9150_v55 = vld [vmem:[#allocation2 + $0xca] sm:$0xff] }
 0x163   : > { %7616 = vmatprep.mubr.msk.f32.mxu1 %vm408_vm3, %v8846_v59  ;;  %v9156_v59 = vld [vmem:[#allocation2 + $0xda] sm:$0xff] }
 0x164   : > { %11894 = vst [vmem:[#allocation66_spill] sm:$0xff] %v9156_v59 }
 0x165   : > { %7567 = vmatmul.mubr.msk.f32.gmra.mxu0 %vm408_vm3, %v9138_v49 }
 0x166   : > { %7617 = vmatmul.mubr.msk.f32.gmra.mxu1 %vm408_vm3, %v8858_v62  ;;  %7569 = vmatprep.mubr.msk.f32.mxu0 %vm408_vm3, %v9144_v52  ;;  %v9162_v62 = vld [vmem:[#allocation2 + $0xe2] sm:$0xff] }
 0x167   : > { %7619 = vmatprep.mubr.msk.f32.mxu1 %vm408_vm3, %v8870_v1  ;;  %v9168_v1 = vld [vmem:[#allocation2 + $0xf2] sm:$0xff] }
 0x169   : > { %7570 = vmatmul.mubr.msk.f32.gmra.mxu0 %vm408_vm3, %v9150_v55 }
 0x16a   : > { %7620 = vmatmul.mubr.msk.f32.gmra.mxu1 %vm408_vm3, %v8884_v7  ;;  %7572 = vmatprep.mubr.msk.f32.mxu0 %vm408_vm3, %v9156_v59  ;;  %v9174_v7 = vld [vmem:[#allocation2 + $0xfa] sm:$0xff] }
 0x16b   : > { %7622 = vmatprep.mubr.msk.f32.mxu1 %vm408_vm3, %v8896_v10  ;;  %v9180_v10 = vld [vmem:[#allocation2 + $0x10a] sm:$0xff] }
 0x16c   : > { %11895 = vst [vmem:[#allocation67_spill] sm:$0xff] %v9180_v10 }
 0x16d   : > { %7573 = vmatmul.mubr.msk.f32.gmra.mxu0 %vm408_vm3, %v9162_v62 }
 0x16e   : > { %7623 = vmatmul.mubr.msk.f32.gmra.mxu1 %vm408_vm3, %v8908_v5  ;;  %7575 = vmatprep.mubr.msk.f32.mxu0 %vm408_vm3, %v9168_v1  ;;  %v9186_v5 = vld [vmem:[#allocation2 + $0x112] sm:$0xff] }
 0x16f   : > { %7625 = vmatprep.mubr.msk.f32.mxu1 %vm408_vm3, %v8920_v60  ;;  %11896 = vst [vmem:[#allocation68_spill] sm:$0xff] %v9186_v5  ;;  %v9192_v60 = vld [vmem:[#allocation2 + $0x122] sm:$0xff] }
 0x170   : > { %11897 = vst [vmem:[#allocation69_spill] sm:$0xff] %v9192_v60 }
 0x171   : > { %7576 = vmatmul.mubr.msk.f32.gmra.mxu0 %vm408_vm3, %v9174_v7 }
 0x172   : > { %7626 = vmatmul.mubr.msk.f32.gmra.mxu1 %vm408_vm3, %v8932_v53  ;;  %7578 = vmatprep.mubr.msk.f32.mxu0 %vm408_vm3, %v9180_v10  ;;  %v9198_v53 = vld [vmem:[#allocation2 + $0x12a] sm:$0xff] }
 0x173   : > { %7628 = vmatprep.mubr.msk.f32.mxu1 %vm408_vm3, %v8944_v47  ;;  %11898 = vst [vmem:[#allocation70_spill] sm:$0xff] %v9198_v53  ;;  %v9204_v47 = vld [vmem:[#allocation2 + $0x13a] sm:$0xff] }
 0x174   : > { %11899 = vst [vmem:[#allocation71_spill] sm:$0xff] %v9204_v47 }
 0x175   : > { %7579 = vmatmul.mubr.msk.f32.gmra.mxu0 %vm408_vm3, %v9186_v5 }
 0x176   : > { %7629 = vmatmul.mubr.msk.f32.gmra.mxu1 %vm408_vm3, %v8956_v41  ;;  %7581 = vmatprep.mubr.msk.f32.mxu0 %vm408_vm3, %v9192_v60  ;;  %v9210_v41 = vld [vmem:[#allocation2 + $0x142] sm:$0xff] }
 0x177   : > { %7631 = vmatprep.mubr.msk.f32.mxu1 %vm408_vm3, %v8968_v35  ;;  %11900 = vst [vmem:[#allocation72_spill] sm:$0xff] %v9210_v41  ;;  %v9216_v35 = vld [vmem:[#allocation2 + $0x152] sm:$0xff] }
 0x178   : > { %11901 = vst [vmem:[#allocation73_spill] sm:$0xff] %v9216_v35 }
 0x179   : > { %7582 = vmatmul.mubr.msk.f32.gmra.mxu0 %vm408_vm3, %v9198_v53 }
 0x17a   : > { %7632 = vmatmul.mubr.msk.f32.gmra.mxu1 %vm408_vm3, %v8980_v29  ;;  %7584 = vmatprep.mubr.msk.f32.mxu0 %vm408_vm3, %v9204_v47  ;;  %v9222_v29 = vld [vmem:[#allocation2 + $0x180] sm:$0xff] }
 0x17b   : > { %7634 = vmatprep.mubr.msk.f32.mxu1 %vm408_vm3, %v8992_v23  ;;  %11902 = vst [vmem:[#allocation74_spill] sm:$0xff] %v9222_v29  ;;  %v9230_v23 = vld [vmem:[#allocation2 + $0x16a] sm:$0xff] }
 0x17c   : > { %11904 = vst [vmem:[#allocation76_spill] sm:$0xff] %v9230_v23 }
 0x17d   : > { %7585 = vmatmul.mubr.msk.f32.gmra.mxu0 %vm408_vm3, %v9210_v41 }
 0x17e   : > { %7635 = vmatmul.mubr.msk.f32.gmra.mxu1 %vm408_vm3, %v9004_v17  ;;  %7587 = vmatprep.mubr.msk.f32.mxu0 %vm408_vm3, %v9216_v35  ;;  %v9236_v17 = vld [vmem:[#allocation2 + $0x188] sm:$0xff] }
 0x17f   : > { %7637 = vmatprep.mubr.msk.f32.mxu1 %vm408_vm3, %v9014_v14  ;;  %v9238_v14 = vld [vmem:[#allocation2 + $0x172] sm:$0xff] }
 0x180   : > { %11905 = vst [vmem:[#allocation77_spill] sm:$0xff] %v9238_v14 }
 0x181   : > { %7588 = vmatmul.mubr.msk.f32.gmra.mxu0 %vm408_vm3, %v9224_v28 }
 0x182   : > { %7638 = vmatmul.mubr.msk.f32.gmra.mxu1 %vm408_vm3, %v9026_v4  ;;  %7590 = vmatprep.mubr.msk.f32.mxu0 %vm408_vm3, %v9230_v23 }
 0x183   : > { %7640 = vmatprep.mubr.msk.f32.mxu1 %vm408_vm3, %v9222_v29  ;;  %v9255_v29 = vld [vmem:[%s11708_s1 + $0x20] sm:$0xf] }
 0x185   : > { %7591 = vmatmul.mubr.msk.f32.gmra.mxu0 %vm408_vm3, %v9238_v14 }
 0x186   : > { %7641 = vmatmul.mubr.msk.f32.gmra.mxu1 %vm408_vm3, %v9236_v17  ;;  %7645 = vmatprep.mubr.msk.f32.mxu0 %vm408_vm3, %v8669_v15  ;;  %v9281_v15 = vpop.f32.mrf.mxu1 }
 0x187   : > { %7695 = vmatprep.mubr.msk.f32.mxu1 %vm408_vm3, %v9042_v8  ;;  %11907 = vst [vmem:[#allocation79_spill] sm:$0xff] %v9281_v15 }
 0x189   : > { %7646 = vmatmul.mubr.msk.f32.vlgmr.msra.gmra.mxu0 %vm408_vm3, %v8681_v18 }
 0x18a   : > { %7696 = vmatmul.mubr.msk.f32.vlgmr.msra.gmra.mxu1 %vm408_vm3, %v9062_v13  ;;  %7744 = vmatpush3.msk.msra.mxu0 %vm648_vm2, %v9047_v12  ;;  %v9279_v12 = vpop.f32.mrf.mxu0 }
 0x18b   : > { %7648 = vmatprep.mubr.msk.f32.mxu0 %vm408_vm3, %v8693_v21  ;;  %7698 = vmatprep.mubr.msk.f32.mxu1 %vm408_vm3, %v9072_v11  ;;  %11906 = vst [vmem:[#allocation78_spill] sm:$0xff] %v9279_v12 }
 0x18c   : > { %7794 = vmatpush3.msk.msra.mxu1 %vm648_vm2, %v9052_v20  ;;  %7843 = vmatprep.subr.msk.mxu0 %vm648_vm2, %v9255_v29 }
 0x18d   : > { %7649 = vmatmul.mubr.msk.f32.gmra.mxu0 %vm408_vm3, %v8705_v24 }
 0x18e   : > { %7699 = vmatmul.mubr.msk.f32.gmra.mxu1 %vm408_vm3, %v9078_v16  ;;  %7651 = vmatprep.mubr.msk.f32.mxu0 %vm408_vm3, %v8717_v27 }
 0x18f   : > { %7701 = vmatprep.mubr.msk.f32.mxu1 %vm408_vm3, %v9084_v19 }
 0x191   : > { %7652 = vmatmul.mubr.msk.f32.gmra.mxu0 %vm408_vm3, %v8729_v30 }
 0x192   : > { %7702 = vmatmul.mubr.msk.f32.gmra.mxu1 %vm408_vm3, %v9090_v56  ;;  %7654 = vmatprep.mubr.msk.f32.mxu0 %vm408_vm3, %v8741_v33 }
 0x193   : > { %7704 = vmatprep.mubr.msk.f32.mxu1 %vm408_vm3, %v9096_v2 }
 0x194   : > { %v7450_v18 = vpop.f32.mrf.mxu0 }
 0x195   : > { %v7500_v20 = vpop.f32.mrf.mxu1  ;;  %7655 = vmatmul.mubr.msk.f32.gmra.mxu0 %vm408_vm3, %v8753_v36 }
 0x196   : > { %7705 = vmatmul.mubr.msk.f32.gmra.mxu1 %vm408_vm3, %v9102_v31  ;;  %v9291_v8 = vadd.f32 %v7500_v20, %v7450_v18  ;;  %7657 = vmatprep.mubr.msk.f32.mxu0 %vm408_vm3, %v8765_v39  ;;  %v9305_v13 = vpop.f32.mrf.mxu0 }
 0x197   : > { %7707 = vmatprep.mubr.msk.f32.mxu1 %vm408_vm3, %v9108_v34  ;;  %11908 = vst [vmem:[#allocation80_spill] sm:$0xff] %v9305_v13  ;;  %v9307_v18 = vpop.f32.mrf.mxu1 }
 0x198   : > { %11909 = vst [vmem:[#allocation81_spill] sm:$0xff] %v9307_v18 }
 0x199   : > { %7658 = vmatmul.mubr.msk.f32.gmra.mxu0 %vm408_vm3, %v8777_v42 }
 0x19a   : > { %7708 = vmatmul.mubr.msk.f32.gmra.mxu1 %vm408_vm3, %v9114_v37  ;;  %7660 = vmatprep.mubr.msk.f32.mxu0 %vm408_vm3, %v8789_v45 }
 0x19b   : > { %7710 = vmatprep.mubr.msk.f32.mxu1 %vm408_vm3, %v9120_v40 }
 0x19c   : > { %v7453_v20 = vpop.f32.mrf.mxu0 }
 0x19d   : > { %v7503_v15 = vpop.f32.mrf.mxu1  ;;  %7661 = vmatmul.mubr.msk.f32.gmra.mxu0 %vm408_vm3, %v8801_v48 }
 0x19e   : > { %7711 = vmatmul.mubr.msk.f32.gmra.mxu1 %vm408_vm3, %v9126_v43  ;;  %v9313_v12 = vadd.f32 %v7503_v15, %v7453_v20  ;;  %7663 = vmatprep.mubr.msk.f32.mxu0 %vm408_vm3, %v8813_v51  ;;  %v9327_v15 = vpop.f32.mrf.mxu0 }
 0x19f   : > { %7713 = vmatprep.mubr.msk.f32.mxu1 %vm408_vm3, %v9132_v46  ;;  %11910 = vst [vmem:[#allocation82_spill] sm:$0xff] %v9327_v15  ;;  %v9329_v20 = vpop.f32.mrf.mxu1 }
 0x1a0   : > { %11911 = vst [vmem:[#allocation83_spill] sm:$0xff] %v9329_v20 }
 0x1a1   : > { %7664 = vmatmul.mubr.msk.f32.gmra.mxu0 %vm408_vm3, %v8825_v54 }
 0x1a2   : > { %7714 = vmatmul.mubr.msk.f32.gmra.mxu1 %vm408_vm3, %v9138_v49  ;;  %7666 = vmatprep.mubr.msk.f32.mxu0 %vm408_vm3, %v8844_v58 }
 0x1a3   : > { %7716 = vmatprep.mubr.msk.f32.mxu1 %vm408_vm3, %v9144_v52 }
 0x1a4   : > { %v7456_v18 = vpop.f32.mrf.mxu0 }
 0x1a5   : > { %v7506_v13 = vpop.f32.mrf.mxu1  ;;  %7667 = vmatmul.mubr.msk.f32.gmra.mxu0 %vm408_vm3, %v8856_v61 }
 0x1a6   : > { %7717 = vmatmul.mubr.msk.f32.gmra.mxu1 %vm408_vm3, %v9150_v55  ;;  %v9335_v46 = vadd.f32 %v7506_v13, %v7456_v18  ;;  %7669 = vmatprep.mubr.msk.f32.mxu0 %vm408_vm3, %v8868_v0  ;;  %v9349_v13 = vpop.f32.mrf.mxu0 }
 0x1a7   : > { %7719 = vmatprep.mubr.msk.f32.mxu1 %vm408_vm3, %v9156_v59  ;;  %11912 = vst [vmem:[#allocation84_spill] sm:$0xff] %v9349_v13  ;;  %v9351_v18 = vpop.f32.mrf.mxu1 }
 0x1a8   : > { %11913 = vst [vmem:[#allocation85_spill] sm:$0xff] %v9351_v18 }
 0x1a9   : > { %7670 = vmatmul.mubr.msk.f32.gmra.mxu0 %vm408_vm3, %v8882_v6 }
 0x1aa   : > { %7720 = vmatmul.mubr.msk.f32.gmra.mxu1 %vm408_vm3, %v9162_v62  ;;  %7672 = vmatprep.mubr.msk.f32.mxu0 %vm408_vm3, %v8894_v9 }
 0x1ab   : > { %7722 = vmatprep.mubr.msk.f32.mxu1 %vm408_vm3, %v9168_v1 }
 0x1ac   : > { %v7459_v20 = vpop.f32.mrf.mxu0 }
 0x1ad   : > { %v7509_v15 = vpop.f32.mrf.mxu1  ;;  %7673 = vmatmul.mubr.msk.f32.gmra.mxu0 %vm408_vm3, %v8906_v3 }
 0x1ae   : > { %7723 = vmatmul.mubr.msk.f32.gmra.mxu1 %vm408_vm3, %v9174_v7  ;;  %v9357_v59 = vadd.f32 %v7509_v15, %v7459_v20  ;;  %7675 = vmatprep.mubr.msk.f32.mxu0 %vm408_vm3, %v8918_v63  ;;  %v9371_v15 = vpop.f32.mrf.mxu0 }
 0x1af   : > { %7725 = vmatprep.mubr.msk.f32.mxu1 %vm408_vm3, %v9180_v10  ;;  %11914 = vst [vmem:[#allocation86_spill] sm:$0xff] %v9371_v15  ;;  %v9373_v20 = vpop.f32.mrf.mxu1 }
 0x1b0   : > { %11915 = vst [vmem:[#allocation87_spill] sm:$0xff] %v9373_v20 }
 0x1b1   : > { %7676 = vmatmul.mubr.msk.f32.gmra.mxu0 %vm408_vm3, %v8930_v57 }
 0x1b2   : > { %7726 = vmatmul.mubr.msk.f32.gmra.mxu1 %vm408_vm3, %v9186_v5  ;;  %7678 = vmatprep.mubr.msk.f32.mxu0 %vm408_vm3, %v8942_v50 }
 0x1b3   : > { %7728 = vmatprep.mubr.msk.f32.mxu1 %vm408_vm3, %v9192_v60 }
 0x1b4   : > { %v7462_v18 = vpop.f32.mrf.mxu0 }
 0x1b5   : > { %v7512_v13 = vpop.f32.mrf.mxu1  ;;  %7679 = vmatmul.mubr.msk.f32.gmra.mxu0 %vm408_vm3, %v8954_v44 }
 0x1b6   : > { %7729 = vmatmul.mubr.msk.f32.gmra.mxu1 %vm408_vm3, %v9198_v53  ;;  %v9379_v10 = vadd.f32 %v7512_v13, %v7462_v18  ;;  %7681 = vmatprep.mubr.msk.f32.mxu0 %vm408_vm3, %v8966_v38  ;;  %v9393_v13 = vpop.f32.mrf.mxu0  ;;  %v11918_v53 = vld [vmem:[#allocation58_spill] sm:$0xff] }
 0x1b7   : > { %7731 = vmatprep.mubr.msk.f32.mxu1 %vm408_vm3, %v9204_v47  ;;  %11916 = vst [vmem:[#allocation88_spill] sm:$0xff] %v9393_v13  ;;  %v9395_v18 = vpop.f32.mrf.mxu1  ;;  %v9413_v13 = vld [vmem:[#allocation2 + $0x182] sm:$0xff] }
 0x1b8   : > { %11917 = vst [vmem:[#allocation89_spill] sm:$0xff] %v9395_v18  ;;  %v9411_v18 = vld [vmem:[#allocation2 + $0x181] sm:$0xff]  ;;  %11921 = vst [vmem:[#allocation58_spill] sm:$0xff] %v9413_v13 }
 0x1b9   : > { %7682 = vmatmul.mubr.msk.f32.gmra.mxu0 %vm408_vm3, %v8978_v32 }
 0x1ba   : > { %7732 = vmatmul.mubr.msk.f32.gmra.mxu1 %vm408_vm3, %v9210_v41  ;;  %7684 = vmatprep.mubr.msk.f32.mxu0 %vm408_vm3, %v8990_v26  ;;  %v11919_v41 = vld [vmem:[#allocation60_spill] sm:$0xff] }
 0x1bb   : > { %7734 = vmatprep.mubr.msk.f32.mxu1 %vm408_vm3, %v9216_v35  ;;  %v11920_v35 = vld [vmem:[#allocation63_spill] sm:$0xff] }
 0x1bc   : > { %v7465_v20 = vpop.f32.mrf.mxu0 }
 0x1bd   : > { %v7515_v15 = vpop.f32.mrf.mxu1  ;;  %7685 = vmatmul.mubr.msk.f32.gmra.mxu0 %vm408_vm3, %v11918_v53 }
 0x1be   : > { %7735 = vmatmul.mubr.msk.f32.gmra.mxu1 %vm408_vm3, %v9224_v28  ;;  %v9401_v47 = vadd.f32 %v7515_v15, %v7465_v20  ;;  %7687 = vmatprep.mubr.msk.f32.mxu0 %vm408_vm3, %v11919_v41  ;;  %v9419_v15 = vpop.f32.mrf.mxu0  ;;  %v9425_v28 = vld [vmem:[#allocation2 + $0x18a] sm:$0xff] }
 0x1bf   : > { %7737 = vmatprep.mubr.msk.f32.mxu1 %vm408_vm3, %v9230_v23  ;;  %11922 = vst [vmem:[#allocation60_spill] sm:$0xff] %v9419_v15  ;;  %v9421_v20 = vpop.f32.mrf.mxu1  ;;  %v9423_v23 = vld [vmem:[#allocation2 + $0x189] sm:$0xff] }
 0x1c0   : > { %11923 = vst [vmem:[#allocation63_spill] sm:$0xff] %v9421_v20 }
 0x1c1   : > { %7688 = vmatmul.mubr.msk.f32.gmra.mxu0 %vm408_vm3, %v11920_v35 }
 0x1c2   : > { %7738 = vmatmul.mubr.msk.f32.gmra.mxu1 %vm408_vm3, %v9238_v14  ;;  %7690 = vmatprep.mubr.msk.f32.mxu0 %vm408_vm3, %v9411_v18 }
 0x1c3   : > { %7740 = vmatprep.mubr.msk.f32.mxu1 %vm408_vm3, %v9413_v13 }
 0x1c4   : > { %v7468_v60 = vpop.f32.mrf.mxu0 }
 0x1c5   : > { %v7518_v14 = vpop.f32.mrf.mxu1  ;;  %7691 = vmatmul.mubr.msk.f32.gmra.mxu0 %vm408_vm3, %v9423_v23 }
 0x1c6   : > { %7741 = vmatmul.mubr.msk.f32.gmra.mxu1 %vm408_vm3, %v9425_v28  ;;  %v9431_v5 = vadd.f32 %v7518_v14, %v7468_v60  ;;  %7745 = vmatprep.mubr.msk.f32.mxu0 %vm408_vm3, %v8695_v22  ;;  %v788_v20 = vpop.f32.mrf.mxu0  ;;  %v11924_v14 = vld [vmem:[#allocation11_spill] sm:$0xff]  ;;  %v11925_v60 = vld [vmem:[#allocation13_spill] sm:$0xff] }
 0x1c7   : > { %7795 = vmatprep.mubr.msk.f32.mxu1 %vm408_vm3, %v8693_v21  ;;  %v1112_v15 = vpop.f32.mrf.mxu1 }
 0x1c8   : > { %v9437_v13 = vadd.f32 %v1112_v15, %v788_v20 }
 0x1c9   : > { %7746 = vmatmul.mubr.msk.f32.vlgmr.msra.gmra.mxu0 %vm408_vm3, %v8707_v25 }
 0x1ca   : > { %7796 = vmatmul.mubr.msk.f32.vlgmr.msra.gmra.mxu1 %vm408_vm3, %v8705_v24  ;;  %7844 = vmatpush3.msk.msra.mxu0 %vm648_vm2, %v9255_v29  ;;  %v11926_v24 = vld [vmem:[#allocation15_spill] sm:$0xff]  ;;  %v11927_v29 = vld [vmem:[#allocation17_spill] sm:$0xff] }
 0x1cb   : > { %7748 = vmatprep.mubr.msk.f32.mxu0 %vm408_vm3, %v11924_v14  ;;  %7798 = vmatprep.mubr.msk.f32.mxu1 %vm408_vm3, %v8717_v27  ;;  %v11928_v27 = vld [vmem:[#allocation19_spill] sm:$0xff] }
 0x1cc   : > { %v7471_v21 = vpop.f32.mrf.mxu0 }
 0x1cd   : > { %v7521_v22 = vpop.f32.mrf.mxu1  ;;  %7749 = vmatmul.mubr.msk.f32.gmra.mxu0 %vm408_vm3, %v11925_v60 }
 0x1ce   : > { %7799 = vmatmul.mubr.msk.f32.gmra.mxu1 %vm408_vm3, %v8729_v30  ;;  %v9453_v25 = vadd.f32 %v7521_v22, %v7471_v21  ;;  %7751 = vmatprep.mubr.msk.f32.mxu0 %vm408_vm3, %v11926_v24  ;;  %v9467_v30 = vpop.f32.mrf.mxu0  ;;  %v11929_v21 = vld [vmem:[#allocation21_spill] sm:$0xff]  ;;  %v11932_v22 = vld [vmem:[#allocation27_spill] sm:$0xff] }
 0x1cf   : > { %7801 = vmatprep.mubr.msk.f32.mxu1 %vm408_vm3, %v8741_v33  ;;  %v9469_v15 = vpop.f32.mrf.mxu1 }
 0x1d1   : > { %7752 = vmatmul.mubr.msk.f32.gmra.mxu0 %vm408_vm3, %v11927_v29 }
 0x1d2   : > { %7802 = vmatmul.mubr.msk.f32.gmra.mxu1 %vm408_vm3, %v8753_v36  ;;  %7754 = vmatprep.mubr.msk.f32.mxu0 %vm408_vm3, %v11928_v27  ;;  %v11930_v36 = vld [vmem:[#allocation23_spill] sm:$0xff]  ;;  %v11933_v27 = vld [vmem:[#allocation29_spill] sm:$0xff] }
 0x1d3   : > { %7804 = vmatprep.mubr.msk.f32.mxu1 %vm408_vm3, %v8765_v39  ;;  %v11931_v39 = vld [vmem:[#allocation25_spill] sm:$0xff] }
 0x1d4   : > { %v7474_v20 = vpop.f32.mrf.mxu0 }
 0x1d5   : > { %v7524_v14 = vpop.f32.mrf.mxu1  ;;  %7755 = vmatmul.mubr.msk.f32.gmra.mxu0 %vm408_vm3, %v11929_v21 }
 0x1d6   : > { %7805 = vmatmul.mubr.msk.f32.gmra.mxu1 %vm408_vm3, %v8777_v42  ;;  %v9475_v33 = vadd.f32 %v7524_v14, %v7474_v20  ;;  %7757 = vmatprep.mubr.msk.f32.mxu0 %vm408_vm3, %v11930_v36  ;;  %v9489_v42 = vpop.f32.mrf.mxu0  ;;  %v11936_v20 = vld [vmem:[#allocation35_spill] sm:$0xff] }
 0x1d7   : > { %7807 = vmatprep.mubr.msk.f32.mxu1 %vm408_vm3, %v8789_v45  ;;  %v9491_v60 = vpop.f32.mrf.mxu1 }
 0x1d9   : > { %7758 = vmatmul.mubr.msk.f32.gmra.mxu0 %vm408_vm3, %v11931_v39  ;;  %v11937_v39 = vld [vmem:[#allocation38_spill] sm:$0xff] }
 0x1da   : > { %7808 = vmatmul.mubr.msk.f32.gmra.mxu1 %vm408_vm3, %v8801_v48  ;;  %7760 = vmatprep.mubr.msk.f32.mxu0 %vm408_vm3, %v11932_v22  ;;  %v11934_v48 = vld [vmem:[#allocation31_spill] sm:$0xff]  ;;  %v11940_v22 = vld [vmem:[#allocation44_spill] sm:$0xff] }
 0x1db   : > { %7810 = vmatprep.mubr.msk.f32.mxu1 %vm408_vm3, %v8813_v51  ;;  %v11935_v51 = vld [vmem:[#allocation33_spill] sm:$0xff] }
 0x1dc   : > { %v7477_v24 = vpop.f32.mrf.mxu0 }
 0x1dd   : > { %v7527_v29 = vpop.f32.mrf.mxu1  ;;  %7761 = vmatmul.mubr.msk.f32.gmra.mxu0 %vm408_vm3, %v11933_v27 }
 0x1de   : > { %7811 = vmatmul.mubr.msk.f32.gmra.mxu1 %vm408_vm3, %v8825_v54  ;;  %v9497_v45 = vadd.f32 %v7527_v29, %v7477_v24  ;;  %7763 = vmatprep.mubr.msk.f32.mxu0 %vm408_vm3, %v11934_v48  ;;  %v9511_v54 = vpop.f32.mrf.mxu0  ;;  %v11941_v48 = vld [vmem:[#allocation46_spill] sm:$0xff] }
 0x1df   : > { %7813 = vmatprep.mubr.msk.f32.mxu1 %vm408_vm3, %v8844_v58  ;;  %v9513_v14 = vpop.f32.mrf.mxu1 }
 0x1e1   : > { %7764 = vmatmul.mubr.msk.f32.gmra.mxu0 %vm408_vm3, %v11935_v51  ;;  %v11944_v51 = vld [vmem:[#allocation52_spill] sm:$0xff] }
 0x1e2   : > { %7814 = vmatmul.mubr.msk.f32.gmra.mxu1 %vm408_vm3, %v8856_v61  ;;  %7766 = vmatprep.mubr.msk.f32.mxu0 %vm408_vm3, %v11936_v20  ;;  %v11938_v61 = vld [vmem:[#allocation40_spill] sm:$0xff] }
 0x1e3   : > { %7816 = vmatprep.mubr.msk.f32.mxu1 %vm408_vm3, %v8868_v0  ;;  %v11939_v0 = vld [vmem:[#allocation42_spill] sm:$0xff] }
 0x1e4   : > { %v7480_v21 = vpop.f32.mrf.mxu0 }
 0x1e5   : > { %v7530_v36 = vpop.f32.mrf.mxu1  ;;  %7767 = vmatmul.mubr.msk.f32.gmra.mxu0 %vm408_vm3, %v11937_v39  ;;  %v11947_v39 = vld [vmem:[#allocation54_spill] sm:$0xff] }
 0x1e6   : > { %7817 = vmatmul.mubr.msk.f32.gmra.mxu1 %vm408_vm3, %v8882_v6  ;;  %v9519_v58 = vadd.f32 %v7530_v36, %v7480_v21  ;;  %7769 = vmatprep.mubr.msk.f32.mxu0 %vm408_vm3, %v11938_v61  ;;  %v9533_v6 = vpop.f32.mrf.mxu0  ;;  %v11950_v61 = vld [vmem:[#allocation61_spill] sm:$0xff] }
 0x1e7   : > { %7819 = vmatprep.mubr.msk.f32.mxu1 %vm408_vm3, %v8894_v9  ;;  %v9535_v24 = vpop.f32.mrf.mxu1 }
 0x1e9   : > { %7770 = vmatmul.mubr.msk.f32.gmra.mxu0 %vm408_vm3, %v11939_v0 }
 0x1ea   : > { %7820 = vmatmul.mubr.msk.f32.gmra.mxu1 %vm408_vm3, %v8906_v3  ;;  %7772 = vmatprep.mubr.msk.f32.mxu0 %vm408_vm3, %v11940_v22  ;;  %v11942_v3 = vld [vmem:[#allocation48_spill] sm:$0xff] }
 0x1eb   : > { %7822 = vmatprep.mubr.msk.f32.mxu1 %vm408_vm3, %v8918_v63  ;;  %v11943_v63 = vld [vmem:[#allocation50_spill] sm:$0xff] }
 0x1ec   : > { %v7483_v29 = vpop.f32.mrf.mxu0 }
 0x1ed   : > { %v7533_v27 = vpop.f32.mrf.mxu1  ;;  %7773 = vmatmul.mubr.msk.f32.gmra.mxu0 %vm408_vm3, %v11941_v48 }
 0x1ee   : > { %7823 = vmatmul.mubr.msk.f32.gmra.mxu1 %vm408_vm3, %v8930_v57  ;;  %v9541_v9 = vadd.f32 %v7533_v27, %v7483_v29  ;;  %7775 = vmatprep.mubr.msk.f32.mxu0 %vm408_vm3, %v11942_v3  ;;  %v9555_v57 = vpop.f32.mrf.mxu0  ;;  %v511_v27 = vld [vmem:[#allocation2 + $0x199] sm:$0xff] }
 0x1ef   : > { %7825 = vmatprep.mubr.msk.f32.mxu1 %vm408_vm3, %v8942_v50  ;;  %11945 = vst [vmem:[#allocation11_spill] sm:$0xff] %v9555_v57  ;;  %v9557_v20 = vpop.f32.mrf.mxu1 }
 0x1f0   : > { %11946 = vst [vmem:[#allocation13_spill] sm:$0xff] %v9557_v20 }
 0x1f1   : > { %7776 = vmatmul.mubr.msk.f32.gmra.mxu0 %vm408_vm3, %v11943_v63 }
 0x1f2   : > { %7826 = vmatmul.mubr.msk.f32.gmra.mxu1 %vm408_vm3, %v8954_v44  ;;  %7778 = vmatprep.mubr.msk.f32.mxu0 %vm408_vm3, %v11944_v51  ;;  %v11948_v44 = vld [vmem:[#allocation56_spill] sm:$0xff] }
 0x1f3   : > { %7828 = vmatprep.mubr.msk.f32.mxu1 %vm408_vm3, %v8966_v38  ;;  %v11949_v38 = vld [vmem:[#allocation59_spill] sm:$0xff] }
 0x1f4   : > { %v7486_v21 = vpop.f32.mrf.mxu0 }
 0x1f5   : > { %v7536_v36 = vpop.f32.mrf.mxu1  ;;  %7779 = vmatmul.mubr.msk.f32.gmra.mxu0 %vm408_vm3, %v11947_v39  ;;  %v11958_v39 = vld [vmem:[#allocation36_spill] sm:$0xff] }
 0x1f6   : > { %7829 = vmatmul.mubr.msk.f32.gmra.mxu1 %vm408_vm3, %v8978_v32  ;;  %v9563_v50 = vadd.f32 %v7536_v36, %v7486_v21  ;;  %7781 = vmatprep.mubr.msk.f32.mxu0 %vm408_vm3, %v11948_v44  ;;  %v9577_v32 = vpop.f32.mrf.mxu0 }
 0x1f7   : > { %7831 = vmatprep.mubr.msk.f32.mxu1 %vm408_vm3, %v8990_v26  ;;  %11951 = vst [vmem:[#allocation15_spill] sm:$0xff] %v9577_v32  ;;  %v9579_v0 = vpop.f32.mrf.mxu1 }
 0x1f8   : > { %11952 = vst [vmem:[#allocation17_spill] sm:$0xff] %v9579_v0 }
 0x1f9   : > { %7782 = vmatmul.mubr.msk.f32.gmra.mxu0 %vm408_vm3, %v11949_v38 }
 0x1fa   : > { %7832 = vmatmul.mubr.msk.f32.gmra.mxu1 %vm408_vm3, %v11918_v53  ;;  %7784 = vmatprep.mubr.msk.f32.mxu0 %vm408_vm3, %v11950_v61  ;;  %v11953_v53 = vld [vmem:[#allocation74_spill] sm:$0xff] }
 0x1fb   : > { %7834 = vmatprep.mubr.msk.f32.mxu1 %vm408_vm3, %v11919_v41  ;;  %v475_v41 = vld [vmem:[#allocation2 + $0x198] sm:$0xff] }
 0x1fc   : > { %v7489_v22 = vpop.f32.mrf.mxu0 }
 0x1fd   : > { %v7539_v29 = vpop.f32.mrf.mxu1  ;;  %7785 = vmatmul.mubr.msk.f32.gmra.mxu0 %vm408_vm3, %v9026_v4  ;;  %v476_v4 = vld [vmem:[#allocation2 + $0x1a0] sm:$0xff] }
 0x1fe   : > { %7835 = vmatmul.mubr.msk.f32.gmra.mxu1 %vm408_vm3, %v11920_v35  ;;  %v9585_v26 = vadd.f32 %v7539_v29, %v7489_v22  ;;  %7787 = vmatprep.mubr.msk.f32.mxu0 %vm408_vm3, %v11953_v53  ;;  %v512_v35 = vld [vmem:[#allocation2 + $0x1a1] sm:$0xff]  ;;  %v9597_v48 = vpop.f32.mrf.mxu0 }
 0x1ff   : > { %7837 = vmatprep.mubr.msk.f32.mxu1 %vm408_vm3, %v9411_v18  ;;  %11954 = vst [vmem:[#allocation19_spill] sm:$0xff] %v9597_v48  ;;  %v9599_v3 = vpop.f32.mrf.mxu1 }
 0x200   : > { %11955 = vst [vmem:[#allocation21_spill] sm:$0xff] %v9599_v3 }
 0x201   : > { %7788 = vmatmul.mubr.msk.f32.gmra.mxu0 %vm408_vm3, %v9236_v17 }
 0x202   : > { %7838 = vmatmul.mubr.msk.f32.gmra.mxu1 %vm408_vm3, %v9423_v23  ;;  %7790 = vmatprep.mubr.msk.f32.mxu0 %vm408_vm3, %v475_v41 }
 0x203   : > { %7840 = vmatprep.mubr.msk.f32.mxu1 %vm408_vm3, %v511_v27 }
 0x205   : > { %v7492_v63 = vpop.f32.mrf.mxu0  ;;  %7791 = vmatmul.mubr.msk.f32.gmra.mxu0 %vm408_vm3, %v476_v4 }
 0x206   : > { %v7542_v18 = vpop.f32.mrf.mxu1  ;;  %7841 = vmatmul.mubr.msk.f32.gmra.mxu1 %vm408_vm3, %v512_v35  ;;  %7845 = vmatprep.mubr.msk.f32.mxu0 %vm408_vm3, %v9072_v11 }
 0x207   : > { %v9603_v17 = vadd.f32 %v7542_v18, %v7492_v63  ;;  %v9607_v23 = vpop.f32.mrf.mxu0 }
 0x208   : > { %11956 = vst [vmem:[#allocation23_spill] sm:$0xff] %v9607_v23  ;;  %v9609_v51 = vpop.f32.mrf.mxu1 }
 0x209   : > { %11957 = vst [vmem:[#allocation25_spill] sm:$0xff] %v9609_v51  ;;  %v7547_v21 = vpop.f32.mrf.mxu0  ;;  %7846 = vmatmul.mubr.msk.f32.vlgmr.msra.gmra.mxu0 %vm408_vm3, %v9078_v16 }
 0x20a   : > { %v7597_v36 = vpop.f32.mrf.mxu1  ;;  %v1528_v44 = vadd.f32 %v7547_v21, %v11958_v39  ;;  %7848 = vmatprep.mubr.msk.f32.mxu0 %vm408_vm3, %v9084_v19 }
 0x20b   : > { %v9616_v38 = vpop.f32.mrf.mxu0 }
 0x20c   : > { %v9618_v61 = vpop.f32.mrf.mxu1  ;;  %v9620_v22 = vadd.f32 %v7597_v36, %v1528_v44  ;;  %v6539_v36 = vld [vmem:[%s11710_s3 + $0x4] sm:$0xf] }
 0x20d   : > { %v7550_v11 = vpop.f32.mrf.mxu0  ;;  %7849 = vmatmul.mubr.msk.f32.gmra.mxu0 %vm408_vm3, %v9090_v56  ;;  %7893 = vmatprep.subr.msk.mxu1 %vm648_vm2, %v6539_v36 }
 0x20e   : > { %v7600_v29 = vpop.f32.mrf.mxu1  ;;  %v1530_v53 = vadd.f32 %v7550_v11, %v9291_v8  ;;  %7851 = vmatprep.mubr.msk.f32.mxu0 %vm408_vm3, %v9096_v2  ;;  %7894 = vmatpush3.msk.msra.mxu1 %vm648_vm2, %v6539_v36  ;;  %v11960_v36 = vld [vmem:[#allocation66_spill] sm:$0xff] }
 0x20f   : > { %v9627_v16 = vpop.f32.mrf.mxu0 }
 0x210   : > { %v9629_v41 = vpop.f32.mrf.mxu1  ;;  %v9631_v19 = vadd.f32 %v7600_v29, %v1530_v53 }
 0x211   : > { %v7553_v27 = vpop.f32.mrf.mxu0  ;;  %7852 = vmatmul.mubr.msk.f32.gmra.mxu0 %vm408_vm3, %v9102_v31 }
 0x212   : > { %v7603_v4 = vpop.f32.mrf.mxu1  ;;  %v1532_v35 = vadd.f32 %v7553_v27, %v9313_v12  ;;  %7854 = vmatprep.mubr.msk.f32.mxu0 %vm408_vm3, %v9108_v34 }
 0x213   : > { %v9638_v56 = vpop.f32.mrf.mxu0 }
 0x214   : > { %v9640_v8 = vpop.f32.mrf.mxu1  ;;  %v9642_v2 = vadd.f32 %v7603_v4, %v1532_v35 }
 0x215   : > { %v7556_v63 = vpop.f32.mrf.mxu0  ;;  %7855 = vmatmul.mubr.msk.f32.gmra.mxu0 %vm408_vm3, %v9114_v37 }
 0x216   : > { %v7606_v18 = vpop.f32.mrf.mxu1  ;;  %v1534_v21 = vadd.f32 %v7556_v63, %v9335_v46  ;;  %7857 = vmatprep.mubr.msk.f32.mxu0 %vm408_vm3, %v9120_v40  ;;  %v11959_v40 = vld [vmem:[#allocation65_spill] sm:$0xff] }
 0x217   : > { %v9649_v31 = vpop.f32.mrf.mxu0 }
 0x218   : > { %v9651_v12 = vpop.f32.mrf.mxu1  ;;  %v9653_v34 = vadd.f32 %v7606_v18, %v1534_v21 }
 0x219   : > { %v7559_v39 = vpop.f32.mrf.mxu0  ;;  %7858 = vmatmul.mubr.msk.f32.gmra.mxu0 %vm408_vm3, %v9126_v43 }
 0x21a   : > { %v7609_v44 = vpop.f32.mrf.mxu1  ;;  %v1536_v37 = vadd.f32 %v7559_v39, %v9357_v59  ;;  %7860 = vmatprep.mubr.msk.f32.mxu0 %vm408_vm3, %v11959_v40 }
 0x21b   : > { %v9665_v46 = vpop.f32.mrf.mxu0 }
 0x21c   : > { %v9667_v11 = vpop.f32.mrf.mxu1  ;;  %v9669_v29 = vadd.f32 %v7609_v44, %v1536_v37 }
 0x21d   : > { %v7562_v53 = vpop.f32.mrf.mxu0  ;;  %7861 = vmatmul.mubr.msk.f32.gmra.mxu0 %vm408_vm3, %v9138_v49 }
 0x21e   : > { %v7612_v27 = vpop.f32.mrf.mxu1  ;;  %v1538_v43 = vadd.f32 %v7562_v53, %v9379_v10  ;;  %7863 = vmatprep.mubr.msk.f32.mxu0 %vm408_vm3, %v9144_v52 }
 0x21f   : > { %v9676_v59 = vpop.f32.mrf.mxu0 }
 0x220   : > { %v9678_v4 = vpop.f32.mrf.mxu1  ;;  %v9680_v35 = vadd.f32 %v7612_v27, %v1538_v43 }
 0x221   : > { %v7565_v63 = vpop.f32.mrf.mxu0  ;;  %7864 = vmatmul.mubr.msk.f32.gmra.mxu0 %vm408_vm3, %v9150_v55 }
 0x222   : > { %v7615_v18 = vpop.f32.mrf.mxu1  ;;  %v1540_v21 = vadd.f32 %v7565_v63, %v9401_v47  ;;  %7866 = vmatprep.mubr.msk.f32.mxu0 %vm408_vm3, %v11960_v36  ;;  %v11964_v63 = vld [vmem:[#allocation67_spill] sm:$0xff] }
 0x223   : > { %v9687_v49 = vpop.f32.mrf.mxu0 }
 0x224   : > { %v9689_v10 = vpop.f32.mrf.mxu1  ;;  %v9691_v52 = vadd.f32 %v7615_v18, %v1540_v21 }
 0x225   : > { %11961 = vst [vmem:[#allocation27_spill] sm:$0xff] %v9689_v10  ;;  %v7568_v39 = vpop.f32.mrf.mxu0  ;;  %7867 = vmatmul.mubr.msk.f32.gmra.mxu0 %vm408_vm3, %v9162_v62  ;;  %v1123_v62 = vadd.f32 %v9469_v15, %v9467_v30  ;;  %v11968_v30 = vld [vmem:[#allocation69_spill] sm:$0xff] }
 0x226   : > { %v7618_v44 = vpop.f32.mrf.mxu1  ;;  %v1542_v37 = vadd.f32 %v7568_v39, %v9431_v5  ;;  %7869 = vmatprep.mubr.msk.f32.mxu0 %vm408_vm3, %v9168_v1 }
 0x227   : > { %v1438_v47 = vpop.f32.mrf.mxu0 }
 0x228   : > { %v9698_v55 = vpop.f32.mrf.mxu1  ;;  %v9700_v40 = vadd.f32 %v7618_v44, %v1542_v37  ;;  %v9703_v53 = vadd.f32 %v1438_v47, %v9437_v13  ;;  %v11967_v44 = vld [vmem:[#allocation68_spill] sm:$0xff] }
 0x229   : > { %11962 = vst [vmem:[#allocation29_spill] sm:$0xff] %v9698_v55  ;;  %v7571_v27 = vpop.f32.mrf.mxu0  ;;  %7870 = vmatmul.mubr.msk.f32.gmra.mxu0 %vm408_vm3, %v9174_v7 }
 0x22a   : > { %11963 = vst [vmem:[#allocation31_spill] sm:$0xff] %v9703_v53  ;;  %v7621_v43 = vpop.f32.mrf.mxu1  ;;  %v1544_v5 = vadd.f32 %v7571_v27, %v9453_v25  ;;  %7872 = vmatprep.mubr.msk.f32.mxu0 %vm408_vm3, %v11964_v63 }
 0x22b   : > { %v1448_v1 = vpop.f32.mrf.mxu0 }
 0x22c   : > { %v9712_v18 = vpop.f32.mrf.mxu1  ;;  %v9714_v21 = vadd.f32 %v7621_v43, %v1544_v5  ;;  %v9716_v13 = vadd.f32 %v1448_v1, %v1123_v62  ;;  %v11971_v43 = vld [vmem:[#allocation70_spill] sm:$0xff]  ;;  %v11972_v5 = vld [vmem:[#allocation71_spill] sm:$0xff] }
 0x22d   : > { %11965 = vst [vmem:[#allocation33_spill] sm:$0xff] %v9712_v18  ;;  %v7574_v36 = vpop.f32.mrf.mxu0  ;;  %7873 = vmatmul.mubr.msk.f32.gmra.mxu0 %vm408_vm3, %v11967_v44 }
 0x22e   : > { %11966 = vst [vmem:[#allocation35_spill] sm:$0xff] %v9716_v13  ;;  %v7624_v39 = vpop.f32.mrf.mxu1  ;;  %v1546_v7 = vadd.f32 %v7574_v36, %v9475_v33  ;;  %7875 = vmatprep.mubr.msk.f32.mxu0 %vm408_vm3, %v11968_v30  ;;  %v11976_v30 = vld [vmem:[#allocation73_spill] sm:$0xff] }
 0x22f   : > { %v9723_v25 = vpop.f32.mrf.mxu0 }
 0x230   : > { %11969 = vst [vmem:[#allocation38_spill] sm:$0xff] %v9723_v25  ;;  %v9725_v15 = vpop.f32.mrf.mxu1  ;;  %v9727_v37 = vadd.f32 %v7624_v39, %v1546_v7  ;;  %v11975_v39 = vld [vmem:[#allocation72_spill] sm:$0xff] }
 0x231   : > { %11970 = vst [vmem:[#allocation40_spill] sm:$0xff] %v9725_v15  ;;  %v7577_v47 = vpop.f32.mrf.mxu0  ;;  %7876 = vmatmul.mubr.msk.f32.gmra.mxu0 %vm408_vm3, %v11971_v43 }
 0x232   : > { %v7627_v27 = vpop.f32.mrf.mxu1  ;;  %v1548_v62 = vadd.f32 %v7577_v47, %v9497_v45  ;;  %7878 = vmatprep.mubr.msk.f32.mxu0 %vm408_vm3, %v11972_v5 }
 0x233   : > { %v9734_v33 = vpop.f32.mrf.mxu0 }
 0x234   : > { %11973 = vst [vmem:[#allocation42_spill] sm:$0xff] %v9734_v33  ;;  %v9736_v63 = vpop.f32.mrf.mxu1  ;;  %v9738_v1 = vadd.f32 %v7627_v27, %v1548_v62  ;;  %v11979_v27 = vld [vmem:[#allocation75_spill] sm:$0xff]  ;;  %v11980_v33 = vld [vmem:[#allocation76_spill] sm:$0xff] }
 0x235   : > { %11974 = vst [vmem:[#allocation44_spill] sm:$0xff] %v9736_v63  ;;  %v7580_v36 = vpop.f32.mrf.mxu0  ;;  %7879 = vmatmul.mubr.msk.f32.gmra.mxu0 %vm408_vm3, %v11975_v39 }
 0x236   : > { %v7630_v44 = vpop.f32.mrf.mxu1  ;;  %v1550_v7 = vadd.f32 %v7580_v36, %v9519_v58  ;;  %7881 = vmatprep.mubr.msk.f32.mxu0 %vm408_vm3, %v11976_v30 }
 0x237   : > { %v9745_v45 = vpop.f32.mrf.mxu0 }
 0x238   : > { %11977 = vst [vmem:[#allocation46_spill] sm:$0xff] %v9745_v45  ;;  %v9747_v47 = vpop.f32.mrf.mxu1  ;;  %v9749_v43 = vadd.f32 %v7630_v44, %v1550_v7  ;;  %v11983_v44 = vld [vmem:[#allocation77_spill] sm:$0xff]  ;;  %v11984_v45 = vld [vmem:[#allocation58_spill] sm:$0xff] }
 0x239   : > { %11978 = vst [vmem:[#allocation48_spill] sm:$0xff] %v9747_v47  ;;  %v7583_v5 = vpop.f32.mrf.mxu0  ;;  %7882 = vmatmul.mubr.msk.f32.gmra.mxu0 %vm408_vm3, %v11979_v27 }
 0x23a   : > { %v7633_v63 = vpop.f32.mrf.mxu1  ;;  %v1552_v62 = vadd.f32 %v7583_v5, %v9541_v9  ;;  %7884 = vmatprep.mubr.msk.f32.mxu0 %vm408_vm3, %v11980_v33  ;;  %v547_v33 = vld [vmem:[#allocation2 + $0x19a] sm:$0xff] }
 0x23b   : > { %v9756_v58 = vpop.f32.mrf.mxu0 }
 0x23c   : > { %11981 = vst [vmem:[#allocation50_spill] sm:$0xff] %v9756_v58  ;;  %v9758_v36 = vpop.f32.mrf.mxu1  ;;  %v9760_v39 = vadd.f32 %v7633_v63, %v1552_v62  ;;  %v3379_v58 = vld [vmem:[%s11710_s3] sm:$0xf] }
 0x23d   : > { %11982 = vst [vmem:[#allocation52_spill] sm:$0xff] %v9758_v36  ;;  %v7586_v30 = vpop.f32.mrf.mxu0  ;;  %7885 = vmatmul.mubr.msk.f32.gmra.mxu0 %vm408_vm3, %v11983_v44  ;;  %7943 = vmatprep.subr.msk.mxu0 %vm648_vm2, %v3379_v58 }
 0x23e   : > { %v7636_v47 = vpop.f32.mrf.mxu1  ;;  %v1554_v7 = vadd.f32 %v7586_v30, %v9563_v50  ;;  %7887 = vmatprep.mubr.msk.f32.mxu0 %vm408_vm3, %v11984_v45  ;;  %v548_v50 = vld [vmem:[#allocation2 + $0x1a2] sm:$0xff]  ;;  %7944 = vmatpush3.msk.msra.mxu0 %vm648_vm2, %v3379_v58 }
 0x23f   : > { %v9767_v9 = vpop.f32.mrf.mxu0 }
 0x240   : > { %11985 = vst [vmem:[#allocation54_spill] sm:$0xff] %v9767_v9  ;;  %v9769_v5 = vpop.f32.mrf.mxu1  ;;  %v9771_v27 = vadd.f32 %v7636_v47, %v1554_v7 }
 0x241   : > { %11986 = vst [vmem:[#allocation56_spill] sm:$0xff] %v9769_v5  ;;  %v7589_v36 = vpop.f32.mrf.mxu0  ;;  %7888 = vmatmul.mubr.msk.f32.gmra.mxu0 %vm408_vm3, %v9425_v28 }
 0x242   : > { %v7639_v63 = vpop.f32.mrf.mxu1  ;;  %v1556_v62 = vadd.f32 %v7589_v36, %v9585_v26  ;;  %7890 = vmatprep.mubr.msk.f32.mxu0 %vm408_vm3, %v547_v33 }
 0x243   : > { %v9777_v30 = vpop.f32.mrf.mxu0 }
 0x244   : > { %11987 = vst [vmem:[#allocation59_spill] sm:$0xff] %v9777_v30  ;;  %v9779_v45 = vpop.f32.mrf.mxu1  ;;  %v9781_v44 = vadd.f32 %v7639_v63, %v1556_v62 }
 0x245   : > { %11988 = vst [vmem:[#allocation61_spill] sm:$0xff] %v9779_v45  ;;  %v7592_v5 = vpop.f32.mrf.mxu0  ;;  %7891 = vmatmul.mubr.msk.f32.gmra.mxu0 %vm408_vm3, %v548_v50 }
 0x246   : > { %v7642_v9 = vpop.f32.mrf.mxu1  ;;  %v1558_v47 = vadd.f32 %v7592_v5, %v9603_v17 }
 0x247   : > { %v9785_v7 = vpop.f32.mrf.mxu0 }
 0x248   : > { %11989 = vst [vmem:[#allocation74_spill] sm:$0xff] %v9785_v7  ;;  %v9787_v28 = vpop.f32.mrf.mxu1  ;;  %v9789_v26 = vadd.f32 %v7642_v9, %v1558_v47 }
 0x249   : > { %11990 = vst [vmem:[#allocation36_spill] sm:$0xff] %v9787_v28  ;;  %v7647_v36 = vpop.f32.mrf.mxu0 }
 0x24a   : > { %v9791_v33 = vpop.f32.mrf.mxu1  ;;  %v9794_v30 = vadd.f32 %v7647_v36, %v9620_v22 }
 0x24b   : > { %v9796_v63 = vpop.f32.mrf.mxu0 }
 0x24c   : > { %v9798_v62 = vpop.f32.mrf.mxu1 }
 0x24d   : > { %v7650_v45 = vpop.f32.mrf.mxu0 }
 0x24e   : > { %v9800_v50 = vpop.f32.mrf.mxu1  ;;  %v9803_v17 = vadd.f32 %v7650_v45, %v9631_v19  ;;  %v3307_v19 = vld [vmem:[#allocation3 + $0x1] sm:$0xff] }
 0x24f   : > { %v9805_v5 = vpop.f32.mrf.mxu0  ;;  %v3271_v45 = vld [vmem:[#allocation3] sm:$0xff]  ;;  %7895 = vmatprep.mubr.msk.f32.mxu1 %vm408_vm3, %v3307_v19 }
 0x250   : > { %v9807_v9 = vpop.f32.mrf.mxu1  ;;  %7945 = vmatprep.mubr.msk.f32.mxu0 %vm408_vm3, %v3271_v45 }
 0x251   : > { %v7653_v47 = vpop.f32.mrf.mxu0 }
 0x252   : > { %v9809_v28 = vpop.f32.mrf.mxu1  ;;  %v9812_v22 = vadd.f32 %v7653_v47, %v9642_v2  ;;  %v3308_v2 = vld [vmem:[#allocation3 + $0x9] sm:$0xff] }
 0x253   : > { %v9814_v36 = vpop.f32.mrf.mxu0  ;;  %v3272_v47 = vld [vmem:[#allocation3 + $0x8] sm:$0xff]  ;;  %7896 = vmatmul.mubr.msk.f32.vlgmr.msra.gmra.mxu1 %vm408_vm3, %v3308_v2 }
 0x254   : > { %v9816_v7 = vpop.f32.mrf.mxu1  ;;  %7946 = vmatmul.mubr.msk.f32.vlgmr.msra.gmra.mxu0 %vm408_vm3, %v3272_v47 }
 0x255   : > { %v7656_v15 = vpop.f32.mrf.mxu0 }
 0x256   : > { %v9822_v25 = vpop.f32.mrf.mxu1  ;;  %v9827_v18 = vadd.f32 %v7656_v15, %v9653_v34  ;;  %v6606_v15 = vld [vmem:[%s11710_s3 + $0x8] sm:$0xf] }
 0x257   : > { %v9831_v13 = vpop.f32.mrf.mxu0  ;;  %7993 = vmatprep.subr.msk.mxu1 %vm648_vm2, %v6606_v15 }
 0x258   : > { %v9833_v55 = vpop.f32.mrf.mxu1  ;;  %7994 = vmatpush3.msk.msra.mxu1 %vm648_vm2, %v6606_v15 }
 0x259   : > { %v7659_v53 = vpop.f32.mrf.mxu0 }
 0x25a   : > { %v9836_v51 = vpop.f32.mrf.mxu1  ;;  %v9839_v58 = vadd.f32 %v7659_v53, %v9669_v29 }
 0x25b   : > { %11991 = vst [vmem:[#allocation65_spill] sm:$0xff] %v9836_v51  ;;  %v9841_v19 = vpop.f32.mrf.mxu0 }
 0x25c   : > { %v9843_v34 = vpop.f32.mrf.mxu1 }
 0x25d   : > { %11992 = vst [vmem:[#allocation66_spill] sm:$0xff] %v9843_v34  ;;  %v7662_v45 = vpop.f32.mrf.mxu0 }
 0x25e   : > { %v9848_v2 = vpop.f32.mrf.mxu1  ;;  %v9852_v47 = vadd.f32 %v7662_v45, %v9680_v35 }
 0x25f   : > { %11993 = vst [vmem:[#allocation67_spill] sm:$0xff] %v9848_v2  ;;  %v9855_v29 = vpop.f32.mrf.mxu0 }
 0x260   : > { %11994 = vst [vmem:[#allocation68_spill] sm:$0xff] %v9852_v47  ;;  %11995 = vst [vmem:[#allocation69_spill] sm:$0xff] %v9855_v29  ;;  %v9857_v53 = vpop.f32.mrf.mxu1 }
 0x261   : > { %11996 = vst [vmem:[#allocation70_spill] sm:$0xff] %v9857_v53  ;;  %v7665_v23 = vpop.f32.mrf.mxu0 }
 0x262   : > { %v9859_v3 = vpop.f32.mrf.mxu1  ;;  %v9862_v48 = vadd.f32 %v7665_v23, %v9691_v52 }
 0x263   : > { %11997 = vst [vmem:[#allocation71_spill] sm:$0xff] %v9859_v3  ;;  %v9864_v10 = vpop.f32.mrf.mxu0 }
 0x264   : > { %11998 = vst [vmem:[#allocation72_spill] sm:$0xff] %v9862_v48  ;;  %11999 = vst [vmem:[#allocation73_spill] sm:$0xff] %v9864_v10  ;;  %v9866_v2 = vpop.f32.mrf.mxu1 }
 0x265   : > { %12000 = vst [vmem:[#allocation75_spill] sm:$0xff] %v9866_v2  ;;  %v7668_v0 = vpop.f32.mrf.mxu0 }
 0x266   : > { %v9868_v32 = vpop.f32.mrf.mxu1  ;;  %v9871_v35 = vadd.f32 %v7668_v0, %v9700_v40 }
 0x267   : > { %12001 = vst [vmem:[#allocation76_spill] sm:$0xff] %v9868_v32  ;;  %v9873_v15 = vpop.f32.mrf.mxu0 }
 0x268   : > { %12002 = vst [vmem:[#allocation77_spill] sm:$0xff] %v9871_v35  ;;  %12003 = vst [vmem:[#allocation58_spill] sm:$0xff] %v9873_v15  ;;  %v9875_v45 = vpop.f32.mrf.mxu1 }
 0x269   : > { %12004 = vst [vmem:[#allocation90_spill] sm:$0xff] %v9875_v45  ;;  %v7671_v53 = vpop.f32.mrf.mxu0 }
 0x26a   : > { %v9877_v47 = vpop.f32.mrf.mxu1  ;;  %v9880_v23 = vadd.f32 %v7671_v53, %v9714_v21 }
 0x26b   : > { %12005 = vst [vmem:[#allocation91_spill] sm:$0xff] %v9877_v47  ;;  %v9882_v52 = vpop.f32.mrf.mxu0 }
 0x26c   : > { %12006 = vst [vmem:[#allocation92_spill] sm:$0xff] %v9880_v23  ;;  %12007 = vst [vmem:[#allocation93_spill] sm:$0xff] %v9882_v52  ;;  %v9884_v3 = vpop.f32.mrf.mxu1 }
 0x26d   : > { %12008 = vst [vmem:[#allocation94_spill] sm:$0xff] %v9884_v3  ;;  %v7674_v2 = vpop.f32.mrf.mxu0 }
 0x26e   : > { %v9886_v48 = vpop.f32.mrf.mxu1  ;;  %v9889_v0 = vadd.f32 %v7674_v2, %v9727_v37 }
 0x26f   : > { %12009 = vst [vmem:[#allocation95_spill] sm:$0xff] %v9886_v48  ;;  %v9891_v40 = vpop.f32.mrf.mxu0 }
 0x270   : > { %12010 = vst [vmem:[#allocation96_spill] sm:$0xff] %v9889_v0  ;;  %12011 = vst [vmem:[#allocation97_spill] sm:$0xff] %v9891_v40  ;;  %v9893_v32 = vpop.f32.mrf.mxu1 }
 0x271   : > { %12012 = vst [vmem:[#allocation98_spill] sm:$0xff] %v9893_v32  ;;  %v7677_v45 = vpop.f32.mrf.mxu0 }
 0x272   : > { %v9895_v35 = vpop.f32.mrf.mxu1  ;;  %v9898_v21 = vadd.f32 %v7677_v45, %v9738_v1 }
 0x273   : > { %12013 = vst [vmem:[#allocation99_spill] sm:$0xff] %v9895_v35  ;;  %v9900_v53 = vpop.f32.mrf.mxu0 }
 0x274   : > { %12014 = vst [vmem:[#allocation100_spill] sm:$0xff] %v9898_v21  ;;  %12015 = vst [vmem:[#allocation101_spill] sm:$0xff] %v9900_v53  ;;  %v9902_v47 = vpop.f32.mrf.mxu1 }
 0x275   : > { %12016 = vst [vmem:[#allocation102_spill] sm:$0xff] %v9902_v47  ;;  %v7680_v3 = vpop.f32.mrf.mxu0 }
 0x276   : > { %v9904_v23 = vpop.f32.mrf.mxu1  ;;  %v9907_v37 = vadd.f32 %v7680_v3, %v9749_v43 }
 0x277   : > { %12017 = vst [vmem:[#allocation103_spill] sm:$0xff] %v9904_v23  ;;  %v9909_v2 = vpop.f32.mrf.mxu0 }
 0x278   : > { %12018 = vst [vmem:[#allocation104_spill] sm:$0xff] %v9907_v37  ;;  %12019 = vst [vmem:[#allocation105_spill] sm:$0xff] %v9909_v2  ;;  %v9911_v48 = vpop.f32.mrf.mxu1 }
 0x279   : > { %12020 = vst [vmem:[#allocation106_spill] sm:$0xff] %v9911_v48  ;;  %v7683_v32 = vpop.f32.mrf.mxu0 }
 0x27a   : > { %v9913_v0 = vpop.f32.mrf.mxu1  ;;  %v9916_v1 = vadd.f32 %v7683_v32, %v9760_v39 }
 0x27b   : > { %12021 = vst [vmem:[#allocation107_spill] sm:$0xff] %v9913_v0  ;;  %v9918_v45 = vpop.f32.mrf.mxu0 }
 0x27c   : > { %12022 = vst [vmem:[#allocation108_spill] sm:$0xff] %v9916_v1  ;;  %12023 = vst [vmem:[#allocation109_spill] sm:$0xff] %v9918_v45  ;;  %v9920_v35 = vpop.f32.mrf.mxu1 }
 0x27d   : > { %12024 = vst [vmem:[#allocation110_spill] sm:$0xff] %v9920_v35  ;;  %v7686_v47 = vpop.f32.mrf.mxu0 }
 0x27e   : > { %v9922_v21 = vpop.f32.mrf.mxu1  ;;  %v9925_v3 = vadd.f32 %v7686_v47, %v9771_v27 }
 0x27f   : > { %12025 = vst [vmem:[#allocation111_spill] sm:$0xff] %v9922_v21  ;;  %v9927_v43 = vpop.f32.mrf.mxu0 }
 0x280   : > { %12026 = vst [vmem:[#allocation112_spill] sm:$0xff] %v9925_v3  ;;  %12027 = vst [vmem:[#allocation113_spill] sm:$0xff] %v9927_v43  ;;  %v9929_v23 = vpop.f32.mrf.mxu1 }
 0x281   : > { %12028 = vst [vmem:[#allocation114_spill] sm:$0xff] %v9929_v23  ;;  %v7689_v48 = vpop.f32.mrf.mxu0 }
 0x282   : > { %v9931_v37 = vpop.f32.mrf.mxu1  ;;  %v9934_v32 = vadd.f32 %v7689_v48, %v9781_v44 }
 0x283   : > { %12029 = vst [vmem:[#allocation115_spill] sm:$0xff] %v9931_v37  ;;  %v9936_v39 = vpop.f32.mrf.mxu0 }
 0x284   : > { %12030 = vst [vmem:[#allocation116_spill] sm:$0xff] %v9934_v32  ;;  %12031 = vst [vmem:[#allocation117_spill] sm:$0xff] %v9936_v39  ;;  %v9938_v0 = vpop.f32.mrf.mxu1 }
 0x285   : > { %12032 = vst [vmem:[#allocation118_spill] sm:$0xff] %v9938_v0  ;;  %v7692_v35 = vpop.f32.mrf.mxu0 }
 0x286   : > { %v9940_v1 = vpop.f32.mrf.mxu1  ;;  %v9943_v27 = vadd.f32 %v7692_v35, %v9789_v26 }
 0x287   : > { %12033 = vst [vmem:[#allocation119_spill] sm:$0xff] %v9940_v1  ;;  %v9945_v47 = vpop.f32.mrf.mxu0 }
 0x288   : > { %12034 = vst [vmem:[#allocation120_spill] sm:$0xff] %v9943_v27  ;;  %12035 = vst [vmem:[#allocation121_spill] sm:$0xff] %v9945_v47  ;;  %v9947_v21 = vpop.f32.mrf.mxu1  ;;  %v9974_v27 = vld [vmem:[%s11710_s3 + $0x10] sm:$0xf] }
 0x289   : > { %12036 = vst [vmem:[#allocation122_spill] sm:$0xff] %v9947_v21  ;;  %v9949_v23 = vpop.f32.mrf.mxu0  ;;  %v6640_v21 = vld [vmem:[%s11710_s3 + $0xc] sm:$0xf]  ;;  %12037 = vst [vmem:[#allocation123_spill] sm:$0xff] %v9974_v27  ;;  %8093 = vmatprep.subr.msk.mxu1 %vm648_vm2, %v9974_v27 }
 0x28a   : > { %v9951_v37 = vpop.f32.mrf.mxu1  ;;  %8043 = vmatprep.subr.msk.mxu0 %vm648_vm2, %v6640_v21 }
 0x28b   : > { %v9953_v48 = vpop.f32.mrf.mxu0  ;;  %8044 = vmatpush3.msk.msra.mxu0 %vm648_vm2, %v6640_v21 }
 0x28c   : > { %v9955_v44 = vpop.f32.mrf.mxu1 }
 0x28d   : > { %v9957_v32 = vpop.f32.mrf.mxu0 }
 0x28e   : > { %v9961_v1 = vpop.f32.mrf.mxu1 }
 0x28f   : > { %v9959_v0 = vpop.f32.mrf.mxu0 }
 0x290   : > { %v9976_v47 = vpop.f32.mrf.mxu1 }
 0x291   : > { %v9963_v26 = vpop.f32.mrf.mxu0 }
 0x292   : > { %v9985_v43 = vpop.f32.mrf.mxu1 }
 0x293   : > { %v9965_v35 = vpop.f32.mrf.mxu0 }
 0x294   : > { %v9991_v53 = vpop.f32.mrf.mxu1 }
 0x295   : > { %v9978_v39 = vpop.f32.mrf.mxu0  ;;  %12041 = vst [vmem:[#allocation127_spill] sm:$0xff] %v9991_v53 }
 0x296   : > { %v9997_v15 = vpop.f32.mrf.mxu1 }
 0x297   : > { %v9983_v3 = vpop.f32.mrf.mxu0  ;;  %12044 = vst [vmem:[#allocation130_spill] sm:$0xff] %v9997_v15 }
 0x298   : > { %12038 = vst [vmem:[#allocation124_spill] sm:$0xff] %v9983_v3  ;;  %v10003_v27 = vpop.f32.mrf.mxu1  ;;  %v12067_v3 = vld [vmem:[#allocation81_spill] sm:$0xff] }
 0x299   : > { %v9987_v45 = vpop.f32.mrf.mxu0  ;;  %12047 = vst [vmem:[#allocation133_spill] sm:$0xff] %v10003_v27 }
 0x29a   : > { %12039 = vst [vmem:[#allocation125_spill] sm:$0xff] %v9987_v45  ;;  %v10009_v45 = vpop.f32.mrf.mxu1 }
 0x29b   : > { %v9989_v2 = vpop.f32.mrf.mxu0  ;;  %12050 = vst [vmem:[#allocation136_spill] sm:$0xff] %v10009_v45 }
 0x29c   : > { %12040 = vst [vmem:[#allocation126_spill] sm:$0xff] %v9989_v2 }
 0x29d   : > { %v9993_v40 = vpop.f32.mrf.mxu0 }
 0x29e   : > { %12042 = vst [vmem:[#allocation128_spill] sm:$0xff] %v9993_v40  ;;  %v10015_v40 = vpop.f32.mrf.mxu1 }
 0x29f   : > { %v9995_v52 = vpop.f32.mrf.mxu0  ;;  %12053 = vst [vmem:[#allocation139_spill] sm:$0xff] %v10015_v40 }
 0x2a0   : > { %12043 = vst [vmem:[#allocation129_spill] sm:$0xff] %v9995_v52 }
 0x2a1   : > { %v9999_v21 = vpop.f32.mrf.mxu0 }
 0x2a2   : > { %12045 = vst [vmem:[#allocation131_spill] sm:$0xff] %v9999_v21  ;;  %v10021_v21 = vpop.f32.mrf.mxu1 }
 0x2a3   : > { %v10001_v10 = vpop.f32.mrf.mxu0  ;;  %12056 = vst [vmem:[#allocation142_spill] sm:$0xff] %v10021_v21 }
 0x2a4   : > { %12046 = vst [vmem:[#allocation132_spill] sm:$0xff] %v10001_v10 }
 0x2a5   : > { %v10005_v29 = vpop.f32.mrf.mxu0 }
 0x2a6   : > { %12048 = vst [vmem:[#allocation134_spill] sm:$0xff] %v10005_v29  ;;  %v10027_v29 = vpop.f32.mrf.mxu1 }
 0x2a7   : > { %v10007_v34 = vpop.f32.mrf.mxu0  ;;  %12059 = vst [vmem:[#allocation145_spill] sm:$0xff] %v10027_v29 }
 0x2a8   : > { %12049 = vst [vmem:[#allocation135_spill] sm:$0xff] %v10007_v34  ;;  %v10035_v40 = vpop.f32.mrf.mxu1 }
 0x2a9   : > { %v10011_v2 = vpop.f32.mrf.mxu0 }
 0x2aa   : > { %12051 = vst [vmem:[#allocation137_spill] sm:$0xff] %v10011_v2  ;;  %v12062_v2 = vld [vmem:[#allocation78_spill] sm:$0xff]  ;;  %v10044_v53 = vpop.f32.mrf.mxu1 }
 0x2ab   : > { %v10013_v20 = vpop.f32.mrf.mxu0  ;;  %12064 = vst [vmem:[#allocation78_spill] sm:$0xff] %v10035_v40 }
 0x2ac   : > { %12052 = vst [vmem:[#allocation138_spill] sm:$0xff] %v10013_v20  ;;  %v12063_v20 = vld [vmem:[#allocation79_spill] sm:$0xff] }
 0x2ad   : > { %v10017_v52 = vpop.f32.mrf.mxu0  ;;  %v1043_v57 = vadd.f32 %v12063_v20, %v12062_v2  ;;  %v12069_v20 = vld [vmem:[#allocation82_spill] sm:$0xff]  ;;  %v12070_v2 = vld [vmem:[#allocation83_spill] sm:$0xff] }
 0x2ae   : > { %12054 = vst [vmem:[#allocation140_spill] sm:$0xff] %v10017_v52  ;;  %v1063_v40 = vadd.f32 %v12070_v2, %v12069_v20 }
 0x2af   : > { %v10019_v15 = vpop.f32.mrf.mxu0 }
 0x2b0   : > { %12055 = vst [vmem:[#allocation141_spill] sm:$0xff] %v10019_v15  ;;  %v1527_v15 = vadd.f32 %v9616_v38, %v1043_v57  ;;  %v1531_v38 = vadd.f32 %v9638_v56, %v1063_v40 }
 0x2b1   : > { %v10023_v10 = vpop.f32.mrf.mxu0 }
 0x2b2   : > { %12057 = vst [vmem:[#allocation143_spill] sm:$0xff] %v10023_v10  ;;  %v12066_v10 = vld [vmem:[#allocation80_spill] sm:$0xff]  ;;  %v1799_v40 = vadd.f32 %v9640_v8, %v1531_v38 }
 0x2b3   : > { %v10025_v27 = vpop.f32.mrf.mxu0  ;;  %v12075_v38 = vld [vmem:[#allocation88_spill] sm:$0xff] }
 0x2b4   : > { %12058 = vst [vmem:[#allocation144_spill] sm:$0xff] %v10025_v27  ;;  %v1053_v27 = vadd.f32 %v12067_v3, %v12066_v10 }
 0x2b5   : > { %v10029_v34 = vpop.f32.mrf.mxu0 }
 0x2b6   : > { %12060 = vst [vmem:[#allocation146_spill] sm:$0xff] %v10029_v34  ;;  %v1529_v34 = vadd.f32 %v9627_v16, %v1053_v27  ;;  %v12072_v16 = vld [vmem:[#allocation85_spill] sm:$0xff] }
 0x2b7   : > { %v10031_v45 = vpop.f32.mrf.mxu0 }
 0x2b8   : > { %12061 = vst [vmem:[#allocation147_spill] sm:$0xff] %v10031_v45  ;;  %v1795_v45 = vadd.f32 %v9618_v61, %v1527_v15  ;;  %v1797_v3 = vadd.f32 %v9629_v41, %v1529_v34  ;;  %v2332_v61 = vadd.f32 %v9791_v33, %v9794_v30  ;;  %v12071_v15 = vld [vmem:[#allocation84_spill] sm:$0xff]  ;;  %v2334_v30 = vadd.f32 %v9800_v50, %v9803_v17  ;;  %v12073_v34 = vld [vmem:[#allocation86_spill] sm:$0xff] }
 0x2b9   : > { %v10037_v52 = vpop.f32.mrf.mxu0  ;;  %v1073_v27 = vadd.f32 %v12072_v16, %v12071_v15  ;;  %v12074_v15 = vld [vmem:[#allocation87_spill] sm:$0xff] }
 0x2ba   : > { %v2063_v57 = vadd.f32 %v9796_v63, %v1795_v45  ;;  %v2065_v63 = vadd.f32 %v9805_v5, %v1797_v3  ;;  %v2600_v56 = vadd.f32 %v9949_v23, %v2332_v61  ;;  %v2067_v5 = vadd.f32 %v9814_v36, %v1799_v40  ;;  %v12076_v3 = vld [vmem:[#allocation89_spill] sm:$0xff] }
 0x2bb   : > { %v10040_v21 = vpop.f32.mrf.mxu0  ;;  %v1533_v45 = vadd.f32 %v9649_v31, %v1073_v27  ;;  %v2602_v23 = vadd.f32 %v9957_v32, %v2334_v30  ;;  %v1093_v61 = vadd.f32 %v12076_v3, %v12075_v38  ;;  %v12078_v32 = vld [vmem:[#allocation63_spill] sm:$0xff]  ;;  %v12081_v38 = vld [vmem:[#allocation124_spill] sm:$0xff] }
 0x2bc   : > { %12065 = vst [vmem:[#allocation79_spill] sm:$0xff] %v10040_v21  ;;  %v10056_v21 = vpop.f32.mrf.mxu1  ;;  %v2331_v20 = vadd.f32 %v9798_v62, %v2063_v57  ;;  %v1083_v62 = vadd.f32 %v12074_v15, %v12073_v34  ;;  %v2333_v8 = vadd.f32 %v9807_v9, %v2065_v63  ;;  %v2868_v31 = vadd.f32 %v9951_v37, %v2600_v56  ;;  %v10098_v9 = vld [vmem:[%s11709_s2] ss:$0 sm:$0xff] }
 0x2bd   : > { %v10046_v29 = vpop.f32.mrf.mxu0  ;;  %v1801_v50 = vadd.f32 %v9651_v12, %v1533_v45  ;;  %v12077_v37 = vld [vmem:[#allocation60_spill] sm:$0xff]  ;;  %v10113_v45 = vadd.f32 %v9513_v14, %v9511_v54  ;;  %v10128_v15 = vadd.f32 %v9535_v24, %v9533_v6  ;;  %v12079_v24 = vld [vmem:[#allocation65_spill] sm:$0xff] }
 0x2be   : > { %12068 = vst [vmem:[#allocation80_spill] sm:$0xff] %v10046_v29  ;;  %v10072_v2 = vpop.f32.mrf.mxu1  ;;  %v2599_v33 = vadd.f32 %v9953_v48, %v2331_v20  ;;  %v1535_v17 = vadd.f32 %v9665_v46, %v1083_v62  ;;  %v2336_v48 = vadd.f32 %v9809_v28, %v9812_v22  ;;  %v1103_v27 = vadd.f32 %v12078_v32, %v12077_v37  ;;  %v12086_v32 = vld [vmem:[#allocation125_spill] sm:$0xff] }
 0x2bf   : > { %v10052_v51 = vpop.f32.mrf.mxu0  ;;  %v2601_v12 = vadd.f32 %v9959_v0, %v2333_v8  ;;  %v10106_v46 = vadd.f32 %v9491_v60, %v9489_v42  ;;  %v2335_v28 = vadd.f32 %v9816_v7, %v2067_v5  ;;  %v2069_v22 = vadd.f32 %v9831_v13, %v1801_v50 }
 0x2c0   : > { %v10093_v16 = vpop.f32.mrf.mxu1  ;;  %v2867_v20 = vadd.f32 %v9955_v44, %v2599_v33  ;;  %v2604_v56 = vadd.f32 %v9963_v26, %v2336_v48  ;;  %v2870_v44 = vadd.f32 %v9961_v1, %v2602_v23  ;;  %v1803_v33 = vadd.f32 %v9667_v11, %v1535_v17  ;;  %v12082_v17 = vld [vmem:[#allocation11_spill] sm:$0xff] }
 0x2c1   : > { %v10058_v10 = vpop.f32.mrf.mxu0  ;;  %v1537_v42 = vadd.f32 %v9676_v59, %v1093_v61  ;;  %v2338_v60 = vadd.f32 %v9822_v25, %v9827_v18  ;;  %v2603_v13 = vadd.f32 %v9965_v35, %v2335_v28  ;;  %v2869_v54 = vadd.f32 %v9976_v47, %v2601_v12  ;;  %v12087_v12 = vld [vmem:[#allocation130_spill] sm:$0xff] }
 0x2c2   : > { %v10122_v7 = vpop.f32.mrf.mxu1  ;;  %v2337_v11 = vadd.f32 %v9833_v55, %v2069_v22  ;;  %v2071_v59 = vadd.f32 %v9841_v19, %v1803_v33  ;;  %v2872_v18 = vadd.f32 %v9985_v43, %v2604_v56  ;;  %v1539_v6 = vadd.f32 %v9687_v49, %v1103_v27  ;;  %v12084_v49 = vld [vmem:[#allocation66_spill] sm:$0xff]  ;;  %v12090_v33 = vld [vmem:[#allocation27_spill] sm:$0xff] }
 0x2c3   : > { %v10065_v29 = vpop.f32.mrf.mxu0  ;;  %v2606_v35 = vadd.f32 %v9978_v39, %v2338_v60  ;;  %v1805_v8 = vadd.f32 %v9678_v4, %v1537_v42  ;;  %v2340_v55 = vadd.f32 %v12079_v24, %v9839_v58  ;;  %v12083_v4 = vld [vmem:[#allocation13_spill] sm:$0xff]  ;;  %v12091_v60 = vld [vmem:[#allocation68_spill] sm:$0xff] }
 0x2c4   : > { %v10141_v23 = vpop.f32.mrf.mxu1  ;;  %v2605_v39 = vadd.f32 %v12081_v38, %v2337_v11  ;;  %v10148_v48 = vadd.f32 %v12083_v4, %v12082_v17  ;;  %v12085_v58 = vld [vmem:[#allocation69_spill] sm:$0xff]  ;;  %v1807_v42 = vadd.f32 %v12090_v33, %v1539_v6  ;;  %v12100_v38 = vld [vmem:[#allocation128_spill] sm:$0xff]  ;;  %v12101_v17 = vld [vmem:[#allocation23_spill] sm:$0xff] }
 0x2c5   : > { %v10074_v41 = vpop.f32.mrf.mxu0  ;;  %v2073_v37 = vadd.f32 %v12085_v58, %v1805_v8  ;;  %v2608_v27 = vadd.f32 %v12086_v32, %v2340_v55  ;;  %v12094_v11 = vld [vmem:[#allocation133_spill] sm:$0xff]  ;;  %v12097_v8 = vld [vmem:[#allocation70_spill] sm:$0xff]  ;;  %v12105_v32 = vld [vmem:[#allocation72_spill] sm:$0xff] }
 0x2c6   : > { %v12098_v24 = vld [vmem:[#allocation73_spill] sm:$0xff] }
 0x2c7   : > { %v10082_v57 = vpop.f32.mrf.mxu0  ;;  %v2341_v6 = vadd.f32 %v12097_v8, %v2073_v37  ;;  %v2075_v55 = vadd.f32 %v12098_v24, %v1807_v42  ;;  %v12102_v4 = vld [vmem:[#allocation25_spill] sm:$0xff] }
 0x2c8   : > { %v12104_v58 = vld [vmem:[#allocation29_spill] sm:$0xff] }
 0x2c9   : > { %v7847_v36 = vpop.f32.mrf.mxu0  ;;  %v12108_v33 = vld [vmem:[#allocation129_spill] sm:$0xff] }
 0x2ca   : > { %v3136_v63 = vadd.f32 %v7847_v36, %v2868_v31  ;;  %v12080_v31 = vld [vmem:[#allocation127_spill] sm:$0xff]  ;;  %v2339_v36 = vadd.f32 %v12084_v49, %v2071_v59  ;;  %v2873_v59 = vadd.f32 %v12094_v11, %v2605_v39  ;;  %v10188_v49 = vadd.f32 %v12102_v4, %v12101_v17  ;;  %v12110_v11 = vld [vmem:[#allocation58_spill] sm:$0xff]  ;;  %v12118_v17 = vld [vmem:[#allocation132_spill] sm:$0xff] }
 0x2cb   : > { %v2976_v40 = vpop.f32.mrf.mxu0  ;;  %v2871_v19 = vadd.f32 %v12080_v31, %v2603_v13  ;;  %v12092_v13 = vld [vmem:[#allocation67_spill] sm:$0xff]  ;;  %v12099_v31 = vld [vmem:[#allocation136_spill] sm:$0xff]  ;;  %v2609_v42 = vadd.f32 %v12108_v33, %v2341_v6  ;;  %v12120_v33 = vld [vmem:[#allocation90_spill] sm:$0xff] }
 0x2cc   : > { %v3175_v0 = vadd.f32 %v10098_v9, %v3136_v63  ;;  %v3135_v30 = vadd.f32 %v2976_v40, %v2867_v20  ;;  %v2874_v63 = vadd.f32 %v12087_v12, %v2606_v35  ;;  %v10159_v40 = vld [vmem:[%s11710_s3 + $0x14] sm:$0xf] }
 0x2cd   : > { %v7850_v26 = vpop.f32.mrf.mxu0  ;;  %8143 = vmatprep.subr.msk.mxu0 %vm648_vm2, %v10159_v40 }
 0x2ce   : > { %v3207_v14 = vmax.f32 %v3175_v0, 0.0  ;;  %v3174_v1 = vadd.f32 %v10098_v9, %v3135_v30  ;;  %v3138_v34 = vadd.f32 %v7850_v26, %v2870_v44  ;;  %v12088_v44 = vld [vmem:[#allocation15_spill] sm:$0xff]  ;;  %v12089_v0 = vld [vmem:[#allocation17_spill] sm:$0xff]  ;;  %v2342_v26 = vadd.f32 %v12092_v13, %v12091_v60 }
 0x2cf   : > { %v2986_v25 = vpop.f32.mrf.mxu0  ;;  %v10163_v30 = vadd.f32 %v12089_v0, %v12088_v44 }
 0x2d0   : > { %3240 = vst.msk [vmem:[#allocation3 + $0x21] sm:$0xff] %vm408_vm3, %v3207_v14  ;;  %v3206_v47 = vmax.f32 %v3174_v1, 0.0  ;;  %v3177_v62 = vadd.f32 %v10098_v9, %v3138_v34  ;;  %v3137_v5 = vadd.f32 %v2986_v25, %v2869_v54  ;;  %v12093_v54 = vld [vmem:[#allocation126_spill] sm:$0xff]  ;;  %v10169_v1 = vpop.f32.mrf.mxu1 }
 0x2d1   : > { %v7853_v43 = vpop.f32.mrf.mxu0  ;;  %v2607_v14 = vadd.f32 %v12093_v54, %v2339_v36  ;;  %v12103_v36 = vld [vmem:[#allocation31_spill] sm:$0xff] }
 0x2d2   : > { %3239 = vst.msk [vmem:[#allocation3 + $0x19] sm:$0xff] %vm408_vm3, %v3206_v47  ;;  %v3209_v3 = vmax.f32 %v3177_v62, 0.0  ;;  %v3176_v61 = vadd.f32 %v10098_v9, %v3137_v5  ;;  %v3140_v50 = vadd.f32 %v7853_v43, %v2872_v18  ;;  %v12095_v47 = vld [vmem:[#allocation19_spill] sm:$0xff]  ;;  %v12096_v62 = vld [vmem:[#allocation21_spill] sm:$0xff]  ;;  %v1809_v37 = vadd.f32 %v12104_v58, %v12103_v36 }
 0x2d3   : > { %v2996_v20 = vpop.f32.mrf.mxu0  ;;  %v10178_v5 = vadd.f32 %v12096_v62, %v12095_v47  ;;  %v12112_v47 = vld [vmem:[#allocation142_spill] sm:$0xff] }
 0x2d4   : > { %3242 = vst.msk [vmem:[#allocation3 + $0x39] sm:$0xff] %vm408_vm3, %v3209_v3  ;;  %v3208_v28 = vmax.f32 %v3176_v61, 0.0  ;;  %v3179_v22 = vadd.f32 %v10098_v9, %v3140_v50  ;;  %v3139_v56 = vadd.f32 %v2996_v20, %v2871_v19  ;;  %v2876_v19 = vadd.f32 %v12099_v31, %v2608_v27  ;;  %v12106_v20 = vld [vmem:[#allocation71_spill] sm:$0xff]  ;;  %v12114_v31 = vld [vmem:[#allocation33_spill] sm:$0xff] }
 0x2d5   : > { %v7856_v34 = vpop.f32.mrf.mxu0  ;;  %v2610_v3 = vadd.f32 %v12100_v38, %v2342_v26  ;;  %v2344_v12 = vadd.f32 %v12106_v20, %v12105_v32  ;;  %v12107_v27 = vld [vmem:[#allocation139_spill] sm:$0xff]  ;;  %v12119_v20 = vld [vmem:[#allocation145_spill] sm:$0xff] }
 0x2d6   : > { %3241 = vst.msk [vmem:[#allocation3 + $0x31] sm:$0xff] %vm408_vm3, %v3208_v28  ;;  %v3211_v18 = vmax.f32 %v3179_v22, 0.0  ;;  %v3178_v25 = vadd.f32 %v10098_v9, %v3139_v56  ;;  %v3142_v35 = vadd.f32 %v7856_v34, %v2874_v63  ;;  %v2875_v63 = vadd.f32 %v12107_v27, %v2607_v14  ;;  %v10195_v28 = vpop.f32.mrf.mxu1  ;;  %v12109_v14 = vld [vmem:[#allocation75_spill] sm:$0xff] }
 0x2d7   : > { %v3006_v43 = vpop.f32.mrf.mxu0  ;;  %v10210_v54 = vld [vmem:[#allocation3 + $0x21] sm:$0xff]  ;;  %v2343_v34 = vadd.f32 %v12109_v14, %v2075_v55  ;;  %v2878_v62 = vadd.f32 %v12112_v47, %v2610_v3 }
 0x2d8   : > { %3244 = vst.msk [vmem:[#allocation3 + $0x51] sm:$0xff] %vm408_vm3, %v3211_v18  ;;  %v3210_v39 = vmax.f32 %v3178_v25, 0.0  ;;  %v3181_v61 = vadd.f32 %v10098_v9, %v3142_v35  ;;  %v3141_v50 = vadd.f32 %v3006_v43, %v2873_v59  ;;  %v2077_v59 = vadd.f32 %v12110_v11, %v1809_v37  ;;  %v12111_v18 = vld [vmem:[#allocation131_spill] sm:$0xff]  ;;  %v12115_v43 = vld [vmem:[#allocation38_spill] sm:$0xff]  ;;  %v10229_v36 = vpop.f32.mrf.mxu1 }
 0x2d9   : > { %v7859_v22 = vpop.f32.mrf.mxu0  ;;  %v10197_v56 = vld [vmem:[#allocation3 + $0x19] sm:$0xff]  ;;  %v2612_v25 = vadd.f32 %v12111_v18, %v2344_v12  ;;  %v12113_v55 = vld [vmem:[#allocation35_spill] sm:$0xff]  ;;  %v1545_v38 = vadd.f32 %v12115_v43, %v10106_v46  ;;  %v2611_v4 = vadd.f32 %v12118_v17, %v2343_v34  ;;  %v2877_v12 = vadd.f32 %v12119_v20, %v2609_v42 }
 0x2da   : > { %v10199_v44 = vld [vmem:[#allocation3 + $0x18] sm:$0xff]  ;;  %v10201_v0 = vld [vmem:[#allocation3 + $0x20] sm:$0xff]  ;;  %3243 = vst.msk [vmem:[#allocation3 + $0x49] sm:$0xff] %vm408_vm3, %v3210_v39  ;;  %v3213_v60 = vmax.f32 %v3181_v61, 0.0  ;;  %v3180_v13 = vadd.f32 %v10098_v9, %v3141_v50  ;;  %v3144_v26 = vadd.f32 %v7859_v22, %v2876_v19  ;;  %7898 = vmatprep.mubr.msk.f32.mxu1 %vm408_vm3, %v10197_v56  ;;  %v1811_v19 = vadd.f32 %v12114_v31, %v12113_v55  ;;  %v12117_v61 = vld [vmem:[#allocation76_spill] sm:$0xff]  ;;  %v10262_v43 = vpop.f32.mrf.mxu1 }
 0x2db   : > { %7948 = vmatprep.mubr.msk.f32.mxu0 %vm408_vm3, %v10199_v44  ;;  %v3016_v35 = vpop.f32.mrf.mxu0  ;;  %7899 = vmatmul.mubr.msk.f32.gmra.mxu1 %vm408_vm3, %v10210_v54  ;;  %v12116_v39 = vld [vmem:[#allocation77_spill] sm:$0xff]  ;;  %v12122_v14 = vld [vmem:[#allocation78_spill] sm:$0xff]  ;;  %v12127_v55 = vld [vmem:[#allocation91_spill] sm:$0xff] }
 0x2dc   : > { %7949 = vmatmul.mubr.msk.f32.gmra.mxu0 %vm408_vm3, %v10201_v0  ;;  %3246 = vst.msk [vmem:[#allocation3 + $0x69] sm:$0xff] %vm408_vm3, %v3213_v60  ;;  %v3212_v8 = vmax.f32 %v3180_v13, 0.0  ;;  %v3183_v6 = vadd.f32 %v10098_v9, %v3144_v26  ;;  %v3143_v24 = vadd.f32 %v3016_v35, %v2875_v63  ;;  %v2346_v50 = vadd.f32 %v12117_v61, %v12116_v39  ;;  %v10244_v22 = vld [vmem:[#allocation3 + $0x39] sm:$0xff] }
 0x2dd   : > { %v7862_v3 = vpop.f32.mrf.mxu0  ;;  %v10231_v58 = vld [vmem:[#allocation3 + $0x31] sm:$0xff]  ;;  %v2345_v60 = vadd.f32 %v12120_v33, %v2077_v59  ;;  %v2880_v42 = vadd.f32 %v12122_v14, %v2612_v25  ;;  %v12123_v11 = vld [vmem:[#allocation134_spill] sm:$0xff] }
 0x2de   : > { %v10233_v37 = vld [vmem:[#allocation3 + $0x30] sm:$0xff]  ;;  %v10235_v32 = vld [vmem:[#allocation3 + $0x38] sm:$0xff]  ;;  %3245 = vst.msk [vmem:[#allocation3 + $0x61] sm:$0xff] %vm408_vm3, %v3212_v8  ;;  %v3215_v27 = vmax.f32 %v3183_v6, 0.0  ;;  %v3182_v46 = vadd.f32 %v10098_v9, %v3143_v24  ;;  %v3146_v63 = vadd.f32 %v7862_v3, %v2878_v62  ;;  %7901 = vmatprep.mubr.msk.f32.mxu1 %vm408_vm3, %v10231_v58  ;;  %v2614_v18 = vadd.f32 %v12123_v11, %v2346_v50  ;;  %v12125_v6 = vld [vmem:[#allocation42_spill] sm:$0xff] }
 0x2df   : > { %7951 = vmatprep.mubr.msk.f32.mxu0 %vm408_vm3, %v10233_v37  ;;  %v12121_v13 = vld [vmem:[#allocation93_spill] sm:$0xff]  ;;  %v3026_v34 = vpop.f32.mrf.mxu0  ;;  %7902 = vmatmul.mubr.msk.f32.gmra.mxu1 %vm408_vm3, %v10244_v22  ;;  %v12124_v59 = vld [vmem:[#allocation40_spill] sm:$0xff]  ;;  %v1547_v25 = vadd.f32 %v12125_v6, %v10113_v45  ;;  %v12129_v3 = vld [vmem:[#allocation135_spill] sm:$0xff] }
 0x2e0   : > { %v2079_v26 = vadd.f32 %v12121_v13, %v1811_v19  ;;  %7952 = vmatmul.mubr.msk.f32.gmra.mxu0 %vm408_vm3, %v10235_v32  ;;  %3248 = vst.msk [vmem:[#allocation3 + $0x81] sm:$0xff] %vm408_vm3, %v3215_v27  ;;  %v3214_v35 = vmax.f32 %v3182_v46, 0.0  ;;  %v3185_v47 = vadd.f32 %v10098_v9, %v3146_v63  ;;  %v3145_v62 = vadd.f32 %v3026_v34, %v2877_v12  ;;  %v12126_v24 = vld [vmem:[#allocation92_spill] sm:$0xff]  ;;  %v12131_v46 = vld [vmem:[#allocation97_spill] sm:$0xff] }
 0x2e1   : > { %v1813_v8 = vadd.f32 %v12124_v59, %v1545_v38  ;;  %v2348_v31 = vadd.f32 %v12127_v55, %v12126_v24  ;;  %v2879_v19 = vadd.f32 %v10044_v53, %v2611_v4  ;;  %v7865_v39 = vpop.f32.mrf.mxu0  ;;  %v10264_v61 = vld [vmem:[#allocation3 + $0x49] sm:$0xff]  ;;  %v2613_v20 = vadd.f32 %v12129_v3, %v2345_v60  ;;  %v10277_v53 = vld [vmem:[#allocation3 + $0x51] sm:$0xff]  ;;  %v12130_v4 = vld [vmem:[#allocation94_spill] sm:$0xff] }
 0x2e2   : > { %v10266_v50 = vld [vmem:[#allocation3 + $0x48] sm:$0xff]  ;;  %v10268_v17 = vld [vmem:[#allocation3 + $0x50] sm:$0xff]  ;;  %3247 = vst.msk [vmem:[#allocation3 + $0x79] sm:$0xff] %vm408_vm3, %v3214_v35  ;;  %v3217_v38 = vmax.f32 %v3185_v47, 0.0  ;;  %v3184_v45 = vadd.f32 %v10098_v9, %v3145_v62  ;;  %v3148_v12 = vadd.f32 %v7865_v39, %v2880_v42  ;;  %7904 = vmatprep.mubr.msk.f32.mxu1 %vm408_vm3, %v10264_v61  ;;  %v2347_v27 = vadd.f32 %v12130_v4, %v2079_v26  ;;  %v12132_v33 = vld [vmem:[#allocation137_spill] sm:$0xff] }
 0x2e3   : > { %12128 = vst [vmem:[#allocation81_spill] sm:$0xff] %v10268_v17  ;;  %7954 = vmatprep.mubr.msk.f32.mxu0 %vm408_vm3, %v10266_v50  ;;  %v2081_v63 = vadd.f32 %v12131_v46, %v1813_v8  ;;  %v2616_v60 = vadd.f32 %v12132_v33, %v2348_v31  ;;  %v3036_v13 = vpop.f32.mrf.mxu0  ;;  %7905 = vmatmul.mubr.msk.f32.gmra.mxu1 %vm408_vm3, %v10277_v53  ;;  %v12133_v26 = vld [vmem:[#allocation44_spill] sm:$0xff]  ;;  %v12134_v47 = vld [vmem:[#allocation46_spill] sm:$0xff]  ;;  %v12136_v8 = vld [vmem:[#allocation95_spill] sm:$0xff]  ;;  %v10295_v31 = vpop.f32.mrf.mxu1 }
 0x2e4   : > { %7955 = vmatmul.mubr.msk.f32.gmra.mxu0 %vm408_vm3, %v10268_v17  ;;  %v2882_v14 = vadd.f32 %v10056_v21, %v2614_v18  ;;  %3250 = vst.msk [vmem:[#allocation3 + $0x99] sm:$0xff] %vm408_vm3, %v3217_v38  ;;  %v3216_v42 = vmax.f32 %v3184_v45, 0.0  ;;  %v3187_v34 = vadd.f32 %v10098_v9, %v3148_v12  ;;  %v3147_v11 = vadd.f32 %v3036_v13, %v2879_v19  ;;  %v12135_v59 = vld [vmem:[#allocation96_spill] sm:$0xff]  ;;  %v12137_v24 = vld [vmem:[#allocation138_spill] sm:$0xff] }
 0x2e5   : > { %v1815_v35 = vadd.f32 %v12133_v26, %v1547_v25  ;;  %v1549_v62 = vadd.f32 %v12134_v47, %v10128_v15  ;;  %v2350_v6 = vadd.f32 %v12136_v8, %v12135_v59  ;;  %v2615_v55 = vadd.f32 %v12137_v24, %v2347_v27  ;;  %v7868_v39 = vpop.f32.mrf.mxu0  ;;  %v10297_v21 = vld [vmem:[#allocation3 + $0x61] sm:$0xff]  ;;  %v10310_v45 = vld [vmem:[#allocation3 + $0x69] sm:$0xff]  ;;  %v12141_v27 = vld [vmem:[#allocation101_spill] sm:$0xff]  ;;  %v10328_v8 = vpop.f32.mrf.mxu1 }
 0x2e6   : > { %v10299_v18 = vld [vmem:[#allocation3 + $0x60] sm:$0xff]  ;;  %v10301_v3 = vld [vmem:[#allocation3 + $0x68] sm:$0xff]  ;;  %v2881_v19 = vadd.f32 %v10072_v2, %v2613_v20  ;;  %3249 = vst.msk [vmem:[#allocation3 + $0x91] sm:$0xff] %vm408_vm3, %v3216_v42  ;;  %v3219_v25 = vmax.f32 %v3187_v34, 0.0  ;;  %v3186_v15 = vadd.f32 %v10098_v9, %v3147_v11  ;;  %v3150_v38 = vadd.f32 %v7868_v39, %v2882_v14  ;;  %7907 = vmatprep.mubr.msk.f32.mxu1 %vm408_vm3, %v10297_v21  ;;  %v12142_v33 = vld [vmem:[#allocation140_spill] sm:$0xff] }
 0x2e7   : > { %12138 = vst [vmem:[#allocation82_spill] sm:$0xff] %v10299_v18  ;;  %12139 = vst [vmem:[#allocation83_spill] sm:$0xff] %v10301_v3  ;;  %7957 = vmatprep.mubr.msk.f32.mxu0 %vm408_vm3, %v10299_v18  ;;  %v12140_v12 = vld [vmem:[#allocation98_spill] sm:$0xff]  ;;  %v2083_v46 = vadd.f32 %v12141_v27, %v1815_v35  ;;  %v2884_v2 = vadd.f32 %v10093_v16, %v2616_v60  ;;  %v3046_v20 = vpop.f32.mrf.mxu0  ;;  %7908 = vmatmul.mubr.msk.f32.gmra.mxu1 %vm408_vm3, %v10310_v45  ;;  %v12145_v60 = vld [vmem:[#allocation100_spill] sm:$0xff] }
 0x2e8   : > { %v2349_v4 = vadd.f32 %v12140_v12, %v2081_v63  ;;  %7958 = vmatmul.mubr.msk.f32.gmra.mxu0 %vm408_vm3, %v10301_v3  ;;  %v2618_v13 = vadd.f32 %v12142_v33, %v2350_v6  ;;  %3252 = vst.msk [vmem:[#allocation3 + $0xb1] sm:$0xff] %vm408_vm3, %v3219_v25  ;;  %v3218_v14 = vmax.f32 %v3186_v15, 0.0  ;;  %v3189_v42 = vadd.f32 %v10098_v9, %v3150_v38  ;;  %v12143_v63 = vld [vmem:[#allocation48_spill] sm:$0xff]  ;;  %v12144_v26 = vld [vmem:[#allocation50_spill] sm:$0xff]  ;;  %v12146_v35 = vld [vmem:[#allocation99_spill] sm:$0xff] }
 0x2e9   : > { %v3149_v34 = vadd.f32 %v3046_v20, %v2881_v19  ;;  %v1817_v11 = vadd.f32 %v12143_v63, %v1549_v62  ;;  %v1551_v16 = vadd.f32 %v12144_v26, %v10148_v48  ;;  %v2352_v47 = vadd.f32 %v12146_v35, %v12145_v60  ;;  %v7871_v24 = vpop.f32.mrf.mxu0  ;;  %v10330_v6 = vld [vmem:[#allocation3 + $0x79] sm:$0xff]  ;;  %v12152_v33 = vld [vmem:[#allocation143_spill] sm:$0xff]  ;;  %v12155_v35 = vld [vmem:[#allocation104_spill] sm:$0xff] }
 0x2ea   : > { %v2883_v59 = vadd.f32 %v10122_v7, %v2615_v55  ;;  %v10332_v39 = vld [vmem:[#allocation3 + $0x78] sm:$0xff]  ;;  %v10334_v25 = vld [vmem:[#allocation3 + $0x80] sm:$0xff]  ;;  %3251 = vst.msk [vmem:[#allocation3 + $0xa9] sm:$0xff] %vm408_vm3, %v3218_v14  ;;  %v3221_v62 = vmax.f32 %v3189_v42, 0.0  ;;  %v3152_v38 = vadd.f32 %v7871_v24, %v2884_v2  ;;  %7910 = vmatprep.mubr.msk.f32.mxu1 %vm408_vm3, %v10330_v6  ;;  %v2886_v2 = vadd.f32 %v10141_v23, %v2618_v13 }
 0x2eb   : > { %12147 = vst [vmem:[#allocation84_spill] sm:$0xff] %v10332_v39  ;;  %12148 = vst [vmem:[#allocation85_spill] sm:$0xff] %v10334_v25  ;;  %v12149_v19 = vld [vmem:[#allocation141_spill] sm:$0xff]  ;;  %v3188_v48 = vadd.f32 %v10098_v9, %v3149_v34  ;;  %7960 = vmatprep.mubr.msk.f32.mxu0 %vm408_vm3, %v10332_v39  ;;  %v10343_v7 = vld [vmem:[#allocation3 + $0x81] sm:$0xff]  ;;  %v3056_v63 = vpop.f32.mrf.mxu0 }
 0x2ec   : > { %v2617_v15 = vadd.f32 %v12149_v19, %v2349_v4  ;;  %v12150_v55 = vld [vmem:[#allocation102_spill] sm:$0xff]  ;;  %v12151_v27 = vld [vmem:[#allocation105_spill] sm:$0xff]  ;;  %v2620_v4 = vadd.f32 %v12152_v33, %v2352_v47  ;;  %7911 = vmatmul.mubr.msk.f32.gmra.mxu1 %vm408_vm3, %v10343_v7  ;;  %7961 = vmatmul.mubr.msk.f32.gmra.mxu0 %vm408_vm3, %v10334_v25  ;;  %3254 = vst.msk [vmem:[#allocation3 + $0xc9] sm:$0xff] %vm408_vm3, %v3221_v62  ;;  %v12156_v47 = vld [vmem:[#allocation103_spill] sm:$0xff] }
 0x2ed   : > { %v2351_v12 = vadd.f32 %v12150_v55, %v2083_v46  ;;  %v2085_v20 = vadd.f32 %v12151_v27, %v1817_v11  ;;  %v3220_v14 = vmax.f32 %v3188_v48, 0.0  ;;  %v3191_v42 = vadd.f32 %v10098_v9, %v3152_v38  ;;  %v12153_v46 = vld [vmem:[#allocation52_spill] sm:$0xff]  ;;  %v12154_v11 = vld [vmem:[#allocation54_spill] sm:$0xff]  ;;  %v10361_v27 = vpop.f32.mrf.mxu1  ;;  %v7874_v33 = vpop.f32.mrf.mxu0  ;;  %v10367_v62 = vld [vmem:[#allocation3 + $0x98] sm:$0xff] }
 0x2ee   : > { %v3151_v34 = vadd.f32 %v3056_v63, %v2883_v59  ;;  %v1819_v26 = vadd.f32 %v12153_v46, %v1551_v16  ;;  %v1553_v60 = vadd.f32 %v12154_v11, %v10163_v30  ;;  %v2354_v24 = vadd.f32 %v12156_v47, %v12155_v35  ;;  %v12157_v19 = vld [vmem:[#allocation144_spill] sm:$0xff]  ;;  %12160 = vst [vmem:[#allocation88_spill] sm:$0xff] %v10367_v62  ;;  %v10376_v38 = vld [vmem:[#allocation3 + $0x99] sm:$0xff] }
 0x2ef   : > { %v2619_v55 = vadd.f32 %v12157_v19, %v2351_v12  ;;  %v10363_v23 = vld [vmem:[#allocation3 + $0x91] sm:$0xff]  ;;  %v2885_v59 = vadd.f32 %v10169_v1, %v2617_v15  ;;  %3253 = vst.msk [vmem:[#allocation3 + $0xc1] sm:$0xff] %vm408_vm3, %v3220_v14  ;;  %v3223_v16 = vmax.f32 %v3191_v42, 0.0  ;;  %v3154_v48 = vadd.f32 %v7874_v33, %v2886_v2  ;;  %12161 = vst [vmem:[#allocation89_spill] sm:$0xff] %v10376_v38  ;;  %v12162_v12 = vld [vmem:[#allocation106_spill] sm:$0xff]  ;;  %v3066_v15 = vpop.f32.mrf.mxu0 }
 0x2f0   : > { %12158 = vst [vmem:[#allocation86_spill] sm:$0xff] %v10363_v23  ;;  %v10365_v13 = vld [vmem:[#allocation3 + $0x90] sm:$0xff]  ;;  %v3190_v30 = vadd.f32 %v10098_v9, %v3151_v34  ;;  %7913 = vmatprep.mubr.msk.f32.mxu1 %vm408_vm3, %v10363_v23  ;;  %v2353_v63 = vadd.f32 %v12162_v12, %v2085_v20  ;;  %v12163_v46 = vld [vmem:[#allocation109_spill] sm:$0xff]  ;;  %v2888_v1 = vadd.f32 %v10195_v28, %v2620_v4  ;;  %v12164_v2 = vld [vmem:[#allocation146_spill] sm:$0xff] }
 0x2f1   : > { %12159 = vst [vmem:[#allocation87_spill] sm:$0xff] %v10365_v13  ;;  %7963 = vmatprep.mubr.msk.f32.mxu0 %vm408_vm3, %v10365_v13  ;;  %v2087_v11 = vadd.f32 %v12163_v46, %v1819_v26  ;;  %7914 = vmatmul.mubr.msk.f32.gmra.mxu1 %vm408_vm3, %v10376_v38  ;;  %v2622_v14 = vadd.f32 %v12164_v2, %v2354_v24  ;;  %3256 = vst.msk [vmem:[#allocation3 + $0xe1] sm:$0xff] %vm408_vm3, %v3223_v16  ;;  %v12165_v20 = vld [vmem:[#allocation56_spill] sm:$0xff]  ;;  %v12166_v26 = vld [vmem:[#allocation59_spill] sm:$0xff]  ;;  %v10394_v46 = vpop.f32.mrf.mxu1  ;;  %v7877_v38 = vpop.f32.mrf.mxu0 }
 0x2f2   : > { %7964 = vmatmul.mubr.msk.f32.gmra.mxu0 %vm408_vm3, %v10367_v62  ;;  %v3222_v42 = vmax.f32 %v3190_v30, 0.0  ;;  %v3193_v34 = vadd.f32 %v10098_v9, %v3154_v48  ;;  %v3153_v35 = vadd.f32 %v3066_v15, %v2885_v59  ;;  %v1821_v47 = vadd.f32 %v12165_v20, %v1553_v60  ;;  %v12167_v4 = vld [vmem:[#allocation108_spill] sm:$0xff]  ;;  %v12168_v19 = vld [vmem:[#allocation107_spill] sm:$0xff]  ;;  %v12175_v20 = vld [vmem:[#allocation113_spill] sm:$0xff] }
 0x2f3   : > { %v1555_v28 = vadd.f32 %v12166_v26, %v10178_v5  ;;  %v2356_v33 = vadd.f32 %v12168_v19, %v12167_v4  ;;  %v2887_v12 = vadd.f32 %v10229_v36, %v2619_v55  ;;  %v10396_v24 = vld [vmem:[#allocation3 + $0xa9] sm:$0xff]  ;;  %v3156_v15 = vadd.f32 %v7877_v38, %v2888_v1  ;;  %v10409_v36 = vld [vmem:[#allocation3 + $0xb1] sm:$0xff]  ;;  %v12174_v55 = vld [vmem:[#allocation110_spill] sm:$0xff]  ;;  %v3076_v4 = vpop.f32.mrf.mxu0 }
 0x2f4   : > { %12169 = vst [vmem:[#allocation60_spill] sm:$0xff] %v10396_v24  ;;  %v10398_v16 = vld [vmem:[#allocation3 + $0xa8] sm:$0xff]  ;;  %v10400_v30 = vld [vmem:[#allocation3 + $0xb0] sm:$0xff]  ;;  %3255 = vst.msk [vmem:[#allocation3 + $0xd9] sm:$0xff] %vm408_vm3, %v3222_v42  ;;  %v3225_v60 = vmax.f32 %v3193_v34, 0.0  ;;  %v3192_v5 = vadd.f32 %v10098_v9, %v3153_v35  ;;  %7916 = vmatprep.mubr.msk.f32.mxu1 %vm408_vm3, %v10396_v24  ;;  %v2355_v2 = vadd.f32 %v12174_v55, %v2087_v11 }
 0x2f5   : > { %12170 = vst [vmem:[#allocation63_spill] sm:$0xff] %v10398_v16  ;;  %12171 = vst [vmem:[#allocation65_spill] sm:$0xff] %v10400_v30  ;;  %v12172_v59 = vld [vmem:[#allocation147_spill] sm:$0xff]  ;;  %7966 = vmatprep.mubr.msk.f32.mxu0 %vm408_vm3, %v10398_v16  ;;  %v2089_v26 = vadd.f32 %v12175_v20, %v1821_v47  ;;  %7917 = vmatmul.mubr.msk.f32.gmra.mxu1 %vm408_vm3, %v10409_v36  ;;  %v2890_v38 = vadd.f32 %v10262_v43, %v2622_v14  ;;  %v12176_v11 = vld [vmem:[#allocation61_spill] sm:$0xff]  ;;  %v7880_v24 = vpop.f32.mrf.mxu0 }
 0x2f6   : > { %v2621_v48 = vadd.f32 %v12172_v59, %v2353_v63  ;;  %12173 = vst [vmem:[#allocation127_spill] sm:$0xff] %v10409_v36  ;;  %v2624_v63 = vadd.f32 %v10037_v52, %v2356_v33  ;;  %7967 = vmatmul.mubr.msk.f32.gmra.mxu0 %vm408_vm3, %v10400_v30  ;;  %3258 = vst.msk [vmem:[#allocation3 + $0xf9] sm:$0xff] %vm408_vm3, %v3225_v60  ;;  %v3224_v1 = vmax.f32 %v3192_v5, 0.0  ;;  %v12177_v47 = vld [vmem:[#allocation74_spill] sm:$0xff]  ;;  %v12178_v19 = vld [vmem:[#allocation112_spill] sm:$0xff]  ;;  %v2838_v36 = vpop.f32.mrf.mxu1 }
 0x2f7   : > { %v3195_v42 = vadd.f32 %v10098_v9, %v3156_v15  ;;  %v3155_v34 = vadd.f32 %v3076_v4, %v2887_v12  ;;  %v1823_v35 = vadd.f32 %v12176_v11, %v1555_v28  ;;  %v1557_v52 = vadd.f32 %v12177_v47, %v10188_v49  ;;  %v12179_v33 = vld [vmem:[#allocation111_spill] sm:$0xff]  ;;  %v10429_v43 = vld [vmem:[#allocation3 + $0xc0] sm:$0xff]  ;;  %v12184_v4 = vld [vmem:[#allocation117_spill] sm:$0xff] }
 0x2f8   : > { %v2358_v59 = vadd.f32 %v12179_v33, %v12178_v19  ;;  %v12180_v55 = vld [vmem:[#allocation79_spill] sm:$0xff]  ;;  %12181 = vst [vmem:[#allocation124_spill] sm:$0xff] %v10429_v43  ;;  %v2889_v12 = vadd.f32 %v10295_v31, %v2621_v48  ;;  %3257 = vst.msk [vmem:[#allocation3 + $0xf1] sm:$0xff] %vm408_vm3, %v3224_v1  ;;  %v3158_v60 = vadd.f32 %v7880_v24, %v2890_v38  ;;  %7969 = vmatprep.mubr.msk.f32.mxu0 %vm408_vm3, %v10429_v43  ;;  %v12183_v15 = vld [vmem:[#allocation114_spill] sm:$0xff]  ;;  %v3086_v48 = vpop.f32.mrf.mxu0  ;;  %v7839_v33 = vpop.f32.mrf.mxu1 }
 0x2f9   : > { %v2623_v20 = vadd.f32 %v12180_v55, %v2355_v2  ;;  %v10427_v23 = vld [vmem:[#allocation3 + $0xc1] sm:$0xff]  ;;  %v3227_v28 = vmax.f32 %v3195_v42, 0.0  ;;  %v3194_v49 = vadd.f32 %v10098_v9, %v3155_v34  ;;  %v10440_v5 = vld [vmem:[#allocation3 + $0xc9] sm:$0xff]  ;;  %v2357_v2 = vadd.f32 %v12183_v15, %v2089_v26 }
 0x2fa   : > { %v10431_v14 = vld [vmem:[#allocation3 + $0xc8] sm:$0xff]  ;;  %7919 = vmatprep.mubr.msk.f32.mxu1 %vm408_vm3, %v10427_v23  ;;  %v2091_v11 = vadd.f32 %v12184_v4, %v1823_v35  ;;  %v2892_v31 = vadd.f32 %v10328_v8, %v2624_v63  ;;  %v12185_v24 = vld [vmem:[#allocation80_spill] sm:$0xff]  ;;  %v3197_v42 = vadd.f32 %v10098_v9, %v3158_v60  ;;  %v3157_v34 = vadd.f32 %v3086_v48, %v2889_v12  ;;  %v7883_v55 = vpop.f32.mrf.mxu0  ;;  %v12192_v48 = vld [vmem:[#allocation121_spill] sm:$0xff] }
 0x2fb   : > { %12182 = vst [vmem:[#allocation11_spill] sm:$0xff] %v10431_v14  ;;  %7920 = vmatmul.mubr.msk.f32.gmra.mxu1 %vm408_vm3, %v10440_v5  ;;  %7970 = vmatmul.mubr.msk.f32.gmra.mxu0 %vm408_vm3, %v10431_v14  ;;  %v2626_v38 = vadd.f32 %v12185_v24, %v2358_v59  ;;  %3260 = vst.msk [vmem:[#allocation3 + $0x111] sm:$0xff] %vm408_vm3, %v3227_v28  ;;  %v3226_v1 = vmax.f32 %v3194_v49, 0.0  ;;  %v12186_v26 = vld [vmem:[#allocation36_spill] sm:$0xff]  ;;  %v12188_v19 = vld [vmem:[#allocation115_spill] sm:$0xff]  ;;  %v2891_v63 = vadd.f32 %v10361_v27, %v2623_v20 }
 0x2fc   : > { %v1825_v47 = vadd.f32 %v12186_v26, %v1557_v52  ;;  %v12187_v35 = vld [vmem:[#allocation116_spill] sm:$0xff]  ;;  %v10456_v15 = vld [vmem:[#allocation3 + $0xd9] sm:$0xff]  ;;  %v2625_v28 = vadd.f32 %v10052_v51, %v2357_v2  ;;  %v3229_v12 = vmax.f32 %v3197_v42, 0.0  ;;  %v3196_v52 = vadd.f32 %v10098_v9, %v3157_v34  ;;  %v10469_v27 = vld [vmem:[#allocation3 + $0xe1] sm:$0xff]  ;;  %v3096_v2 = vpop.f32.mrf.mxu0 }
 0x2fd   : > { %v2360_v8 = vadd.f32 %v12188_v19, %v12187_v35  ;;  %v10458_v4 = vld [vmem:[#allocation3 + $0xd8] sm:$0xff]  ;;  %v10460_v59 = vld [vmem:[#allocation3 + $0xe0] sm:$0xff]  ;;  %3259 = vst.msk [vmem:[#allocation3 + $0x109] sm:$0xff] %vm408_vm3, %v3226_v1  ;;  %v3160_v49 = vadd.f32 %v7883_v55, %v2892_v31  ;;  %7922 = vmatprep.mubr.msk.f32.mxu1 %vm408_vm3, %v10456_v15  ;;  %v2894_v31 = vadd.f32 %v10394_v46, %v2626_v38  ;;  %v12194_v26 = vld [vmem:[#allocation119_spill] sm:$0xff]  ;;  %v2848_v35 = vpop.f32.mrf.mxu1 }
 0x2fe   : > { %12189 = vst [vmem:[#allocation13_spill] sm:$0xff] %v10458_v4  ;;  %12190 = vst [vmem:[#allocation66_spill] sm:$0xff] %v10460_v59  ;;  %7972 = vmatprep.mubr.msk.f32.mxu0 %vm408_vm3, %v10458_v4  ;;  %v12191_v20 = vld [vmem:[#allocation118_spill] sm:$0xff]  ;;  %v2093_v24 = vadd.f32 %v12192_v48, %v1825_v47  ;;  %v3228_v1 = vmax.f32 %v3196_v52, 0.0  ;;  %v3159_v34 = vadd.f32 %v3096_v2, %v2891_v63  ;;  %v7886_v19 = vpop.f32.mrf.mxu0 }
 0x2ff   : > { %v2359_v60 = vadd.f32 %v12191_v20, %v2091_v11  ;;  %v2628_v51 = vadd.f32 %v10058_v10, %v2360_v8  ;;  %7923 = vmatmul.mubr.msk.f32.gmra.mxu1 %vm408_vm3, %v10469_v27  ;;  %7973 = vmatmul.mubr.msk.f32.gmra.mxu0 %vm408_vm3, %v10460_v59  ;;  %3262 = vst.msk [vmem:[#allocation3 + $0x129] sm:$0xff] %vm408_vm3, %v3229_v12  ;;  %v12193_v11 = vld [vmem:[#allocation120_spill] sm:$0xff]  ;;  %v10488_v20 = vld [vmem:[#allocation3 + $0xf8] sm:$0xff]  ;;  %v12197_v52 = vld [vmem:[#allocation122_spill] sm:$0xff]  ;;  %v7842_v48 = vpop.f32.mrf.mxu1 }
 0x300   : > { %v3199_v42 = vadd.f32 %v10098_v9, %v3160_v49  ;;  %v2362_v47 = vadd.f32 %v12194_v26, %v12193_v11  ;;  %v10484_v8 = vld [vmem:[#allocation3 + $0xf1] sm:$0xff]  ;;  %12196 = vst [vmem:[#allocation125_spill] sm:$0xff] %v10488_v20  ;;  %v2893_v46 = vadd.f32 %v2838_v36, %v2625_v28  ;;  %3261 = vst.msk [vmem:[#allocation3 + $0x121] sm:$0xff] %vm408_vm3, %v3228_v1  ;;  %v3106_v2 = vpop.f32.mrf.mxu0 }
 0x301   : > { %v2627_v10 = vadd.f32 %v10065_v29, %v2359_v60  ;;  %v10486_v55 = vld [vmem:[#allocation3 + $0xf0] sm:$0xff]  ;;  %v3198_v12 = vadd.f32 %v10098_v9, %v3159_v34  ;;  %v3162_v63 = vadd.f32 %v7886_v19, %v2894_v31  ;;  %7925 = vmatprep.mubr.msk.f32.mxu1 %vm408_vm3, %v10484_v8  ;;  %v10496_v29 = vld [vmem:[#allocation3 + $0xf9] sm:$0xff]  ;;  %v2361_v49 = vadd.f32 %v12197_v52, %v2093_v24 }
 0x302   : > { %12195 = vst [vmem:[#allocation69_spill] sm:$0xff] %v10486_v55  ;;  %v3231_v38 = vmax.f32 %v3199_v42, 0.0  ;;  %7975 = vmatprep.mubr.msk.f32.mxu0 %vm408_vm3, %v10486_v55  ;;  %v2896_v60 = vadd.f32 %v7839_v33, %v2628_v51  ;;  %v2630_v36 = vadd.f32 %v10074_v41, %v2362_v47  ;;  %v3161_v1 = vadd.f32 %v3106_v2, %v2893_v46  ;;  %v7889_v34 = vpop.f32.mrf.mxu0 }
 0x303   : > { %7926 = vmatmul.mubr.msk.f32.gmra.mxu1 %vm408_vm3, %v10496_v29  ;;  %7976 = vmatmul.mubr.msk.f32.gmra.mxu0 %vm408_vm3, %v10488_v20  ;;  %v3230_v28 = vmax.f32 %v3198_v12, 0.0  ;;  %v3201_v31 = vadd.f32 %v10098_v9, %v3162_v63  ;;  %v2895_v42 = vadd.f32 %v2848_v35, %v2627_v10  ;;  %v2629_v11 = vadd.f32 %v10082_v57, %v2361_v49  ;;  %v10519_v10 = vld [vmem:[#allocation3 + $0x111] sm:$0xff]  ;;  %v2858_v35 = vpop.f32.mrf.mxu1 }
 0x304   : > { %3264 = vst.msk [vmem:[#allocation3 + $0x141] sm:$0xff] %vm408_vm3, %v3231_v38  ;;  %v10506_v24 = vld [vmem:[#allocation3 + $0x109] sm:$0xff]  ;;  %v3200_v41 = vadd.f32 %v10098_v9, %v3161_v1  ;;  %v3164_v47 = vadd.f32 %v7889_v34, %v2896_v60  ;;  %v3116_v19 = vpop.f32.mrf.mxu0  ;;  %v2898_v57 = vadd.f32 %v7842_v48, %v2630_v36 }
 0x305   : > { %v10508_v33 = vld [vmem:[#allocation3 + $0x108] sm:$0xff]  ;;  %v10510_v51 = vld [vmem:[#allocation3 + $0x110] sm:$0xff]  ;;  %3263 = vst.msk [vmem:[#allocation3 + $0x139] sm:$0xff] %vm408_vm3, %v3230_v28  ;;  %v3233_v26 = vmax.f32 %v3201_v31, 0.0  ;;  %7928 = vmatprep.mubr.msk.f32.mxu1 %vm408_vm3, %v10506_v24  ;;  %v3163_v12 = vadd.f32 %v3116_v19, %v2895_v42  ;;  %v2897_v2 = vadd.f32 %v2858_v35, %v2629_v11 }
 0x306   : > { %12198 = vst [vmem:[#allocation130_spill] sm:$0xff] %v10508_v33  ;;  %12199 = vst [vmem:[#allocation15_spill] sm:$0xff] %v10510_v51  ;;  %7978 = vmatprep.mubr.msk.f32.mxu0 %vm408_vm3, %v10508_v33  ;;  %v3232_v46 = vmax.f32 %v3200_v41, 0.0  ;;  %v3203_v38 = vadd.f32 %v10098_v9, %v3164_v47  ;;  %v7892_v63 = vpop.f32.mrf.mxu0  ;;  %v10539_v36 = vld [vmem:[#allocation3 + $0x129] sm:$0xff] }
 0x307   : > { %7929 = vmatmul.mubr.msk.f32.gmra.mxu1 %vm408_vm3, %v10519_v10  ;;  %7979 = vmatmul.mubr.msk.f32.gmra.mxu0 %vm408_vm3, %v10510_v51  ;;  %3266 = vst.msk [vmem:[#allocation3 + $0x159] sm:$0xff] %vm408_vm3, %v3233_v26  ;;  %v10527_v52 = vld [vmem:[#allocation3 + $0x121] sm:$0xff]  ;;  %v3202_v31 = vadd.f32 %v10098_v9, %v3163_v12  ;;  %v3166_v48 = vadd.f32 %v7892_v63, %v2898_v57 }
 0x308   : > { %v10529_v49 = vld [vmem:[#allocation3 + $0x120] sm:$0xff]  ;;  %v10531_v60 = vld [vmem:[#allocation3 + $0x128] sm:$0xff]  ;;  %3265 = vst.msk [vmem:[#allocation3 + $0x151] sm:$0xff] %vm408_vm3, %v3232_v46  ;;  %v3235_v28 = vmax.f32 %v3203_v38, 0.0  ;;  %7931 = vmatprep.mubr.msk.f32.mxu1 %vm408_vm3, %v10527_v52  ;;  %v3126_v1 = vpop.f32.mrf.mxu0 }
 0x309   : > { %12200 = vst [vmem:[#allocation17_spill] sm:$0xff] %v10529_v49  ;;  %12201 = vst [vmem:[#allocation27_spill] sm:$0xff] %v10531_v60  ;;  %7981 = vmatprep.mubr.msk.f32.mxu0 %vm408_vm3, %v10529_v49  ;;  %v3234_v42 = vmax.f32 %v3202_v31, 0.0  ;;  %v3205_v34 = vadd.f32 %v10098_v9, %v3166_v48  ;;  %v3165_v11 = vadd.f32 %v3126_v1, %v2897_v2  ;;  %v3343_v2 = vld [vmem:[#allocation3 + $0x2] sm:$0xff] }
 0x30a   : > { %3268 = vst.msk [vmem:[#allocation3 + $0x171] sm:$0xff] %vm408_vm3, %v3235_v28 }
 0x30b   : > { %7932 = vmatmul.mubr.msk.f32.gmra.mxu1 %vm408_vm3, %v10539_v36  ;;  %7982 = vmatmul.mubr.msk.f32.gmra.mxu0 %vm408_vm3, %v10531_v60  ;;  %3267 = vst.msk [vmem:[#allocation3 + $0x169] sm:$0xff] %vm408_vm3, %v3234_v42  ;;  %v3237_v35 = vmax.f32 %v3205_v34, 0.0  ;;  %v3204_v19 = vadd.f32 %v10098_v9, %v3165_v11  ;;  %v10559_v57 = vld [vmem:[#allocation3 + $0x141] sm:$0xff]  ;;  %v3344_v42 = vld [vmem:[#allocation3 + $0xa] sm:$0xff] }
 0x30c   : > { %v10547_v26 = vld [vmem:[#allocation3 + $0x139] sm:$0xff]  ;;  %v10610_v11 = vld [vmem:[%s11710_s3 + $0x18] sm:$0xf] }
 0x30d   : > { %v10549_v41 = vld [vmem:[#allocation3 + $0x138] sm:$0xff]  ;;  %v10551_v47 = vld [vmem:[#allocation3 + $0x140] sm:$0xff]  ;;  %7934 = vmatprep.mubr.msk.f32.mxu1 %vm408_vm3, %v10547_v26  ;;  %3270 = vst.msk [vmem:[#allocation3 + $0x189] sm:$0xff] %vm408_vm3, %v3237_v35  ;;  %v3236_v46 = vmax.f32 %v3204_v19, 0.0  ;;  %v10615_v35 = vld [vmem:[%s11710_s3 + $0x1c] sm:$0xf] }
 0x30e   : > { %12202 = vst [vmem:[#allocation68_spill] sm:$0xff] %v10549_v41  ;;  %12203 = vst [vmem:[#allocation67_spill] sm:$0xff] %v10551_v47  ;;  %7984 = vmatprep.mubr.msk.f32.mxu0 %vm408_vm3, %v10549_v41  ;;  %v10577_v63 = vld [vmem:[#allocation3 + $0x159] sm:$0xff] }
 0x30f   : > { %7935 = vmatmul.mubr.msk.f32.gmra.mxu1 %vm408_vm3, %v10559_v57  ;;  %7985 = vmatmul.mubr.msk.f32.gmra.mxu0 %vm408_vm3, %v10551_v47  ;;  %v10566_v38 = vld [vmem:[#allocation3 + $0x151] sm:$0xff]  ;;  %3269 = vst.msk [vmem:[#allocation3 + $0x181] sm:$0xff] %vm408_vm3, %v3236_v46  ;;  %v10605_v34 = vld [vmem:[#allocation3 + $0x1a] sm:$0xff]  ;;  %v12207_v46 = vld [vmem:[#allocation123_spill] sm:$0xff] }
 0x310   : > { %v10568_v9 = vld [vmem:[#allocation3 + $0x150] sm:$0xff]  ;;  %v10570_v12 = vld [vmem:[#allocation3 + $0x158] sm:$0xff]  ;;  %7937 = vmatprep.mubr.msk.f32.mxu1 %vm408_vm3, %v10566_v38 }
 0x311   : > { %12204 = vst [vmem:[#allocation126_spill] sm:$0xff] %v10568_v9  ;;  %12205 = vst [vmem:[#allocation133_spill] sm:$0xff] %v10570_v12  ;;  %7987 = vmatprep.mubr.msk.f32.mxu0 %vm408_vm3, %v10568_v9  ;;  %v10593_v1 = vld [vmem:[#allocation3 + $0x171] sm:$0xff] }
 0x312   : > { %v10583_v28 = vld [vmem:[#allocation3 + $0x169] sm:$0xff] }
 0x313   : > { %7938 = vmatmul.mubr.msk.f32.gmra.mxu1 %vm408_vm3, %v10577_v63  ;;  %7988 = vmatmul.mubr.msk.f32.gmra.mxu0 %vm408_vm3, %v10570_v12  ;;  %v10585_v31 = vld [vmem:[#allocation3 + $0x168] sm:$0xff]  ;;  %v10587_v48 = vld [vmem:[#allocation3 + $0x170] sm:$0xff] }
 0x314   : > { %12206 = vst [vmem:[#allocation19_spill] sm:$0xff] %v10585_v31  ;;  %7940 = vmatprep.mubr.msk.f32.mxu1 %vm408_vm3, %v10583_v28  ;;  %7990 = vmatprep.mubr.msk.f32.mxu0 %vm408_vm3, %v10585_v31  ;;  %v7947_v19 = vpop.f32.mrf.mxu0 }
 0x317   : > { %7941 = vmatmul.mubr.msk.f32.gmra.mxu1 %vm408_vm3, %v10593_v1  ;;  %7991 = vmatmul.mubr.msk.f32.gmra.mxu0 %vm408_vm3, %v10587_v48 }
 0x318   : > { %8045 = vmatprep.mubr.msk.f32.mxu0 %vm408_vm3, %v10199_v44  ;;  %7995 = vmatprep.mubr.msk.f32.mxu1 %vm408_vm3, %v3343_v2  ;;  %v7897_v44 = vpop.f32.mrf.mxu1  ;;  %v10627_v2 = vld [vmem:[#allocation3 + $0x22] sm:$0xff] }
 0x31b   : > { %7996 = vmatmul.mubr.msk.f32.vlgmr.msra.gmra.mxu1 %vm408_vm3, %v3344_v42  ;;  %8046 = vmatmul.mubr.msk.f32.vlgmr.msra.gmra.mxu0 %vm408_vm3, %v10201_v0  ;;  %v10621_v0 = vadd.f32 %v7947_v19, %v7897_v44  ;;  %v10637_v42 = vld [vmem:[#allocation3 + $0x32] sm:$0xff]  ;;  %v10649_v44 = vld [vmem:[#allocation3 + $0x4a] sm:$0xff] }
 0x31c   : > { %8094 = vmatpush3.msk.msra.mxu1 %vm648_vm2, %v12207_v46  ;;  %7998 = vmatprep.mubr.msk.f32.mxu1 %vm408_vm3, %v10605_v34  ;;  %v10655_v19 = vld [vmem:[#allocation3 + $0x52] sm:$0xff]  ;;  %v10661_v46 = vld [vmem:[#allocation3 + $0x62] sm:$0xff] }
 0x31d   : > { %12208 = vst [vmem:[#allocation21_spill] sm:$0xff] %v10621_v0  ;;  %8048 = vmatprep.mubr.msk.f32.mxu0 %vm408_vm3, %v10233_v37  ;;  %8144 = vmatpush3.msk.msra.mxu0 %vm648_vm2, %v10159_v40  ;;  %v10643_v40 = vld [vmem:[#allocation3 + $0x3a] sm:$0xff]  ;;  %v10667_v0 = vld [vmem:[#allocation3 + $0x6a] sm:$0xff] }
 0x31e   : > { %8193 = vmatprep.subr.msk.mxu1 %vm648_vm2, %v10610_v11  ;;  %8243 = vmatprep.subr.msk.mxu0 %vm648_vm2, %v10615_v35 }
 0x31f   : > { %7999 = vmatmul.mubr.msk.f32.gmra.mxu1 %vm408_vm3, %v10627_v2  ;;  %8049 = vmatmul.mubr.msk.f32.gmra.mxu0 %vm408_vm3, %v10235_v32 }
 0x320   : > { %8001 = vmatprep.mubr.msk.f32.mxu1 %vm408_vm3, %v10637_v42  ;;  %8051 = vmatprep.mubr.msk.f32.mxu0 %vm408_vm3, %v10266_v50 }
 0x323   : > { %8002 = vmatmul.mubr.msk.f32.gmra.mxu1 %vm408_vm3, %v10643_v40  ;;  %8052 = vmatmul.mubr.msk.f32.gmra.mxu0 %vm408_vm3, %v10268_v17  ;;  %v10795_v17 = vld [vmem:[#allocation3 + $0x180] sm:$0xff] }
 0x324   : > { %8004 = vmatprep.mubr.msk.f32.mxu1 %vm408_vm3, %v10649_v44  ;;  %8054 = vmatprep.mubr.msk.f32.mxu0 %vm408_vm3, %v10299_v18  ;;  %v10673_v18 = vld [vmem:[#allocation3 + $0x7a] sm:$0xff]  ;;  %12214 = vst [vmem:[#allocation25_spill] sm:$0xff] %v10795_v17 }
 0x327   : > { %8005 = vmatmul.mubr.msk.f32.gmra.mxu1 %vm408_vm3, %v10655_v19  ;;  %8055 = vmatmul.mubr.msk.f32.gmra.mxu0 %vm408_vm3, %v10301_v3  ;;  %v10679_v3 = vld [vmem:[#allocation3 + $0x82] sm:$0xff] }
 0x328   : > { %8007 = vmatprep.mubr.msk.f32.mxu1 %vm408_vm3, %v10661_v46  ;;  %8057 = vmatprep.mubr.msk.f32.mxu0 %vm408_vm3, %v10332_v39  ;;  %v10685_v39 = vld [vmem:[#allocation3 + $0x92] sm:$0xff] }
 0x32b   : > { %8008 = vmatmul.mubr.msk.f32.gmra.mxu1 %vm408_vm3, %v10667_v0  ;;  %8058 = vmatmul.mubr.msk.f32.gmra.mxu0 %vm408_vm3, %v10334_v25  ;;  %v10691_v25 = vld [vmem:[#allocation3 + $0x9a] sm:$0xff] }
 0x32c   : > { %8010 = vmatprep.mubr.msk.f32.mxu1 %vm408_vm3, %v10673_v18  ;;  %8060 = vmatprep.mubr.msk.f32.mxu0 %vm408_vm3, %v10365_v13  ;;  %v10697_v13 = vld [vmem:[#allocation3 + $0xaa] sm:$0xff] }
 0x32f   : > { %8011 = vmatmul.mubr.msk.f32.gmra.mxu1 %vm408_vm3, %v10679_v3  ;;  %8061 = vmatmul.mubr.msk.f32.gmra.mxu0 %vm408_vm3, %v10367_v62  ;;  %v10703_v62 = vld [vmem:[#allocation3 + $0xb2] sm:$0xff] }
 0x330   : > { %8013 = vmatprep.mubr.msk.f32.mxu1 %vm408_vm3, %v10685_v39  ;;  %8063 = vmatprep.mubr.msk.f32.mxu0 %vm408_vm3, %v10398_v16  ;;  %v10709_v16 = vld [vmem:[#allocation3 + $0xc2] sm:$0xff] }
 0x333   : > { %8014 = vmatmul.mubr.msk.f32.gmra.mxu1 %vm408_vm3, %v10691_v25  ;;  %8064 = vmatmul.mubr.msk.f32.gmra.mxu0 %vm408_vm3, %v10400_v30  ;;  %v10715_v30 = vld [vmem:[#allocation3 + $0xca] sm:$0xff] }
 0x334   : > { %8016 = vmatprep.mubr.msk.f32.mxu1 %vm408_vm3, %v10697_v13  ;;  %8066 = vmatprep.mubr.msk.f32.mxu0 %vm408_vm3, %v10429_v43  ;;  %v10721_v43 = vld [vmem:[#allocation3 + $0xda] sm:$0xff] }
 0x337   : > { %8017 = vmatmul.mubr.msk.f32.gmra.mxu1 %vm408_vm3, %v10703_v62  ;;  %8067 = vmatmul.mubr.msk.f32.gmra.mxu0 %vm408_vm3, %v10431_v14  ;;  %v10727_v14 = vld [vmem:[#allocation3 + $0xe2] sm:$0xff] }
 0x338   : > { %8019 = vmatprep.mubr.msk.f32.mxu1 %vm408_vm3, %v10709_v16  ;;  %8069 = vmatprep.mubr.msk.f32.mxu0 %vm408_vm3, %v10458_v4  ;;  %v10733_v4 = vld [vmem:[#allocation3 + $0xf2] sm:$0xff] }
 0x33b   : > { %8020 = vmatmul.mubr.msk.f32.gmra.mxu1 %vm408_vm3, %v10715_v30  ;;  %8070 = vmatmul.mubr.msk.f32.gmra.mxu0 %vm408_vm3, %v10460_v59  ;;  %v10739_v59 = vld [vmem:[#allocation3 + $0xfa] sm:$0xff] }
 0x33c   : > { %8022 = vmatprep.mubr.msk.f32.mxu1 %vm408_vm3, %v10721_v43  ;;  %8072 = vmatprep.mubr.msk.f32.mxu0 %vm408_vm3, %v10486_v55  ;;  %v10745_v55 = vld [vmem:[#allocation3 + $0x10a] sm:$0xff] }
 0x33f   : > { %8023 = vmatmul.mubr.msk.f32.gmra.mxu1 %vm408_vm3, %v10727_v14  ;;  %8073 = vmatmul.mubr.msk.f32.gmra.mxu0 %vm408_vm3, %v10488_v20  ;;  %v10751_v20 = vld [vmem:[#allocation3 + $0x112] sm:$0xff] }
 0x340   : > { %8025 = vmatprep.mubr.msk.f32.mxu1 %vm408_vm3, %v10733_v4  ;;  %8075 = vmatprep.mubr.msk.f32.mxu0 %vm408_vm3, %v10508_v33  ;;  %v10757_v33 = vld [vmem:[#allocation3 + $0x122] sm:$0xff] }
 0x343   : > { %8026 = vmatmul.mubr.msk.f32.gmra.mxu1 %vm408_vm3, %v10739_v59  ;;  %8076 = vmatmul.mubr.msk.f32.gmra.mxu0 %vm408_vm3, %v10510_v51  ;;  %v10763_v51 = vld [vmem:[#allocation3 + $0x12a] sm:$0xff] }
 0x344   : > { %8028 = vmatprep.mubr.msk.f32.mxu1 %vm408_vm3, %v10745_v55  ;;  %8078 = vmatprep.mubr.msk.f32.mxu0 %vm408_vm3, %v10529_v49  ;;  %v10769_v49 = vld [vmem:[#allocation3 + $0x13a] sm:$0xff] }
 0x345   : > { %12209 = vst [vmem:[#allocation70_spill] sm:$0xff] %v10769_v49 }
 0x347   : > { %8029 = vmatmul.mubr.msk.f32.gmra.mxu1 %vm408_vm3, %v10751_v20  ;;  %8079 = vmatmul.mubr.msk.f32.gmra.mxu0 %vm408_vm3, %v10531_v60  ;;  %v10775_v60 = vld [vmem:[#allocation3 + $0x142] sm:$0xff] }
 0x348   : > { %8031 = vmatprep.mubr.msk.f32.mxu1 %vm408_vm3, %v10757_v33  ;;  %8081 = vmatprep.mubr.msk.f32.mxu0 %vm408_vm3, %v10549_v41  ;;  %12210 = vst [vmem:[#allocation73_spill] sm:$0xff] %v10775_v60  ;;  %v10781_v41 = vld [vmem:[#allocation3 + $0x152] sm:$0xff] }
 0x349   : > { %12211 = vst [vmem:[#allocation136_spill] sm:$0xff] %v10781_v41 }
 0x34b   : > { %8032 = vmatmul.mubr.msk.f32.gmra.mxu1 %vm408_vm3, %v10763_v51  ;;  %8082 = vmatmul.mubr.msk.f32.gmra.mxu0 %vm408_vm3, %v10551_v47  ;;  %v10787_v47 = vld [vmem:[#allocation3 + $0x15a] sm:$0xff] }
 0x34c   : > { %8034 = vmatprep.mubr.msk.f32.mxu1 %vm408_vm3, %v10769_v49  ;;  %8084 = vmatprep.mubr.msk.f32.mxu0 %vm408_vm3, %v10568_v9  ;;  %12212 = vst [vmem:[#allocation128_spill] sm:$0xff] %v10787_v47  ;;  %v10793_v9 = vld [vmem:[#allocation3 + $0x16a] sm:$0xff] }
 0x34d   : > { %12213 = vst [vmem:[#allocation23_spill] sm:$0xff] %v10793_v9 }
 0x34f   : > { %8035 = vmatmul.mubr.msk.f32.gmra.mxu1 %vm408_vm3, %v10775_v60  ;;  %8085 = vmatmul.mubr.msk.f32.gmra.mxu0 %vm408_vm3, %v10570_v12  ;;  %v10801_v12 = vld [vmem:[#allocation3 + $0x172] sm:$0xff] }
 0x350   : > { %8037 = vmatprep.mubr.msk.f32.mxu1 %vm408_vm3, %v10781_v41  ;;  %8087 = vmatprep.mubr.msk.f32.mxu0 %vm408_vm3, %v10585_v31  ;;  %12215 = vst [vmem:[#allocation31_spill] sm:$0xff] %v10801_v12  ;;  %v10803_v31 = vld [vmem:[#allocation3 + $0x188] sm:$0xff] }
 0x353   : > { %8038 = vmatmul.mubr.msk.f32.gmra.mxu1 %vm408_vm3, %v10787_v47  ;;  %8088 = vmatmul.mubr.msk.f32.gmra.mxu0 %vm408_vm3, %v10587_v48 }
 0x354   : > { %8040 = vmatprep.mubr.msk.f32.mxu1 %vm408_vm3, %v10793_v9  ;;  %8090 = vmatprep.mubr.msk.f32.mxu0 %vm408_vm3, %v10795_v17  ;;  %v10820_v17 = vld [vmem:[%s11710_s3 + $0x20] sm:$0xf] }
 0x357   : > { %8041 = vmatmul.mubr.msk.f32.gmra.mxu1 %vm408_vm3, %v10801_v12  ;;  %8091 = vmatmul.mubr.msk.f32.gmra.mxu0 %vm408_vm3, %v10803_v31 }
 0x358   : > { %8095 = vmatprep.mubr.msk.f32.mxu1 %vm408_vm3, %v10197_v56  ;;  %8145 = vmatprep.mubr.msk.f32.mxu0 %vm408_vm3, %v10605_v34  ;;  %v12216_v56 = vld [vmem:[#allocation86_spill] sm:$0xff]  ;;  %v12218_v34 = vld [vmem:[#allocation60_spill] sm:$0xff] }
 0x35b   : > { %8096 = vmatmul.mubr.msk.f32.vlgmr.msra.gmra.mxu1 %vm408_vm3, %v10210_v54  ;;  %8146 = vmatmul.mubr.msk.f32.vlgmr.msra.gmra.mxu0 %vm408_vm3, %v10627_v2  ;;  %v12217_v54 = vld [vmem:[#allocation89_spill] sm:$0xff]  ;;  %v10942_v2 = vld [vmem:[#allocation3 + $0x182] sm:$0xff] }
 0x35c   : > { %8194 = vmatpush3.msk.msra.mxu1 %vm648_vm2, %v10610_v11  ;;  %8098 = vmatprep.mubr.msk.f32.mxu1 %vm408_vm3, %v10231_v58  ;;  %v12219_v11 = vld [vmem:[#allocation127_spill] sm:$0xff]  ;;  %12220 = vst [vmem:[#allocation29_spill] sm:$0xff] %v10942_v2 }
 0x35d   : > { %8148 = vmatprep.mubr.msk.f32.mxu0 %vm408_vm3, %v10637_v42  ;;  %8244 = vmatpush3.msk.msra.mxu0 %vm648_vm2, %v10615_v35  ;;  %v10940_v35 = vld [vmem:[#allocation3 + $0x181] sm:$0xff] }
 0x35e   : > { %8293 = vmatprep.subr.msk.mxu1 %vm648_vm2, %v10820_v17 }
 0x35f   : > { %8099 = vmatmul.mubr.msk.f32.gmra.mxu1 %vm408_vm3, %v10244_v22  ;;  %8149 = vmatmul.mubr.msk.f32.gmra.mxu0 %vm408_vm3, %v10643_v40 }
 0x360   : > { %8101 = vmatprep.mubr.msk.f32.mxu1 %vm408_vm3, %v10264_v61  ;;  %8151 = vmatprep.mubr.msk.f32.mxu0 %vm408_vm3, %v10649_v44 }
 0x363   : > { %8102 = vmatmul.mubr.msk.f32.gmra.mxu1 %vm408_vm3, %v10277_v53  ;;  %8152 = vmatmul.mubr.msk.f32.gmra.mxu0 %vm408_vm3, %v10655_v19 }
 0x364   : > { %8104 = vmatprep.mubr.msk.f32.mxu1 %vm408_vm3, %v10297_v21  ;;  %8154 = vmatprep.mubr.msk.f32.mxu0 %vm408_vm3, %v10661_v46 }
 0x367   : > { %8105 = vmatmul.mubr.msk.f32.gmra.mxu1 %vm408_vm3, %v10310_v45  ;;  %8155 = vmatmul.mubr.msk.f32.gmra.mxu0 %vm408_vm3, %v10667_v0 }
 0x368   : > { %8107 = vmatprep.mubr.msk.f32.mxu1 %vm408_vm3, %v10330_v6  ;;  %8157 = vmatprep.mubr.msk.f32.mxu0 %vm408_vm3, %v10673_v18 }
 0x36b   : > { %8108 = vmatmul.mubr.msk.f32.gmra.mxu1 %vm408_vm3, %v10343_v7  ;;  %8158 = vmatmul.mubr.msk.f32.gmra.mxu0 %vm408_vm3, %v10679_v3 }
 0x36c   : > { %8110 = vmatprep.mubr.msk.f32.mxu1 %vm408_vm3, %v12216_v56  ;;  %8160 = vmatprep.mubr.msk.f32.mxu0 %vm408_vm3, %v10685_v39 }
 0x36f   : > { %8111 = vmatmul.mubr.msk.f32.gmra.mxu1 %vm408_vm3, %v12217_v54  ;;  %8161 = vmatmul.mubr.msk.f32.gmra.mxu0 %vm408_vm3, %v10691_v25 }
 0x370   : > { %8113 = vmatprep.mubr.msk.f32.mxu1 %vm408_vm3, %v12218_v34  ;;  %8163 = vmatprep.mubr.msk.f32.mxu0 %vm408_vm3, %v10697_v13 }
 0x373   : > { %8114 = vmatmul.mubr.msk.f32.gmra.mxu1 %vm408_vm3, %v12219_v11  ;;  %8164 = vmatmul.mubr.msk.f32.gmra.mxu0 %vm408_vm3, %v10703_v62 }
 0x374   : > { %8116 = vmatprep.mubr.msk.f32.mxu1 %vm408_vm3, %v10427_v23  ;;  %8166 = vmatprep.mubr.msk.f32.mxu0 %vm408_vm3, %v10709_v16 }
 0x377   : > { %8117 = vmatmul.mubr.msk.f32.gmra.mxu1 %vm408_vm3, %v10440_v5  ;;  %8167 = vmatmul.mubr.msk.f32.gmra.mxu0 %vm408_vm3, %v10715_v30 }
 0x378   : > { %8119 = vmatprep.mubr.msk.f32.mxu1 %vm408_vm3, %v10456_v15  ;;  %8169 = vmatprep.mubr.msk.f32.mxu0 %vm408_vm3, %v10721_v43 }
 0x37b   : > { %8120 = vmatmul.mubr.msk.f32.gmra.mxu1 %vm408_vm3, %v10469_v27  ;;  %8170 = vmatmul.mubr.msk.f32.gmra.mxu0 %vm408_vm3, %v10727_v14 }
 0x37c   : > { %8122 = vmatprep.mubr.msk.f32.mxu1 %vm408_vm3, %v10484_v8  ;;  %8172 = vmatprep.mubr.msk.f32.mxu0 %vm408_vm3, %v10733_v4 }
 0x37f   : > { %8123 = vmatmul.mubr.msk.f32.gmra.mxu1 %vm408_vm3, %v10496_v29  ;;  %8173 = vmatmul.mubr.msk.f32.gmra.mxu0 %vm408_vm3, %v10739_v59 }
 0x380   : > { %8125 = vmatprep.mubr.msk.f32.mxu1 %vm408_vm3, %v10506_v24  ;;  %8175 = vmatprep.mubr.msk.f32.mxu0 %vm408_vm3, %v10745_v55 }
 0x383   : > { %8126 = vmatmul.mubr.msk.f32.gmra.mxu1 %vm408_vm3, %v10519_v10  ;;  %8176 = vmatmul.mubr.msk.f32.gmra.mxu0 %vm408_vm3, %v10751_v20 }
 0x384   : > { %8128 = vmatprep.mubr.msk.f32.mxu1 %vm408_vm3, %v10527_v52  ;;  %8178 = vmatprep.mubr.msk.f32.mxu0 %vm408_vm3, %v10757_v33 }
 0x387   : > { %8129 = vmatmul.mubr.msk.f32.gmra.mxu1 %vm408_vm3, %v10539_v36  ;;  %8179 = vmatmul.mubr.msk.f32.gmra.mxu0 %vm408_vm3, %v10763_v51 }
 0x388   : > { %8131 = vmatprep.mubr.msk.f32.mxu1 %vm408_vm3, %v10547_v26  ;;  %8181 = vmatprep.mubr.msk.f32.mxu0 %vm408_vm3, %v10769_v49  ;;  %v12224_v49 = vld [vmem:[#allocation83_spill] sm:$0xff] }
 0x38b   : > { %8132 = vmatmul.mubr.msk.f32.gmra.mxu1 %vm408_vm3, %v10559_v57  ;;  %8182 = vmatmul.mubr.msk.f32.gmra.mxu0 %vm408_vm3, %v10775_v60 }
 0x38c   : > { %8134 = vmatprep.mubr.msk.f32.mxu1 %vm408_vm3, %v10566_v38  ;;  %8184 = vmatprep.mubr.msk.f32.mxu0 %vm408_vm3, %v10781_v41  ;;  %v10950_v41 = vld [vmem:[#allocation3 + $0x18a] sm:$0xff] }
 0x38d   : > { %12221 = vst [vmem:[#allocation72_spill] sm:$0xff] %v10950_v41 }
 0x38f   : > { %8135 = vmatmul.mubr.msk.f32.gmra.mxu1 %vm408_vm3, %v10577_v63  ;;  %8185 = vmatmul.mubr.msk.f32.gmra.mxu0 %vm408_vm3, %v10787_v47  ;;  %v10948_v47 = vld [vmem:[#allocation3 + $0x189] sm:$0xff] }
 0x390   : > { %8137 = vmatprep.mubr.msk.f32.mxu1 %vm408_vm3, %v10583_v28  ;;  %8187 = vmatprep.mubr.msk.f32.mxu0 %vm408_vm3, %v10793_v9 }
 0x393   : > { %8138 = vmatmul.mubr.msk.f32.gmra.mxu1 %vm408_vm3, %v10593_v1  ;;  %8188 = vmatmul.mubr.msk.f32.gmra.mxu0 %vm408_vm3, %v10801_v12  ;;  %v12222_v12 = vld [vmem:[#allocation81_spill] sm:$0xff] }
 0x394   : > { %8140 = vmatprep.mubr.msk.f32.mxu1 %vm408_vm3, %v10940_v35  ;;  %8190 = vmatprep.mubr.msk.f32.mxu0 %vm408_vm3, %v10942_v2  ;;  %v10968_v2 = vpop.f32.mrf.mxu1 }
 0x397   : > { %8141 = vmatmul.mubr.msk.f32.gmra.mxu1 %vm408_vm3, %v10948_v47  ;;  %8191 = vmatmul.mubr.msk.f32.gmra.mxu0 %vm408_vm3, %v10950_v41  ;;  %v10970_v41 = vpop.f32.mrf.mxu0 }
 0x398   : > { %8195 = vmatprep.mubr.msk.f32.mxu1 %vm408_vm3, %v10233_v37  ;;  %8245 = vmatprep.mubr.msk.f32.mxu0 %vm408_vm3, %v10231_v58 }
 0x39b   : > { %8196 = vmatmul.mubr.msk.f32.vlgmr.msra.gmra.mxu1 %vm408_vm3, %v10235_v32  ;;  %8246 = vmatmul.mubr.msk.f32.vlgmr.msra.gmra.mxu0 %vm408_vm3, %v10244_v22  ;;  %v7900_v58 = vpop.f32.mrf.mxu1  ;;  %v12223_v22 = vld [vmem:[#allocation82_spill] sm:$0xff] }
 0x39c   : > { %8294 = vmatpush3.msk.msra.mxu1 %vm648_vm2, %v10820_v17  ;;  %8198 = vmatprep.mubr.msk.f32.mxu1 %vm408_vm3, %v10266_v50  ;;  %v7950_v37 = vpop.f32.mrf.mxu0 }
 0x39d   : > { %8248 = vmatprep.mubr.msk.f32.mxu0 %vm408_vm3, %v10264_v61  ;;  %v10978_v32 = vadd.f32 %v7950_v37, %v7900_v58  ;;  %v3557_v50 = vpop.f32.mrf.mxu1 }
 0x39e   : > { %v3881_v17 = vpop.f32.mrf.mxu0 }
 0x39f   : > { %8199 = vmatmul.mubr.msk.f32.gmra.mxu1 %vm408_vm3, %v12222_v12  ;;  %8249 = vmatmul.mubr.msk.f32.gmra.mxu0 %vm408_vm3, %v10277_v53  ;;  %v10984_v9 = vadd.f32 %v3881_v17, %v3557_v50  ;;  %v7903_v61 = vpop.f32.mrf.mxu1  ;;  %v12225_v12 = vld [vmem:[#allocation84_spill] sm:$0xff]  ;;  %v12226_v17 = vld [vmem:[#allocation85_spill] sm:$0xff] }
 0x3a0   : > { %8201 = vmatprep.mubr.msk.f32.mxu1 %vm408_vm3, %v12223_v22  ;;  %8251 = vmatprep.mubr.msk.f32.mxu0 %vm408_vm3, %v10297_v21  ;;  %v7953_v60 = vpop.f32.mrf.mxu0 }
 0x3a1   : > { %v10990_v53 = vadd.f32 %v7953_v60, %v7903_v61  ;;  %v3567_v21 = vpop.f32.mrf.mxu1 }
 0x3a2   : > { %v3891_v58 = vpop.f32.mrf.mxu0 }
 0x3a3   : > { %8202 = vmatmul.mubr.msk.f32.gmra.mxu1 %vm408_vm3, %v12224_v49  ;;  %8252 = vmatmul.mubr.msk.f32.gmra.mxu0 %vm408_vm3, %v10310_v45  ;;  %v10996_v37 = vadd.f32 %v3891_v58, %v3567_v21  ;;  %v7906_v22 = vpop.f32.mrf.mxu1  ;;  %v12227_v49 = vld [vmem:[#allocation87_spill] sm:$0xff]  ;;  %v12228_v58 = vld [vmem:[#allocation88_spill] sm:$0xff] }
 0x3a4   : > { %8204 = vmatprep.mubr.msk.f32.mxu1 %vm408_vm3, %v12225_v12  ;;  %8254 = vmatprep.mubr.msk.f32.mxu0 %vm408_vm3, %v10330_v6  ;;  %v7956_v50 = vpop.f32.mrf.mxu0 }
 0x3a5   : > { %v11002_v45 = vadd.f32 %v7956_v50, %v7906_v22  ;;  %v3577_v6 = vpop.f32.mrf.mxu1  ;;  %v12229_v22 = vld [vmem:[#allocation63_spill] sm:$0xff] }
 0x3a6   : > { %v3901_v60 = vpop.f32.mrf.mxu0 }
 0x3a7   : > { %8205 = vmatmul.mubr.msk.f32.gmra.mxu1 %vm408_vm3, %v12226_v17  ;;  %8255 = vmatmul.mubr.msk.f32.gmra.mxu0 %vm408_vm3, %v10343_v7  ;;  %v11008_v61 = vadd.f32 %v3901_v60, %v3577_v6  ;;  %v7909_v12 = vpop.f32.mrf.mxu1  ;;  %v12230_v60 = vld [vmem:[#allocation65_spill] sm:$0xff] }
 0x3a8   : > { %8207 = vmatprep.mubr.msk.f32.mxu1 %vm408_vm3, %v12227_v49  ;;  %8257 = vmatprep.mubr.msk.f32.mxu0 %vm408_vm3, %v12216_v56  ;;  %v7959_v21 = vpop.f32.mrf.mxu0 }
 0x3a9   : > { %v11014_v7 = vadd.f32 %v7959_v21, %v7909_v12  ;;  %v3587_v56 = vpop.f32.mrf.mxu1  ;;  %v12231_v12 = vld [vmem:[#allocation124_spill] sm:$0xff] }
 0x3aa   : > { %v3911_v50 = vpop.f32.mrf.mxu0 }
 0x3ab   : > { %8208 = vmatmul.mubr.msk.f32.gmra.mxu1 %vm408_vm3, %v12228_v58  ;;  %8258 = vmatmul.mubr.msk.f32.gmra.mxu0 %vm408_vm3, %v12217_v54  ;;  %v11020_v17 = vadd.f32 %v3911_v50, %v3587_v56  ;;  %v12232_v50 = vld [vmem:[#allocation11_spill] sm:$0xff] }
 0x3ac   : > { %8210 = vmatprep.mubr.msk.f32.mxu1 %vm408_vm3, %v12229_v22  ;;  %8260 = vmatprep.mubr.msk.f32.mxu0 %vm408_vm3, %v12218_v34  ;;  %v7912_v49 = vpop.f32.mrf.mxu1  ;;  %v7962_v6 = vpop.f32.mrf.mxu0 }
 0x3ad   : > { %v11026_v54 = vadd.f32 %v7962_v6, %v7912_v49  ;;  %v12233_v49 = vld [vmem:[#allocation13_spill] sm:$0xff] }
 0x3ae   : > { %v3597_v34 = vpop.f32.mrf.mxu1  ;;  %v3921_v21 = vpop.f32.mrf.mxu0 }
 0x3af   : > { %8211 = vmatmul.mubr.msk.f32.gmra.mxu1 %vm408_vm3, %v12230_v60  ;;  %8261 = vmatmul.mubr.msk.f32.gmra.mxu0 %vm408_vm3, %v12219_v11  ;;  %v11032_v58 = vadd.f32 %v3921_v21, %v3597_v34  ;;  %v12234_v21 = vld [vmem:[#allocation66_spill] sm:$0xff] }
 0x3b0   : > { %8213 = vmatprep.mubr.msk.f32.mxu1 %vm408_vm3, %v12231_v12  ;;  %8263 = vmatprep.mubr.msk.f32.mxu0 %vm408_vm3, %v10427_v23 }
 0x3b1   : > { %v7915_v22 = vpop.f32.mrf.mxu1 }
 0x3b2   : > { %v7965_v56 = vpop.f32.mrf.mxu0 }
 0x3b3   : > { %8214 = vmatmul.mubr.msk.f32.gmra.mxu1 %vm408_vm3, %v12232_v50  ;;  %8264 = vmatmul.mubr.msk.f32.gmra.mxu0 %vm408_vm3, %v10440_v5  ;;  %v11038_v11 = vadd.f32 %v7965_v56, %v7915_v22  ;;  %v3607_v23 = vpop.f32.mrf.mxu1  ;;  %v12235_v22 = vld [vmem:[#allocation69_spill] sm:$0xff] }
 0x3b4   : > { %8216 = vmatprep.mubr.msk.f32.mxu1 %vm408_vm3, %v12233_v49  ;;  %8266 = vmatprep.mubr.msk.f32.mxu0 %vm408_vm3, %v10456_v15  ;;  %v3931_v6 = vpop.f32.mrf.mxu0 }
 0x3b5   : > { %v11044_v60 = vadd.f32 %v3931_v6, %v3607_v23  ;;  %v7918_v12 = vpop.f32.mrf.mxu1  ;;  %v12236_v6 = vld [vmem:[#allocation125_spill] sm:$0xff] }
 0x3b6   : > { %v7968_v34 = vpop.f32.mrf.mxu0 }
 0x3b7   : > { %8217 = vmatmul.mubr.msk.f32.gmra.mxu1 %vm408_vm3, %v12234_v21  ;;  %8267 = vmatmul.mubr.msk.f32.gmra.mxu0 %vm408_vm3, %v10469_v27  ;;  %v11050_v5 = vadd.f32 %v7968_v34, %v7918_v12  ;;  %v3617_v15 = vpop.f32.mrf.mxu1  ;;  %v12237_v12 = vld [vmem:[#allocation130_spill] sm:$0xff] }
 0x3b8   : > { %8219 = vmatprep.mubr.msk.f32.mxu1 %vm408_vm3, %v12235_v22  ;;  %8269 = vmatprep.mubr.msk.f32.mxu0 %vm408_vm3, %v10484_v8  ;;  %v3941_v56 = vpop.f32.mrf.mxu0 }
 0x3b9   : > { %v11056_v50 = vadd.f32 %v3941_v56, %v3617_v15  ;;  %v12238_v56 = vld [vmem:[#allocation15_spill] sm:$0xff] }
 0x3bb   : > { %v7921_v49 = vpop.f32.mrf.mxu1  ;;  %v7971_v23 = vpop.f32.mrf.mxu0  ;;  %8220 = vmatmul.mubr.msk.f32.gmra.mxu1 %vm408_vm3, %v12236_v6  ;;  %8270 = vmatmul.mubr.msk.f32.gmra.mxu0 %vm408_vm3, %v10496_v29 }
 0x3bc   : > { %v11062_v27 = vadd.f32 %v7971_v23, %v7921_v49  ;;  %8222 = vmatprep.mubr.msk.f32.mxu1 %vm408_vm3, %v12237_v12  ;;  %8272 = vmatprep.mubr.msk.f32.mxu0 %vm408_vm3, %v10506_v24  ;;  %v12239_v49 = vld [vmem:[#allocation17_spill] sm:$0xff] }
 0x3bd   : > { %v3627_v8 = vpop.f32.mrf.mxu1  ;;  %v3951_v34 = vpop.f32.mrf.mxu0 }
 0x3be   : > { %v11068_v21 = vadd.f32 %v3951_v34, %v3627_v8  ;;  %v12240_v34 = vld [vmem:[#allocation27_spill] sm:$0xff] }
 0x3bf   : > { %v7924_v22 = vpop.f32.mrf.mxu1  ;;  %v7974_v15 = vpop.f32.mrf.mxu0  ;;  %8223 = vmatmul.mubr.msk.f32.gmra.mxu1 %vm408_vm3, %v12238_v56  ;;  %8273 = vmatmul.mubr.msk.f32.gmra.mxu0 %vm408_vm3, %v10519_v10 }
 0x3c0   : > { %v11074_v29 = vadd.f32 %v7974_v15, %v7924_v22  ;;  %8225 = vmatprep.mubr.msk.f32.mxu1 %vm408_vm3, %v12239_v49  ;;  %8275 = vmatprep.mubr.msk.f32.mxu0 %vm408_vm3, %v10527_v52  ;;  %v12241_v22 = vld [vmem:[#allocation68_spill] sm:$0xff] }
 0x3c1   : > { %v3637_v24 = vpop.f32.mrf.mxu1  ;;  %v3961_v23 = vpop.f32.mrf.mxu0 }
 0x3c2   : > { %v11080_v6 = vadd.f32 %v3961_v23, %v3637_v24  ;;  %v12242_v23 = vld [vmem:[#allocation67_spill] sm:$0xff] }
 0x3c3   : > { %v7927_v12 = vpop.f32.mrf.mxu1  ;;  %v7977_v8 = vpop.f32.mrf.mxu0  ;;  %8226 = vmatmul.mubr.msk.f32.gmra.mxu1 %vm408_vm3, %v12240_v34  ;;  %8276 = vmatmul.mubr.msk.f32.gmra.mxu0 %vm408_vm3, %v10539_v36 }
 0x3c4   : > { %v11086_v10 = vadd.f32 %v7977_v8, %v7927_v12  ;;  %8228 = vmatprep.mubr.msk.f32.mxu1 %vm408_vm3, %v12241_v22  ;;  %8278 = vmatprep.mubr.msk.f32.mxu0 %vm408_vm3, %v10547_v26  ;;  %v12243_v12 = vld [vmem:[#allocation126_spill] sm:$0xff] }
 0x3c5   : > { %v3647_v52 = vpop.f32.mrf.mxu1  ;;  %v3971_v15 = vpop.f32.mrf.mxu0 }
 0x3c6   : > { %v11092_v56 = vadd.f32 %v3971_v15, %v3647_v52  ;;  %v12244_v15 = vld [vmem:[#allocation133_spill] sm:$0xff] }
 0x3c7   : > { %v7930_v49 = vpop.f32.mrf.mxu1  ;;  %v7980_v24 = vpop.f32.mrf.mxu0  ;;  %8229 = vmatmul.mubr.msk.f32.gmra.mxu1 %vm408_vm3, %v12242_v23  ;;  %8279 = vmatmul.mubr.msk.f32.gmra.mxu0 %vm408_vm3, %v10559_v57 }
 0x3c8   : > { %v11098_v36 = vadd.f32 %v7980_v24, %v7930_v49  ;;  %8231 = vmatprep.mubr.msk.f32.mxu1 %vm408_vm3, %v12243_v12  ;;  %8281 = vmatprep.mubr.msk.f32.mxu0 %vm408_vm3, %v10566_v38  ;;  %v12245_v49 = vld [vmem:[#allocation19_spill] sm:$0xff] }
 0x3c9   : > { %v3657_v26 = vpop.f32.mrf.mxu1  ;;  %v3981_v8 = vpop.f32.mrf.mxu0 }
 0x3ca   : > { %v11104_v34 = vadd.f32 %v3981_v8, %v3657_v26  ;;  %v12246_v8 = vld [vmem:[#allocation25_spill] sm:$0xff] }
 0x3cb   : > { %v7933_v22 = vpop.f32.mrf.mxu1  ;;  %v7983_v52 = vpop.f32.mrf.mxu0  ;;  %8232 = vmatmul.mubr.msk.f32.gmra.mxu1 %vm408_vm3, %v12244_v15  ;;  %8282 = vmatmul.mubr.msk.f32.gmra.mxu0 %vm408_vm3, %v10577_v63  ;;  %v3341_v15 = vld [vmem:[#allocation3 + $0x199] sm:$0xff] }
 0x3cc   : > { %v11110_v57 = vadd.f32 %v7983_v52, %v7933_v22  ;;  %8234 = vmatprep.mubr.msk.f32.mxu1 %vm408_vm3, %v12245_v49  ;;  %8284 = vmatprep.mubr.msk.f32.mxu0 %vm408_vm3, %v10583_v28  ;;  %v3305_v52 = vld [vmem:[#allocation3 + $0x198] sm:$0xff] }
 0x3cd   : > { %v3667_v38 = vpop.f32.mrf.mxu1  ;;  %v3991_v24 = vpop.f32.mrf.mxu0 }
 0x3ce   : > { %v11116_v23 = vadd.f32 %v3991_v24, %v3667_v38 }
 0x3cf   : > { %v7936_v12 = vpop.f32.mrf.mxu1  ;;  %v7986_v26 = vpop.f32.mrf.mxu0  ;;  %8235 = vmatmul.mubr.msk.f32.gmra.mxu1 %vm408_vm3, %v10587_v48  ;;  %8285 = vmatmul.mubr.msk.f32.gmra.mxu0 %vm408_vm3, %v10593_v1  ;;  %v3306_v1 = vld [vmem:[#allocation3 + $0x1a0] sm:$0xff] }
 0x3d0   : > { %v11122_v63 = vadd.f32 %v7986_v26, %v7936_v12  ;;  %8237 = vmatprep.mubr.msk.f32.mxu1 %vm408_vm3, %v12246_v8  ;;  %8287 = vmatprep.mubr.msk.f32.mxu0 %vm408_vm3, %v10940_v35  ;;  %v3342_v35 = vld [vmem:[#allocation3 + $0x1a1] sm:$0xff] }
 0x3d1   : > { %v3677_v28 = vpop.f32.mrf.mxu1  ;;  %v4001_v22 = vpop.f32.mrf.mxu0 }
 0x3d2   : > { %v11128_v49 = vadd.f32 %v4001_v22, %v3677_v28 }
 0x3d3   : > { %v7939_v38 = vpop.f32.mrf.mxu1  ;;  %v7989_v24 = vpop.f32.mrf.mxu0  ;;  %8238 = vmatmul.mubr.msk.f32.gmra.mxu1 %vm408_vm3, %v10803_v31  ;;  %8288 = vmatmul.mubr.msk.f32.gmra.mxu0 %vm408_vm3, %v10948_v47 }
 0x3d4   : > { %v11134_v48 = vadd.f32 %v7989_v24, %v7939_v38  ;;  %8240 = vmatprep.mubr.msk.f32.mxu1 %vm408_vm3, %v3305_v52  ;;  %8290 = vmatprep.mubr.msk.f32.mxu0 %vm408_vm3, %v3341_v15 }
 0x3d5   : > { %v3687_v12 = vpop.f32.mrf.mxu1  ;;  %v4011_v26 = vpop.f32.mrf.mxu0 }
 0x3d6   : > { %v11138_v8 = vadd.f32 %v4011_v26, %v3687_v12  ;;  %v3872_v12 = vadd.f32 %v10970_v41, %v10968_v2 }
 0x3d7   : > { %v7942_v28 = vpop.f32.mrf.mxu1  ;;  %v7992_v22 = vpop.f32.mrf.mxu0  ;;  %8241 = vmatmul.mubr.msk.f32.gmra.mxu1 %vm408_vm3, %v3306_v1  ;;  %8291 = vmatmul.mubr.msk.f32.gmra.mxu0 %vm408_vm3, %v3342_v35  ;;  %v12248_v1 = vld [vmem:[#allocation21_spill] sm:$0xff] }
 0x3d8   : > { %v11142_v31 = vadd.f32 %v7992_v22, %v7942_v28  ;;  %8295 = vmatprep.mubr.msk.f32.mxu1 %vm408_vm3, %v10637_v42 }
 0x3d9   : > { %v3697_v47 = vpop.f32.mrf.mxu1  ;;  %v4021_v52 = vpop.f32.mrf.mxu0 }
 0x3da   : > { %v11146_v38 = vadd.f32 %v4021_v52, %v3697_v47 }
 0x3db   : > { %v7997_v15 = vpop.f32.mrf.mxu1  ;;  %v8047_v24 = vpop.f32.mrf.mxu0  ;;  %8296 = vmatmul.mubr.msk.f32.vlgmr.msra.gmra.mxu1 %vm408_vm3, %v10643_v40 }
 0x3dc   : > { %12247 = vst [vmem:[#allocation71_spill] sm:$0xff] %v11146_v38  ;;  %v4357_v26 = vadd.f32 %v7997_v15, %v12248_v1  ;;  %8298 = vmatprep.mubr.msk.f32.mxu1 %vm408_vm3, %v10649_v44 }
 0x3dd   : > { %v4197_v35 = vpop.f32.mrf.mxu1  ;;  %v4465_v28 = vpop.f32.mrf.mxu0 }
 0x3de   : > { %v11155_v42 = vadd.f32 %v8047_v24, %v4357_v26  ;;  %v4356_v22 = vadd.f32 %v4197_v35, %v3872_v12 }
 0x3df   : > { %v8000_v47 = vpop.f32.mrf.mxu1  ;;  %v8050_v52 = vpop.f32.mrf.mxu0  ;;  %8299 = vmatmul.mubr.msk.f32.gmra.mxu1 %vm408_vm3, %v10655_v19 }
 0x3e0   : > { %v11159_v38 = vadd.f32 %v4465_v28, %v4356_v22  ;;  %v4359_v40 = vadd.f32 %v8000_v47, %v10978_v32  ;;  %8301 = vmatprep.mubr.msk.f32.mxu1 %vm408_vm3, %v10661_v46 }
 0x3e1   : > { %v4207_v41 = vpop.f32.mrf.mxu1  ;;  %v4475_v2 = vpop.f32.mrf.mxu0 }
 0x3e2   : > { %v11164_v44 = vadd.f32 %v8050_v52, %v4359_v40  ;;  %v4358_v15 = vadd.f32 %v4207_v41, %v10984_v9 }
 0x3e3   : > { %v8003_v24 = vpop.f32.mrf.mxu1  ;;  %v8053_v12 = vpop.f32.mrf.mxu0  ;;  %8302 = vmatmul.mubr.msk.f32.gmra.mxu1 %vm408_vm3, %v10667_v0 }
 0x3e4   : > { %v11169_v1 = vadd.f32 %v4475_v2, %v4358_v15  ;;  %v4361_v19 = vadd.f32 %v8003_v24, %v10990_v53  ;;  %8304 = vmatprep.mubr.msk.f32.mxu1 %vm408_vm3, %v10673_v18 }
 0x3e5   : > { %v4217_v32 = vpop.f32.mrf.mxu1  ;;  %v4485_v46 = vpop.f32.mrf.mxu0 }
 0x3e6   : > { %v11174_v26 = vadd.f32 %v8053_v12, %v4361_v19  ;;  %v4360_v35 = vadd.f32 %v4217_v32, %v10996_v37 }
 0x3e7   : > { %v8006_v28 = vpop.f32.mrf.mxu1  ;;  %v8056_v9 = vpop.f32.mrf.mxu0  ;;  %8305 = vmatmul.mubr.msk.f32.gmra.mxu1 %vm408_vm3, %v10679_v3 }
 0x3e8   : > { %v11179_v22 = vadd.f32 %v4485_v46, %v4360_v35  ;;  %v4363_v0 = vadd.f32 %v8006_v28, %v11002_v45  ;;  %8307 = vmatprep.mubr.msk.f32.mxu1 %vm408_vm3, %v10685_v39 }
 0x3e9   : > { %v4227_v53 = vpop.f32.mrf.mxu1  ;;  %v4495_v18 = vpop.f32.mrf.mxu0 }
 0x3ea   : > { %v11184_v47 = vadd.f32 %v8056_v9, %v4363_v0  ;;  %v4362_v52 = vadd.f32 %v4227_v53, %v11008_v61 }
 0x3eb   : > { %v8009_v40 = vpop.f32.mrf.mxu1  ;;  %v8059_v37 = vpop.f32.mrf.mxu0  ;;  %8308 = vmatmul.mubr.msk.f32.gmra.mxu1 %vm408_vm3, %v10691_v25 }
 0x3ec   : > { %v11189_v41 = vadd.f32 %v4495_v18, %v4362_v52  ;;  %v4365_v3 = vadd.f32 %v8009_v40, %v11014_v7  ;;  %8310 = vmatprep.mubr.msk.f32.mxu1 %vm408_vm3, %v10697_v13 }
 0x3ed   : > { %v4237_v45 = vpop.f32.mrf.mxu1  ;;  %v4505_v39 = vpop.f32.mrf.mxu0 }
 0x3ee   : > { %v11194_v2 = vadd.f32 %v8059_v37, %v4365_v3  ;;  %v4364_v15 = vadd.f32 %v4237_v45, %v11020_v17 }
 0x3ef   : > { %v8012_v24 = vpop.f32.mrf.mxu1  ;;  %v8062_v61 = vpop.f32.mrf.mxu0  ;;  %8311 = vmatmul.mubr.msk.f32.gmra.mxu1 %vm408_vm3, %v10703_v62 }
 0x3f0   : > { %v11199_v12 = vadd.f32 %v4505_v39, %v4364_v15  ;;  %v4367_v25 = vadd.f32 %v8012_v24, %v11026_v54  ;;  %8313 = vmatprep.mubr.msk.f32.mxu1 %vm408_vm3, %v10709_v16 }
 0x3f1   : > { %v4247_v7 = vpop.f32.mrf.mxu1  ;;  %v4515_v13 = vpop.f32.mrf.mxu0 }
 0x3f2   : > { %v11204_v19 = vadd.f32 %v8062_v61, %v4367_v25  ;;  %v4366_v32 = vadd.f32 %v4247_v7, %v11032_v58 }
 0x3f3   : > { %v8015_v46 = vpop.f32.mrf.mxu1  ;;  %v8065_v17 = vpop.f32.mrf.mxu0  ;;  %8314 = vmatmul.mubr.msk.f32.gmra.mxu1 %vm408_vm3, %v10715_v30 }
 0x3f4   : > { %v11209_v35 = vadd.f32 %v4515_v13, %v4366_v32  ;;  %v4369_v62 = vadd.f32 %v8015_v46, %v11038_v11  ;;  %8316 = vmatprep.mubr.msk.f32.mxu1 %vm408_vm3, %v10721_v43  ;;  %v12249_v13 = vld [vmem:[#allocation70_spill] sm:$0xff] }
 0x3f5   : > { %v4257_v54 = vpop.f32.mrf.mxu1  ;;  %v4525_v16 = vpop.f32.mrf.mxu0 }
 0x3f6   : > { %v11214_v28 = vadd.f32 %v8065_v17, %v4369_v62  ;;  %v4368_v9 = vadd.f32 %v4257_v54, %v11044_v60  ;;  %v12250_v62 = vld [vmem:[#allocation73_spill] sm:$0xff] }
 0x3f7   : > { %v8018_v0 = vpop.f32.mrf.mxu1  ;;  %v8068_v58 = vpop.f32.mrf.mxu0  ;;  %8317 = vmatmul.mubr.msk.f32.gmra.mxu1 %vm408_vm3, %v10727_v14 }
 0x3f8   : > { %v11219_v53 = vadd.f32 %v4525_v16, %v4368_v9  ;;  %v4371_v30 = vadd.f32 %v8018_v0, %v11050_v5  ;;  %8319 = vmatprep.mubr.msk.f32.mxu1 %vm408_vm3, %v10733_v4  ;;  %v12251_v16 = vld [vmem:[#allocation136_spill] sm:$0xff] }
 0x3f9   : > { %v4267_v11 = vpop.f32.mrf.mxu1  ;;  %v4535_v43 = vpop.f32.mrf.mxu0 }
 0x3fa   : > { %v11224_v18 = vadd.f32 %v8068_v58, %v4371_v30  ;;  %v4370_v52 = vadd.f32 %v4267_v11, %v11056_v50  ;;  %v12252_v11 = vld [vmem:[#allocation128_spill] sm:$0xff] }
 0x3fb   : > { %v8021_v40 = vpop.f32.mrf.mxu1  ;;  %v8071_v60 = vpop.f32.mrf.mxu0  ;;  %8320 = vmatmul.mubr.msk.f32.gmra.mxu1 %vm408_vm3, %v10739_v59 }
 0x3fc   : > { %v11229_v37 = vadd.f32 %v4535_v43, %v4370_v52  ;;  %v4373_v14 = vadd.f32 %v8021_v40, %v11062_v27  ;;  %8322 = vmatprep.mubr.msk.f32.mxu1 %vm408_vm3, %v10745_v55  ;;  %v12253_v40 = vld [vmem:[#allocation23_spill] sm:$0xff] }
 0x3fd   : > { %v4277_v5 = vpop.f32.mrf.mxu1  ;;  %v4545_v4 = vpop.f32.mrf.mxu0 }
 0x3fe   : > { %v11234_v3 = vadd.f32 %v8071_v60, %v4373_v14  ;;  %v4372_v45 = vadd.f32 %v4277_v5, %v11068_v21 }
 0x3ff   : > { %v8024_v39 = vpop.f32.mrf.mxu1  ;;  %v8074_v50 = vpop.f32.mrf.mxu0  ;;  %8323 = vmatmul.mubr.msk.f32.gmra.mxu1 %vm408_vm3, %v10751_v20 }
 0x400   : > { %v11239_v15 = vadd.f32 %v4545_v4, %v4372_v45  ;;  %v4375_v59 = vadd.f32 %v8024_v39, %v11074_v29  ;;  %8325 = vmatprep.mubr.msk.f32.mxu1 %vm408_vm3, %v10757_v33  ;;  %v12254_v45 = vld [vmem:[#allocation31_spill] sm:$0xff] }
 0x401   : > { %v4287_v27 = vpop.f32.mrf.mxu1  ;;  %v4555_v55 = vpop.f32.mrf.mxu0 }
 0x402   : > { %v11244_v24 = vadd.f32 %v8074_v50, %v4375_v59  ;;  %v4374_v61 = vadd.f32 %v4287_v27, %v11080_v6  ;;  %v12255_v59 = vld [vmem:[#allocation29_spill] sm:$0xff] }
 0x403   : > { %v8027_v25 = vpop.f32.mrf.mxu1  ;;  %v8077_v21 = vpop.f32.mrf.mxu0  ;;  %8326 = vmatmul.mubr.msk.f32.gmra.mxu1 %vm408_vm3, %v10763_v51 }
 0x404   : > { %v11249_v7 = vadd.f32 %v4555_v55, %v4374_v61  ;;  %v4377_v20 = vadd.f32 %v8027_v25, %v11086_v10  ;;  %8328 = vmatprep.mubr.msk.f32.mxu1 %vm408_vm3, %v12249_v13  ;;  %v3377_v55 = vld [vmem:[#allocation3 + $0x19a] sm:$0xff] }
 0x405   : > { %v4297_v29 = vpop.f32.mrf.mxu1  ;;  %v4565_v33 = vpop.f32.mrf.mxu0 }
 0x406   : > { %v11254_v32 = vadd.f32 %v8077_v21, %v4377_v20  ;;  %v4376_v46 = vadd.f32 %v4297_v29, %v11092_v56  ;;  %v12256_v20 = vld [vmem:[#allocation72_spill] sm:$0xff] }
 0x407   : > { %v8030_v17 = vpop.f32.mrf.mxu1  ;;  %v8080_v6 = vpop.f32.mrf.mxu0  ;;  %8329 = vmatmul.mubr.msk.f32.gmra.mxu1 %vm408_vm3, %v12250_v62 }
 0x408   : > { %v11259_v54 = vadd.f32 %v4565_v33, %v4376_v46  ;;  %v4379_v51 = vadd.f32 %v8030_v17, %v11098_v36  ;;  %8331 = vmatprep.mubr.msk.f32.mxu1 %vm408_vm3, %v12251_v16 }
 0x409   : > { %v4307_v10 = vpop.f32.mrf.mxu1  ;;  %v4575_v9 = vpop.f32.mrf.mxu0 }
 0x40a   : > { %v11264_v0 = vadd.f32 %v8080_v6, %v4379_v51  ;;  %v4378_v58 = vadd.f32 %v4307_v10, %v11104_v34 }
 0x40b   : > { %v8033_v30 = vpop.f32.mrf.mxu1  ;;  %v8083_v56 = vpop.f32.mrf.mxu0  ;;  %8332 = vmatmul.mubr.msk.f32.gmra.mxu1 %vm408_vm3, %v12252_v11 }
 0x40c   : > { %v11269_v43 = vadd.f32 %v4575_v9, %v4378_v58  ;;  %v4381_v52 = vadd.f32 %v8033_v30, %v11110_v57  ;;  %8334 = vmatprep.mubr.msk.f32.mxu1 %vm408_vm3, %v12253_v40  ;;  %v12257_v58 = vld [vmem:[#allocation71_spill] sm:$0xff] }
 0x40d   : > { %v4317_v36 = vpop.f32.mrf.mxu1  ;;  %v4585_v60 = vpop.f32.mrf.mxu0 }
 0x40e   : > { %v11274_v14 = vadd.f32 %v8083_v56, %v4381_v52  ;;  %v4380_v5 = vadd.f32 %v4317_v36, %v11116_v23 }
 0x40f   : > { %v8036_v4 = vpop.f32.mrf.mxu1  ;;  %v8086_v34 = vpop.f32.mrf.mxu0  ;;  %8335 = vmatmul.mubr.msk.f32.gmra.mxu1 %vm408_vm3, %v12254_v45 }
 0x410   : > { %v11279_v39 = vadd.f32 %v4585_v60, %v4380_v5  ;;  %v4383_v50 = vadd.f32 %v8036_v4, %v11122_v63  ;;  %8337 = vmatprep.mubr.msk.f32.mxu1 %vm408_vm3, %v12255_v59  ;;  %v3378_v63 = vld [vmem:[#allocation3 + $0x1a2] sm:$0xff] }
 0x411   : > { %v4327_v57 = vpop.f32.mrf.mxu1  ;;  %v4595_v27 = vpop.f32.mrf.mxu0 }
 0x412   : > { %v11284_v61 = vadd.f32 %v8086_v34, %v4383_v50  ;;  %v4382_v25 = vadd.f32 %v4327_v57, %v11128_v49 }
 0x413   : > { %v8039_v23 = vpop.f32.mrf.mxu1  ;;  %v8089_v21 = vpop.f32.mrf.mxu0  ;;  %8338 = vmatmul.mubr.msk.f32.gmra.mxu1 %vm408_vm3, %v12256_v20 }
 0x414   : > { %v11289_v13 = vadd.f32 %v4595_v27, %v4382_v25  ;;  %v4385_v29 = vadd.f32 %v8039_v23, %v11134_v48  ;;  %8340 = vmatprep.mubr.msk.f32.mxu1 %vm408_vm3, %v3377_v55 }
 0x415   : > { %v4337_v33 = vpop.f32.mrf.mxu1  ;;  %v4605_v46 = vpop.f32.mrf.mxu0 }
 0x416   : > { %v11293_v17 = vadd.f32 %v8089_v21, %v4385_v29  ;;  %v4384_v6 = vadd.f32 %v4337_v33, %v11138_v8 }
 0x417   : > { %v8042_v62 = vpop.f32.mrf.mxu1  ;;  %v8092_v49 = vpop.f32.mrf.mxu0  ;;  %8341 = vmatmul.mubr.msk.f32.gmra.mxu1 %vm408_vm3, %v3378_v63 }
 0x418   : > { %v11297_v51 = vadd.f32 %v4605_v46, %v4384_v6  ;;  %v4387_v16 = vadd.f32 %v8042_v62, %v11142_v31 }
 0x419   : > { %v4347_v10 = vpop.f32.mrf.mxu1  ;;  %v4615_v9 = vpop.f32.mrf.mxu0 }
 0x41a   : > { %v11300_v48 = vadd.f32 %v8092_v49, %v4387_v16  ;;  %v4386_v30 = vadd.f32 %v4347_v10, %v12257_v58 }
 0x41b   : > { %v8097_v56 = vpop.f32.mrf.mxu1  ;;  %v8147_v11 = vpop.f32.mrf.mxu0 }
 0x41c   : > { %v11303_v52 = vadd.f32 %v4615_v9, %v4386_v30  ;;  %v4893_v8 = vadd.f32 %v8097_v56, %v11155_v42 }
 0x41d   : > { %v4733_v40 = vpop.f32.mrf.mxu1  ;;  %v11306_v36 = vpop.f32.mrf.mxu0 }
 0x41e   : > { %v11308_v60 = vadd.f32 %v8147_v11, %v4893_v8  ;;  %v11311_v5 = vadd.f32 %v4733_v40, %v11159_v38 }
 0x41f   : > { %v8100_v31 = vpop.f32.mrf.mxu1  ;;  %v8150_v4 = vpop.f32.mrf.mxu0 }
 0x420   : > { %v4895_v34 = vadd.f32 %v8100_v31, %v11164_v44 }
 0x421   : > { %v4743_v45 = vpop.f32.mrf.mxu1  ;;  %v5011_v50 = vpop.f32.mrf.mxu0 }
 0x422   : > { %v11314_v59 = vadd.f32 %v8150_v4, %v4895_v34  ;;  %v4894_v57 = vadd.f32 %v4743_v45, %v11169_v1 }
 0x423   : > { %v8103_v27 = vpop.f32.mrf.mxu1  ;;  %v8153_v42 = vpop.f32.mrf.mxu0 }
 0x424   : > { %v11317_v55 = vadd.f32 %v5011_v50, %v4894_v57  ;;  %v4897_v25 = vadd.f32 %v8103_v27, %v11174_v26 }
 0x425   : > { %v4753_v23 = vpop.f32.mrf.mxu1  ;;  %v5021_v21 = vpop.f32.mrf.mxu0 }
 0x426   : > { %v11320_v38 = vadd.f32 %v8153_v42, %v4897_v25  ;;  %v4896_v20 = vadd.f32 %v4753_v23, %v11179_v22 }
 0x427   : > { %v8106_v29 = vpop.f32.mrf.mxu1  ;;  %v8156_v44 = vpop.f32.mrf.mxu0 }
 0x428   : > { %v11323_v63 = vadd.f32 %v5021_v21, %v4896_v20  ;;  %v4899_v33 = vadd.f32 %v8106_v29, %v11184_v47 }
 0x429   : > { %v4763_v46 = vpop.f32.mrf.mxu1  ;;  %v5031_v1 = vpop.f32.mrf.mxu0 }
 0x42a   : > { %v11326_v6 = vadd.f32 %v8156_v44, %v4899_v33  ;;  %v4898_v62 = vadd.f32 %v4763_v46, %v11189_v41 }
 0x42b   : > { %v8109_v49 = vpop.f32.mrf.mxu1  ;;  %v8159_v26 = vpop.f32.mrf.mxu0 }
 0x42c   : > { %v11329_v16 = vadd.f32 %v5031_v1, %v4898_v62  ;;  %v4901_v10 = vadd.f32 %v8109_v49, %v11194_v2 }
 0x42d   : > { %v4773_v9 = vpop.f32.mrf.mxu1  ;;  %v5041_v22 = vpop.f32.mrf.mxu0 }
 0x42e   : > { %v11332_v58 = vadd.f32 %v8159_v26, %v4901_v10  ;;  %v4900_v30 = vadd.f32 %v4773_v9, %v11199_v12 }
 0x42f   : > { %v8112_v56 = vpop.f32.mrf.mxu1  ;;  %v8162_v47 = vpop.f32.mrf.mxu0 }
 0x430   : > { %v11335_v11 = vadd.f32 %v5041_v22, %v4900_v30  ;;  %v4903_v8 = vadd.f32 %v8112_v56, %v11204_v19 }
 0x431   : > { %v4783_v40 = vpop.f32.mrf.mxu1  ;;  %v5051_v41 = vpop.f32.mrf.mxu0 }
 0x432   : > { %v11338_v31 = vadd.f32 %v8162_v47, %v4903_v8  ;;  %v4902_v4 = vadd.f32 %v4783_v40, %v11209_v35 }
 0x433   : > { %v8115_v34 = vpop.f32.mrf.mxu1  ;;  %v8165_v2 = vpop.f32.mrf.mxu0 }
 0x434   : > { %v11341_v45 = vadd.f32 %v5051_v41, %v4902_v4  ;;  %v4905_v50 = vadd.f32 %v8115_v34, %v11214_v28 }
 0x435   : > { %v4793_v57 = vpop.f32.mrf.mxu1  ;;  %v5061_v12 = vpop.f32.mrf.mxu0 }
 0x436   : > { %v11344_v27 = vadd.f32 %v8165_v2, %v4905_v50  ;;  %v4904_v42 = vadd.f32 %v4793_v57, %v11219_v53 }
 0x437   : > { %v8118_v25 = vpop.f32.mrf.mxu1  ;;  %v8168_v19 = vpop.f32.mrf.mxu0 }
 0x438   : > { %v11347_v23 = vadd.f32 %v5061_v12, %v4904_v42  ;;  %v4907_v21 = vadd.f32 %v8118_v25, %v11224_v18 }
 0x439   : > { %v4803_v20 = vpop.f32.mrf.mxu1  ;;  %v5071_v35 = vpop.f32.mrf.mxu0 }
 0x43a   : > { %v11350_v29 = vadd.f32 %v8168_v19, %v4907_v21  ;;  %v4906_v44 = vadd.f32 %v4803_v20, %v11229_v37 }
 0x43b   : > { %v8121_v33 = vpop.f32.mrf.mxu1  ;;  %v8171_v28 = vpop.f32.mrf.mxu0 }
 0x43c   : > { %v11353_v46 = vadd.f32 %v5071_v35, %v4906_v44  ;;  %v4909_v1 = vadd.f32 %v8121_v33, %v11234_v3 }
 0x43d   : > { %v4813_v62 = vpop.f32.mrf.mxu1  ;;  %v5081_v53 = vpop.f32.mrf.mxu0 }
 0x43e   : > { %v11356_v49 = vadd.f32 %v8171_v28, %v4909_v1  ;;  %v4908_v26 = vadd.f32 %v4813_v62, %v11239_v15 }
 0x43f   : > { %v8124_v10 = vpop.f32.mrf.mxu1  ;;  %v8174_v18 = vpop.f32.mrf.mxu0 }
 0x440   : > { %v11359_v9 = vadd.f32 %v5081_v53, %v4908_v26  ;;  %v4911_v22 = vadd.f32 %v8124_v10, %v11244_v24 }
 0x441   : > { %v4823_v30 = vpop.f32.mrf.mxu1  ;;  %v5091_v37 = vpop.f32.mrf.mxu0 }
 0x442   : > { %v11362_v56 = vadd.f32 %v8174_v18, %v4911_v22  ;;  %v4910_v47 = vadd.f32 %v4823_v30, %v11249_v7 }
 0x443   : > { %v8127_v8 = vpop.f32.mrf.mxu1  ;;  %v8177_v3 = vpop.f32.mrf.mxu0 }
 0x444   : > { %v11365_v40 = vadd.f32 %v5091_v37, %v4910_v47  ;;  %v4913_v41 = vadd.f32 %v8127_v8, %v11254_v32 }
 0x445   : > { %v4833_v4 = vpop.f32.mrf.mxu1  ;;  %v5101_v15 = vpop.f32.mrf.mxu0 }
 0x446   : > { %v11368_v34 = vadd.f32 %v8177_v3, %v4913_v41  ;;  %v4912_v2 = vadd.f32 %v4833_v4, %v11259_v54 }
 0x447   : > { %v8130_v50 = vpop.f32.mrf.mxu1  ;;  %v8180_v24 = vpop.f32.mrf.mxu0 }
 0x448   : > { %v11371_v57 = vadd.f32 %v5101_v15, %v4912_v2  ;;  %v4915_v12 = vadd.f32 %v8130_v50, %v11264_v0 }
 0x449   : > { %v4843_v42 = vpop.f32.mrf.mxu1  ;;  %v5111_v7 = vpop.f32.mrf.mxu0 }
 0x44a   : > { %v11374_v25 = vadd.f32 %v8180_v24, %v4915_v12  ;;  %v4914_v19 = vadd.f32 %v4843_v42, %v11269_v43 }
 0x44b   : > { %v8133_v21 = vpop.f32.mrf.mxu1  ;;  %v8183_v32 = vpop.f32.mrf.mxu0 }
 0x44c   : > { %v11377_v20 = vadd.f32 %v5111_v7, %v4914_v19  ;;  %v4917_v35 = vadd.f32 %v8133_v21, %v11274_v14 }
 0x44d   : > { %v4853_v44 = vpop.f32.mrf.mxu1  ;;  %v5121_v54 = vpop.f32.mrf.mxu0 }
 0x44e   : > { %v11380_v33 = vadd.f32 %v8183_v32, %v4917_v35  ;;  %v4916_v28 = vadd.f32 %v4853_v44, %v11279_v39 }
 0x44f   : > { %v8136_v1 = vpop.f32.mrf.mxu1  ;;  %v8186_v0 = vpop.f32.mrf.mxu0 }
 0x450   : > { %v11383_v62 = vadd.f32 %v5121_v54, %v4916_v28  ;;  %v4919_v53 = vadd.f32 %v8136_v1, %v11284_v61 }
 0x451   : > { %v4863_v26 = vpop.f32.mrf.mxu1  ;;  %v5131_v43 = vpop.f32.mrf.mxu0 }
 0x452   : > { %v11386_v10 = vadd.f32 %v8186_v0, %v4919_v53  ;;  %v4918_v18 = vadd.f32 %v4863_v26, %v11289_v13 }
 0x453   : > { %v8139_v22 = vpop.f32.mrf.mxu1  ;;  %v8189_v14 = vpop.f32.mrf.mxu0 }
 0x454   : > { %v11389_v30 = vadd.f32 %v5131_v43, %v4918_v18  ;;  %v4921_v37 = vadd.f32 %v8139_v22, %v11293_v17 }
 0x455   : > { %v4873_v47 = vpop.f32.mrf.mxu1  ;;  %v5141_v39 = vpop.f32.mrf.mxu0 }
 0x456   : > { %v11392_v8 = vadd.f32 %v8189_v14, %v4921_v37  ;;  %v4920_v3 = vadd.f32 %v4873_v47, %v11297_v51 }
 0x457   : > { %v8142_v41 = vpop.f32.mrf.mxu1  ;;  %v8192_v61 = vpop.f32.mrf.mxu0 }
 0x458   : > { %v11395_v4 = vadd.f32 %v5141_v39, %v4920_v3  ;;  %v4923_v15 = vadd.f32 %v8142_v41, %v11300_v48 }
 0x459   : > { %v4883_v2 = vpop.f32.mrf.mxu1  ;;  %v5151_v13 = vpop.f32.mrf.mxu0 }
 0x45a   : > { %v11398_v50 = vadd.f32 %v8192_v61, %v4923_v15  ;;  %v4922_v24 = vadd.f32 %v4883_v2, %v11303_v52 }
 0x45b   : > { %v8197_v12 = vpop.f32.mrf.mxu1  ;;  %v11401_v17 = vpop.f32.mrf.mxu0 }
 0x45c   : > { %v11403_v42 = vadd.f32 %v5151_v13, %v4922_v24  ;;  %v11406_v7 = vadd.f32 %v8197_v12, %v11308_v60 }
 0x45d   : > { %v11408_v51 = vpop.f32.mrf.mxu1  ;;  %v11410_v19 = vpop.f32.mrf.mxu0 }
 0x45f   : > { %v8200_v21 = vpop.f32.mrf.mxu1  ;;  %v11415_v35 = vpop.f32.mrf.mxu0 }
 0x460   : > { %v11413_v48 = vadd.f32 %v8200_v21, %v11314_v59 }
 0x461   : > { %v5279_v32 = vpop.f32.mrf.mxu1  ;;  %v11423_v28 = vpop.f32.mrf.mxu0 }
 0x462   : > { %v11418_v52 = vadd.f32 %v5279_v32, %v11317_v55 }
 0x463   : > { %v8203_v44 = vpop.f32.mrf.mxu1  ;;  %v11431_v26 = vpop.f32.mrf.mxu0 }
 0x464   : > { %v11421_v54 = vadd.f32 %v8203_v44, %v11320_v38 }
 0x465   : > { %v5289_v60 = vpop.f32.mrf.mxu1  ;;  %v11439_v22 = vpop.f32.mrf.mxu0 }
 0x466   : > { %v11426_v1 = vadd.f32 %v5289_v60, %v11323_v63 }
 0x467   : > { %v8206_v0 = vpop.f32.mrf.mxu1  ;;  %v11447_v47 = vpop.f32.mrf.mxu0 }
 0x468   : > { %v11429_v59 = vadd.f32 %v8206_v0, %v11326_v6 }
 0x469   : > { %v5299_v53 = vpop.f32.mrf.mxu1  ;;  %v11455_v41 = vpop.f32.mrf.mxu0 }
 0x46a   : > { %v11434_v55 = vadd.f32 %v5299_v53, %v11329_v16 }
 0x46b   : > { %v8209_v43 = vpop.f32.mrf.mxu1  ;;  %v11463_v2 = vpop.f32.mrf.mxu0 }
 0x46c   : > { %v11437_v38 = vadd.f32 %v8209_v43, %v11332_v58 }
 0x46d   : > { %v5309_v18 = vpop.f32.mrf.mxu1  ;;  %v11471_v12 = vpop.f32.mrf.mxu0 }
 0x46e   : > { %v11442_v63 = vadd.f32 %v5309_v18, %v11335_v11 }
 0x46f   : > { %v8212_v14 = vpop.f32.mrf.mxu1  ;;  %v11479_v44 = vpop.f32.mrf.mxu0 }
 0x470   : > { %v11445_v6 = vadd.f32 %v8212_v14, %v11338_v31 }
 0x471   : > { %v5319_v37 = vpop.f32.mrf.mxu1  ;;  %v11487_v53 = vpop.f32.mrf.mxu0 }
 0x472   : > { %v11450_v16 = vadd.f32 %v5319_v37, %v11341_v45 }
 0x473   : > { %v8215_v39 = vpop.f32.mrf.mxu1  ;;  %v11495_v14 = vpop.f32.mrf.mxu0 }
 0x474   : > { %v11453_v58 = vadd.f32 %v8215_v39, %v11344_v27 }
 0x475   : > { %v5329_v3 = vpop.f32.mrf.mxu1 }
 0x476   : > { %v11458_v11 = vadd.f32 %v5329_v3, %v11347_v23  ;;  %v11503_v3 = vpop.f32.mrf.mxu0 }
 0x477   : > { %v8218_v61 = vpop.f32.mrf.mxu1 }
 0x478   : > { %v11461_v31 = vadd.f32 %v8218_v61, %v11350_v29 }
 0x479   : > { %v5339_v15 = vpop.f32.mrf.mxu1 }
 0x47a   : > { %v11466_v45 = vadd.f32 %v5339_v15, %v11353_v46 }
 0x47b   : > { %v8221_v13 = vpop.f32.mrf.mxu1 }
 0x47c   : > { %v11469_v27 = vadd.f32 %v8221_v13, %v11356_v49  ;;  %v11511_v13 = vpop.f32.mrf.mxu0 }
 0x47d   : > { %v5349_v24 = vpop.f32.mrf.mxu1 }
 0x47e   : > { %v11474_v23 = vadd.f32 %v5349_v24, %v11359_v9 }
 0x47f   : > { %v8224_v21 = vpop.f32.mrf.mxu1 }
 0x480   : > { %v11477_v29 = vadd.f32 %v8224_v21, %v11362_v56 }
 0x481   : > { %v5359_v32 = vpop.f32.mrf.mxu1 }
 0x482   : > { %v11482_v46 = vadd.f32 %v5359_v32, %v11365_v40  ;;  %v5160_v32 = vadd.f32 %v11306_v36, %v11311_v5 }
 0x483   : > { %v8227_v60 = vpop.f32.mrf.mxu1 }
 0x484   : > { %v11485_v49 = vadd.f32 %v8227_v60, %v11368_v34 }
 0x485   : > { %v5369_v0 = vpop.f32.mrf.mxu1 }
 0x486   : > { %v11490_v9 = vadd.f32 %v5369_v0, %v11371_v57  ;;  %v5428_v0 = vadd.f32 %v11408_v51, %v5160_v32  ;;  %v11541_v51 = vld [vmem:[%s11711_s4] ss:$0 sm:$0xff] }
 0x487   : > { %v8230_v43 = vpop.f32.mrf.mxu1 }
 0x488   : > { %v11493_v56 = vadd.f32 %v8230_v43, %v11374_v25  ;;  %v5696_v5 = vadd.f32 %v11410_v19, %v5428_v0  ;;  %v5699_v19 = vadd.f32 %v11415_v35, %v11413_v48 }
 0x489   : > { %v5379_v18 = vpop.f32.mrf.mxu1 }
 0x48a   : > { %v11498_v40 = vadd.f32 %v5379_v18, %v11377_v20 }
 0x48b   : > { %v8233_v37 = vpop.f32.mrf.mxu1 }
 0x48c   : > { %v11501_v34 = vadd.f32 %v8233_v37, %v11380_v33 }
 0x48d   : > { %v5389_v39 = vpop.f32.mrf.mxu1 }
 0x48e   : > { %v11506_v57 = vadd.f32 %v5389_v39, %v11383_v62  ;;  %v11521_v62 = vpop.f32.mrf.mxu0 }
 0x48f   : > { %v8236_v61 = vpop.f32.mrf.mxu1 }
 0x490   : > { %v11509_v25 = vadd.f32 %v8236_v61, %v11386_v10  ;;  %v11532_v18 = vpop.f32.mrf.mxu0 }
 0x491   : > { %v5399_v15 = vpop.f32.mrf.mxu1 }
 0x492   : > { %v11514_v20 = vadd.f32 %v5399_v15, %v11389_v30  ;;  %v11543_v39 = vpop.f32.mrf.mxu0 }
 0x493   : > { %v8239_v24 = vpop.f32.mrf.mxu1 }
 0x494   : > { %v11517_v33 = vadd.f32 %v8239_v24, %v11392_v8  ;;  %v5697_v8 = vadd.f32 %v11401_v17, %v11406_v7  ;;  %v5698_v17 = vadd.f32 %v11423_v28, %v11418_v52 }
 0x495   : > { %v5409_v21 = vpop.f32.mrf.mxu1 }
 0x496   : > { %v11524_v60 = vadd.f32 %v5409_v21, %v11395_v4  ;;  %v11551_v21 = vpop.f32.mrf.mxu0 }
 0x497   : > { %v8242_v10 = vpop.f32.mrf.mxu1 }
 0x498   : > { %v11528_v43 = vadd.f32 %v8242_v10, %v11398_v50  ;;  %v12259_v10 = vld [vmem:[#allocation4_spill] sm:$0xff] }
 0x499   : > { %v5419_v30 = vpop.f32.mrf.mxu1 }
 0x49a   : > { %v11535_v37 = vadd.f32 %v5419_v30, %v11403_v42 }
 0x49b   : > { %v8297_v36 = vpop.f32.mrf.mxu1 }
 0x49c   : > { %12258 = vst [vmem:[#allocation139_spill] sm:$0xff] %v11535_v37  ;;  %v5965_v4 = vadd.f32 %v8297_v36, %v5697_v8 }
 0x49d   : > { %v5805_v50 = vpop.f32.mrf.mxu1 }
 0x49e   : > { %v5964_v61 = vadd.f32 %v5805_v50, %v5696_v5  ;;  %v6004_v42 = vadd.f32 %v11541_v51, %v5965_v4  ;;  %v12260_v50 = vld [vmem:[#allocation5_spill] sm:$0xff]  ;;  %v5700_v4 = vadd.f32 %v11439_v22, %v11426_v1 }
 0x49f   : > { %v8300_v15 = vpop.f32.mrf.mxu1 }
 0x4a0   : > { %v6003_v7 = vadd.f32 %v11541_v51, %v5964_v61  ;;  %v5967_v8 = vadd.f32 %v8300_v15, %v5699_v19  ;;  %v6036_v52 = vadd.f32 %v6004_v42, %v12260_v50  ;;  %v5627_v61 = vpop.f32.mrf.mxu0  ;;  %v5701_v15 = vadd.f32 %v11431_v26, %v11421_v54 }
 0x4a1   : > { %v5815_v24 = vpop.f32.mrf.mxu1 }
 0x4a2   : > { %v5966_v32 = vadd.f32 %v5815_v24, %v5698_v17  ;;  %v6035_v0 = vadd.f32 %v6003_v7, %v12259_v10  ;;  %v6006_v48 = vadd.f32 %v11541_v51, %v5967_v8  ;;  %v6068_v17 = vmax.f32 %v6036_v52, 0.0  ;;  %v12261_v24 = vld [vmem:[#allocation6_spill] sm:$0xff]  ;;  %v11562_v19 = vpop.f32.mrf.mxu0 }
 0x4a3   : > { %v8303_v30 = vpop.f32.mrf.mxu1  ;;  %v5702_v8 = vadd.f32 %v11455_v41, %v11434_v55 }
 0x4a4   : > { %v6005_v36 = vadd.f32 %v11541_v51, %v5966_v32  ;;  %v6067_v5 = vmax.f32 %v6035_v0, 0.0  ;;  %v5969_v32 = vadd.f32 %v8303_v30, %v5701_v15  ;;  %v12262_v0 = vld [vmem:[#allocation7_spill] sm:$0xff]  ;;  %v5637_v52 = vpop.f32.mrf.mxu0  ;;  %v5703_v30 = vadd.f32 %v11447_v47, %v11429_v59  ;;  %v12264_v15 = vld [vmem:[#allocation9_spill] sm:$0xff] }
 0x4a5   : > { %v5825_v28 = vpop.f32.mrf.mxu1 }
 0x4a6   : > { %6099 = vxpose.xlu1.b32.start [1/16] (narrow) %v6067_v5, 8  ;;  %v5968_v35 = vadd.f32 %v5825_v28, %v5700_v4  ;;  %v6037_v7 = vadd.f32 %v6005_v36, %v12261_v24  ;;  %v6038_v5 = vadd.f32 %v6006_v48, %v12262_v0  ;;  %v6008_v28 = vadd.f32 %v11541_v51, %v5969_v32  ;;  %v12263_v4 = vld [vmem:[#allocation8_spill] sm:$0xff]  ;;  %v8280_v24 = vpop.f32.mrf.mxu0 }
 0x4a7   : > { %v8306_v37 = vpop.f32.mrf.mxu1 }
 0x4a8   : > { %v6007_v1 = vadd.f32 %v11541_v51, %v5968_v35  ;;  %v6069_v22 = vmax.f32 %v6037_v7, 0.0  ;;  %v6070_v26 = vmax.f32 %v6038_v5, 0.0  ;;  %v5971_v48 = vadd.f32 %v8306_v37, %v5703_v30  ;;  %v5647_v32 = vpop.f32.mrf.mxu0  ;;  %v12265_v37 = vld [vmem:[#allocation10_spill] sm:$0xff] }
 0x4a9   : > { %v5835_v10 = vpop.f32.mrf.mxu1 }
 0x4aa   : > { %6100 = vxpose.xlu1.b32.cont [2/16] (narrow) %v6068_v17, 8  ;;  %v5970_v54 = vadd.f32 %v5835_v10, %v5702_v8  ;;  %v6039_v17 = vadd.f32 %v6007_v1, %v12263_v4  ;;  %v5704_v10 = vadd.f32 %v11471_v12, %v11442_v63  ;;  %v6010_v1 = vadd.f32 %v11541_v51, %v5971_v48  ;;  %v8283_v4 = vpop.f32.mrf.mxu0 }
 0x4ab   : > { %v8309_v42 = vpop.f32.mrf.mxu1 }
 0x4ac   : > { %v6009_v55 = vadd.f32 %v11541_v51, %v5970_v54  ;;  %v6071_v41 = vmax.f32 %v6039_v17, 0.0  ;;  %v5705_v54 = vadd.f32 %v11463_v2, %v11437_v38  ;;  %v12266_v17 = vld [vmem:[#allocation12_spill] sm:$0xff]  ;;  %v5706_v38 = vadd.f32 %v11487_v53, %v11450_v16  ;;  %v12267_v53 = vld [vmem:[#allocation14_spill] sm:$0xff] }
 0x4ad   : > { %v5845_v50 = vpop.f32.mrf.mxu1  ;;  %v6042_v30 = vadd.f32 %v6010_v1, %v12266_v17  ;;  %v5715_v2 = vadd.f32 %v11551_v21, %v11477_v29  ;;  %v5707_v29 = vadd.f32 %v11479_v44, %v11445_v6 }
 0x4ae   : > { %6101 = vxpose.xlu1.b32.cont [3/16] (narrow) %v6069_v22, 8  ;;  %v6040_v22 = vadd.f32 %v6008_v28, %v12264_v15  ;;  %v5972_v47 = vadd.f32 %v5845_v50, %v5704_v10  ;;  %v6041_v8 = vadd.f32 %v6009_v55, %v12265_v37  ;;  %v5713_v28 = vadd.f32 %v11532_v18, %v11469_v27  ;;  %v5657_v27 = vpop.f32.mrf.mxu0 }
 0x4af   : > { %v8312_v36 = vpop.f32.mrf.mxu1  ;;  %v5973_v63 = vadd.f32 %v8309_v42, %v5705_v54  ;;  %v5712_v50 = vadd.f32 %v11543_v39, %v11474_v23  ;;  %v6074_v10 = vmax.f32 %v6042_v30, 0.0  ;;  %v5717_v37 = vadd.f32 %v11562_v19, %v11485_v49 }
 0x4b0   : > { %v6072_v5 = vmax.f32 %v6040_v22, 0.0  ;;  %v6011_v48 = vadd.f32 %v11541_v51, %v5972_v47  ;;  %v5714_v22 = vadd.f32 %v5627_v61, %v11482_v46  ;;  %v5975_v54 = vadd.f32 %v8312_v36, %v5707_v29 }
 0x4b1   : > { %v5855_v35 = vpop.f32.mrf.mxu1  ;;  %v6012_v23 = vadd.f32 %v11541_v51, %v5973_v63  ;;  %v12268_v63 = vld [vmem:[#allocation16_spill] sm:$0xff]  ;;  %v5708_v19 = vadd.f32 %v11503_v3, %v11458_v11  ;;  %v5718_v36 = vadd.f32 %v5647_v32, %v11498_v40  ;;  %v12269_v11 = vld [vmem:[#allocation18_spill] sm:$0xff] }
 0x4b2   : > { %6102 = vxpose.xlu1.b32.cont [4/16] (narrow) %v6070_v26, 8  ;;  %v5974_v1 = vadd.f32 %v5855_v35, %v5706_v38  ;;  %v5716_v35 = vadd.f32 %v5637_v52, %v11490_v9 }
 0x4b3   : > { %v11572_v7 = vpop.f32.mrf.mxu1 }
 0x4b4   : > { %v6013_v17 = vadd.f32 %v11541_v51, %v5974_v1  ;;  %v12270_v1 = vld [vmem:[#allocation20_spill] sm:$0xff] }
 0x4b5   : > { %v5865_v0 = vpop.f32.mrf.mxu1 }
 0x4b6   : > { %6103 = vxpose.xlu1.b32.cont [5/16] (narrow) %v6071_v41, 8  ;;  %v6073_v41 = vmax.f32 %v6041_v8, 0.0  ;;  %v8286_v8 = vpop.f32.mrf.mxu0  ;;  %v5976_v38 = vadd.f32 %v5865_v0, %v5708_v19  ;;  %v6045_v3 = vadd.f32 %v6013_v17, %v12269_v11  ;;  %v5720_v0 = vadd.f32 %v5657_v27, %v11506_v57  ;;  %v12272_v19 = vld [vmem:[#allocation24_spill] sm:$0xff] }
 0x4b7   : > { %v11579_v59 = vpop.f32.mrf.mxu1  ;;  %v5723_v29 = vadd.f32 %v8286_v8, %v11509_v25  ;;  %v12271_v25 = vld [vmem:[#allocation22_spill] sm:$0xff]  ;;  %v5711_v8 = vadd.f32 %v11511_v13, %v11461_v31 }
 0x4b9   : > { %v11584_v26 = vpop.f32.mrf.mxu1 }
 0x4ba   : > { %6104 = vxpose.xlu1.b32.cont [6/16] (narrow) %v6072_v5, 8  ;;  %v6043_v5 = vadd.f32 %v6011_v48, %v12267_v53  ;;  %v5667_v48 = vpop.f32.mrf.mxu0  ;;  %v6015_v53 = vadd.f32 %v11541_v51, %v5976_v38 }
 0x4bb   : > { %v8321_v12 = vpop.f32.mrf.mxu1  ;;  %v5722_v27 = vadd.f32 %v5667_v48, %v11514_v20 }
 0x4bc   : > { %v5981_v55 = vadd.f32 %v8321_v12, %v5713_v28  ;;  %v6044_v12 = vadd.f32 %v6012_v23, %v12268_v63  ;;  %v6075_v30 = vmax.f32 %v6043_v5, 0.0  ;;  %v8289_v23 = vpop.f32.mrf.mxu0  ;;  %v5710_v5 = vadd.f32 %v11521_v62, %v11466_v45 }
 0x4bd   : > { %v5885_v15 = vpop.f32.mrf.mxu1  ;;  %v6047_v62 = vadd.f32 %v6015_v53, %v12271_v25  ;;  %v5725_v17 = vadd.f32 %v8289_v23, %v11517_v33  ;;  %v12276_v53 = vld [vmem:[#allocation30_spill] sm:$0xff]  ;;  %v12282_v25 = vld [vmem:[#allocation43_spill] sm:$0xff] }
 0x4be   : > { %v11597_v18 = vadd.f32 %v11541_v51, %v5981_v55  ;;  %v5980_v42 = vadd.f32 %v5885_v15, %v5712_v50  ;;  %6105 = vxpose.xlu1.b32.cont [7/16] (narrow) %v6073_v41, 8  ;;  %v5719_v50 = vadd.f32 %v8280_v24, %v11493_v56  ;;  %v6014_v55 = vadd.f32 %v11541_v51, %v5975_v54 }
 0x4bf   : > { %v8324_v39 = vpop.f32.mrf.mxu1  ;;  %v6076_v15 = vmax.f32 %v6044_v12, 0.0  ;;  %v5709_v56 = vadd.f32 %v11495_v14, %v11453_v58 }
 0x4c0   : > { %v11602_v47 = vadd.f32 %v11541_v51, %v5980_v42  ;;  %v5983_v16 = vadd.f32 %v8324_v39, %v5715_v2 }
 0x4c1   : > { %v5895_v21 = vpop.f32.mrf.mxu1  ;;  %v5977_v39 = vadd.f32 %v11572_v7, %v5709_v56 }
 0x4c2   : > { %v11610_v46 = vadd.f32 %v11541_v51, %v5983_v16  ;;  %v5982_v61 = vadd.f32 %v5895_v21, %v5714_v22  ;;  %6106 = vxpose.xlu1.b32.cont [8/16] (narrow) %v6074_v10, 8  ;;  %v5721_v22 = vadd.f32 %v8283_v4, %v11501_v34  ;;  %v6046_v16 = vadd.f32 %v6014_v55, %v12270_v1  ;;  %v5677_v21 = vpop.f32.mrf.mxu0 }
 0x4c3   : > { %v8327_v28 = vpop.f32.mrf.mxu1  ;;  %v6077_v34 = vmax.f32 %v6045_v3, 0.0 }
 0x4c4   : > { %v11616_v6 = vadd.f32 %v11541_v51, %v5982_v61  ;;  %v5985_v44 = vadd.f32 %v8327_v28, %v5717_v37  ;;  %v6016_v37 = vadd.f32 %v11541_v51, %v5977_v39  ;;  %v8292_v54 = vpop.f32.mrf.mxu0  ;;  %v5978_v28 = vadd.f32 %v11584_v26, %v5710_v5 }
 0x4c5   : > { %v5905_v49 = vpop.f32.mrf.mxu1  ;;  %v5979_v26 = vadd.f32 %v11579_v59, %v5711_v8  ;;  %v5727_v55 = vadd.f32 %v8292_v54, %v11528_v43  ;;  %v12283_v8 = vld [vmem:[#allocation45_spill] sm:$0xff] }
 0x4c6   : > { %v11622_v9 = vadd.f32 %v11541_v51, %v5985_v44  ;;  %v5984_v52 = vadd.f32 %v5905_v49, %v5716_v35  ;;  %6107 = vxpose.xlu1.b32.cont [9/16] (narrow) %v6075_v30, 8  ;;  %v6078_v35 = vmax.f32 %v6046_v16, 0.0  ;;  %v5724_v30 = vadd.f32 %v5677_v21, %v11524_v60  ;;  %v5687_v48 = vpop.f32.mrf.mxu0  ;;  %v12273_v60 = vld [vmem:[#allocation139_spill] sm:$0xff]  ;;  %v12278_v21 = vld [vmem:[#allocation34_spill] sm:$0xff] }
 0x4c7   : > { %v8330_v41 = vpop.f32.mrf.mxu1  ;;  %v5726_v38 = vadd.f32 %v5687_v48, %v12273_v60  ;;  %v6018_v59 = vadd.f32 %v11541_v51, %v5979_v26  ;;  %v12291_v60 = vld [vmem:[#allocation64_spill] sm:$0xff] }
 0x4c8   : > { %v11627_v2 = vadd.f32 %v11541_v51, %v5984_v52  ;;  %v5987_v42 = vadd.f32 %v8330_v41, %v5719_v50  ;;  %v6048_v50 = vadd.f32 %v6016_v37, %v12272_v19  ;;  %v6017_v52 = vadd.f32 %v11541_v51, %v5978_v28  ;;  %v12281_v28 = vld [vmem:[#allocation41_spill] sm:$0xff] }
 0x4c9   : > { %v5915_v24 = vpop.f32.mrf.mxu1 }
 0x4ca   : > { %v11634_v40 = vadd.f32 %v11541_v51, %v5987_v42  ;;  %v5986_v32 = vadd.f32 %v5915_v24, %v5718_v36  ;;  %6108 = vxpose.xlu1.b32.cont [10/16] (narrow) %v6076_v15, 8  ;;  %v6079_v36 = vmax.f32 %v6047_v62, 0.0  ;;  %v6080_v56 = vmax.f32 %v6048_v50, 0.0  ;;  %v12274_v24 = vld [vmem:[#allocation26_spill] sm:$0xff]  ;;  %v12287_v50 = vld [vmem:[#allocation53_spill] sm:$0xff] }
 0x4cb   : > { %v8333_v10 = vpop.f32.mrf.mxu1 }
 0x4cc   : > { %v11641_v58 = vadd.f32 %v11541_v51, %v5986_v32  ;;  %v5989_v14 = vadd.f32 %v8333_v10, %v5721_v22  ;;  %v6049_v22 = vadd.f32 %v6017_v52, %v12274_v24  ;;  %v12275_v10 = vld [vmem:[#allocation28_spill] sm:$0xff]  ;;  %v12288_v52 = vld [vmem:[#allocation55_spill] sm:$0xff] }
 0x4cd   : > { %v5925_v4 = vpop.f32.mrf.mxu1  ;;  %v6050_v1 = vadd.f32 %v6018_v59, %v12275_v10 }
 0x4ce   : > { %v11647_v57 = vadd.f32 %v11541_v51, %v5989_v14  ;;  %v5988_v7 = vadd.f32 %v5925_v4, %v5720_v0  ;;  %6109 = vxpose.xlu1.b32.cont [11/16] (narrow) %v6077_v34, 8  ;;  %v6081_v39 = vmax.f32 %v6049_v22, 0.0  ;;  %v6051_v14 = vadd.f32 %v11602_v47, %v12276_v53  ;;  %v12277_v4 = vld [vmem:[#allocation32_spill] sm:$0xff] }
 0x4cf   : > { %v8336_v61 = vpop.f32.mrf.mxu1  ;;  %v6082_v16 = vmax.f32 %v6050_v1, 0.0  ;;  %v6052_v5 = vadd.f32 %v11597_v18, %v12277_v4  ;;  %v6056_v18 = vadd.f32 %v11622_v9, %v12281_v28 }
 0x4d0   : > { %v11653_v63 = vadd.f32 %v11541_v51, %v5988_v7  ;;  %v5991_v45 = vadd.f32 %v8336_v61, %v5723_v29  ;;  %v6083_v34 = vmax.f32 %v6051_v14, 0.0  ;;  %v6053_v7 = vadd.f32 %v11616_v6, %v12278_v21 }
 0x4d1   : > { %v5935_v12 = vpop.f32.mrf.mxu1  ;;  %v6084_v29 = vmax.f32 %v6052_v5, 0.0  ;;  %v6057_v6 = vadd.f32 %v11641_v58, %v12282_v25 }
 0x4d2   : > { %v11660_v20 = vadd.f32 %v11541_v51, %v5991_v45  ;;  %v5990_v44 = vadd.f32 %v5935_v12, %v5722_v27  ;;  %6110 = vxpose.xlu1.b32.cont [12/16] (narrow) %v6078_v35, 8  ;;  %v12279_v27 = vld [vmem:[#allocation37_spill] sm:$0xff]  ;;  %v12280_v35 = vld [vmem:[#allocation39_spill] sm:$0xff]  ;;  %v6088_v45 = vmax.f32 %v6056_v18, 0.0 }
 0x4d3   : > { %v8339_v49 = vpop.f32.mrf.mxu1  ;;  %v6054_v37 = vadd.f32 %v11610_v46, %v12279_v27  ;;  %v6055_v47 = vadd.f32 %v11627_v2, %v12280_v35  ;;  %v6089_v62 = vmax.f32 %v6057_v6, 0.0  ;;  %v6058_v46 = vadd.f32 %v11634_v40, %v12283_v8 }
 0x4d4   : > { %v6029_v31 = vadd.f32 %v11541_v51, %v5990_v44  ;;  %v5993_v13 = vadd.f32 %v8339_v49, %v5725_v17  ;;  %v12284_v17 = vld [vmem:[#allocation47_spill] sm:$0xff]  ;;  %v6062_v48 = vadd.f32 %v11660_v20, %v12287_v50 }
 0x4d5   : > { %v5945_v33 = vpop.f32.mrf.mxu1  ;;  %v6086_v61 = vmax.f32 %v6054_v37, 0.0  ;;  %v6087_v54 = vmax.f32 %v6055_v47, 0.0  ;;  %v6090_v12 = vmax.f32 %v6058_v46, 0.0  ;;  %v6059_v2 = vadd.f32 %v11653_v63, %v12284_v17  ;;  %v12286_v49 = vld [vmem:[#allocation51_spill] sm:$0xff] }
 0x4d6   : > { %v6032_v41 = vadd.f32 %v11541_v51, %v5993_v13  ;;  %v5992_v15 = vadd.f32 %v5945_v33, %v5724_v30  ;;  %6111 = vxpose.xlu1.b32.cont [13/16] (narrow) %v6079_v36, 8  ;;  %v12285_v30 = vld [vmem:[#allocation49_spill] sm:$0xff]  ;;  %v6061_v19 = vadd.f32 %v6029_v31, %v12286_v49  ;;  %v6094_v40 = vmax.f32 %v6062_v48, 0.0 }
 0x4d7   : > { %v8342_v42 = vpop.f32.mrf.mxu1  ;;  %v6091_v44 = vmax.f32 %v6059_v2, 0.0  ;;  %v6060_v9 = vadd.f32 %v11647_v57, %v12285_v30  ;;  %v12289_v36 = vld [vmem:[#allocation57_spill] sm:$0xff] }
 0x4d8   : > { %v6031_v11 = vadd.f32 %v11541_v51, %v5992_v15  ;;  %v5995_v3 = vadd.f32 %v8342_v42, %v5727_v55  ;;  %v6093_v58 = vmax.f32 %v6061_v19, 0.0  ;;  %v6064_v33 = vadd.f32 %v6032_v41, %v12289_v36  ;;  %v12290_v55 = vld [vmem:[#allocation62_spill] sm:$0xff] }
 0x4d9   : > { %v5955_v23 = vpop.f32.mrf.mxu1  ;;  %v6092_v26 = vmax.f32 %v6060_v9, 0.0 }
 0x4da   : > { %v6034_v32 = vadd.f32 %v11541_v51, %v5995_v3  ;;  %v5994_v0 = vadd.f32 %v5955_v23, %v5726_v38  ;;  %6112 = vxpose.xlu1.b32.cont [14/16] (narrow) %v6080_v56, 8  ;;  %v6063_v13 = vadd.f32 %v6031_v11, %v12288_v52  ;;  %v6096_v57 = vmax.f32 %v6064_v33, 0.0 }
 0x4dc   : > { %v6033_v43 = vadd.f32 %v11541_v51, %v5994_v0  ;;  %v6085_v51 = vmax.f32 %v6053_v7, 0.0  ;;  %v6095_v63 = vmax.f32 %v6063_v13, 0.0  ;;  %v6066_v38 = vadd.f32 %v6034_v32, %v12291_v60 }
 0x4de   : > { %6113 = vxpose.xlu1.b32.cont [15/16] (narrow) %v6081_v39, 8  ;;  %v6065_v15 = vadd.f32 %v6033_v43, %v12290_v55  ;;  %v6098_v59 = vmax.f32 %v6066_v38, 0.0 }
 0x4e0   : > { %v6097_v31 = vmax.f32 %v6065_v15, 0.0 }
 0x4e2   : > { %6114 = vxpose.xlu1.b32.end [16/16] (narrow) %v6082_v16, 8 }
 0x4e6   : > { %6131 = vxpose.xlu1.b32.start [1/16] (narrow) %v6083_v34, 8 }
 0x4ea   : > { %6132 = vxpose.xlu1.b32.cont [2/16] (narrow) %v6084_v29, 8 }
 0x4ee   : > { %6133 = vxpose.xlu1.b32.cont [3/16] (narrow) %v6085_v51, 8 }
 0x4f2   : > { %6134 = vxpose.xlu1.b32.cont [4/16] (narrow) %v6086_v61, 8 }
 0x4f6   : > { %6135 = vxpose.xlu1.b32.cont [5/16] (narrow) %v6087_v54, 8 }
 0x4fa   : > { %6136 = vxpose.xlu1.b32.cont [6/16] (narrow) %v6088_v45, 8 }
 0x4fe   : > { %6137 = vxpose.xlu1.b32.cont [7/16] (narrow) %v6089_v62, 8 }
 0x502   : > { %6138 = vxpose.xlu1.b32.cont [8/16] (narrow) %v6090_v12, 8 }
 0x506   : > { %6139 = vxpose.xlu1.b32.cont [9/16] (narrow) %v6091_v44, 8 }
 0x50a   : > { %6140 = vxpose.xlu1.b32.cont [10/16] (narrow) %v6092_v26, 8 }
 0x50e   : > { %6141 = vxpose.xlu1.b32.cont [11/16] (narrow) %v6093_v58, 8 }
 0x512   : > { %6142 = vxpose.xlu1.b32.cont [12/16] (narrow) %v6094_v40, 8 }
 0x516   : > { %6143 = vxpose.xlu1.b32.cont [13/16] (narrow) %v6095_v63, 8 }
 0x51a   : > { %6144 = vxpose.xlu1.b32.cont [14/16] (narrow) %v6096_v57, 8 }
 0x51e   : > { %6145 = vxpose.xlu1.b32.cont [15/16] (narrow) %v6097_v31, 8 }
 0x522   : > { %6146 = vxpose.xlu1.b32.end [16/16] (narrow) %v6098_v59, 8  ;;  %v6115_v20 = vpop.trf.xlu1 }
 0x562   : > { %v6147_v42 = vpop.trf.xlu1 }
 0x563   : > { %v6165_v3 = vcombine.low %v6115_v20, %v6147_v42 }
 0x565   : > { %6167 = vst [vmem:[%s8409_s27] sm:$0xff] %v6165_v3 }
 0x566 PF: > { %s15_s18 = sadd.s32 1, %s8360_s18  }
 0x567   : > { %p12_p5 = scmp.ge.s32.totalorder %s15_s18, 4  }
 0x569   :  { %14 = sbr.rel (!%p12_p5) target bundleno = 1 (0x1), region = 92 }

</bundles_post_ra>
